<compile_context>
chip_gen: v5e
topology: v5e:2x2
jax: 0.10.0
libtpu: 0.0.40
codegen_flags: <defaults>
</compile_context>

<pallas_src>
import functools

import jax
import jax.numpy as jnp
from jax.experimental import pallas as pl
from jax.experimental.pallas import tpu as pltpu

EPS = 1e-5          # InstanceNorm2d default eps
NEG_SLOPE = 0.2     # LeakyReLU(0.2)

# 3x3 neighborhood offsets in PyTorch weight order (ky, kx) row-major.
_TAPS = tuple((dy, dx) for dy in (-1, 0, 1) for dx in (-1, 0, 1))


def _instance_norm_rows(t):
    # t: (rows, S) -- normalize each row (one channel of one sample) over S.
    # Two-pass (numerically safe) form; d = t - m is computed once and reused.
    m = jnp.mean(t, axis=-1, keepdims=True)
    d = t - m
    v = jnp.mean(d * d, axis=-1, keepdims=True)
    return d * jax.lax.rsqrt(v + EPS)


def _leaky_relu(t):
    return jnp.where(t >= 0, t, NEG_SLOPE * t)


def _inverted_res_block_kernel(x_ref, w1_ref, wdw_ref, w2_ref, o_ref, *, H, W):
    # x_ref : (Nb, C, S) with S = H*W   channel-major, spatial flattened on lanes
    # w1_ref: (B, C)  bf16   1x1 expand weight  (PyTorch (B, C, 1, 1) squeezed)
    # wdw_ref: (B, 9) f32    depthwise 3x3 taps, row-major (ky, kx)
    # w2_ref: (C, B)  bf16   1x1 project weight (PyTorch (C, B, 1, 1) squeezed)
    # o_ref : (Nb, C, S)
    S = H * W
    Nb = x_ref.shape[0]

    # Weights: loaded once per grid step (VMEM-resident across steps; bf16 pre-cast
    # happens in the wrapper so there is no per-step cast pass).
    w1 = w1_ref[...]                               # (B, C)  bf16
    w2 = w2_ref[...]                               # (C, B)  bf16
    wdw = wdw_ref[...]                             # (B, 9)  f32

    # --- hoisted boundary masks (shared by all samples and all taps) ---
    # 0/1 f32 multipliers of shape (1, S), destination-index based.  They zero
    # both the semantic padding border and the lanes that wrap around in the
    # cyclic roll below.
    pos = jax.lax.broadcasted_iota(jnp.int32, (1, S), 1)    # flat spatial index
    col = pos % W                                           # x coordinate per lane
    keep_x = {-1: (col != 0).astype(jnp.float32),
              0: None,
              1: (col != W - 1).astype(jnp.float32)}
    keep_y = {-1: (pos >= W).astype(jnp.float32),           # zero first row
              0: None,
              1: (pos < S - W).astype(jnp.float32)}         # zero last row
    keep = {}
    for dy, dx in _TAPS:
        ky, kx = keep_y[dy], keep_x[dx]
        if ky is None:
            keep[(dy, dx)] = kx
        elif kx is None:
            keep[(dy, dx)] = ky
        else:
            keep[(dy, dx)] = ky * kx                        # (1, S) product, hoisted

    for n in range(Nb):   # samples are independent (InstanceNorm is per-sample)
        xc = x_ref[n].astype(jnp.float32)                   # (C, S) f32 residual

        # --- 1x1 expand conv (MXU, bf16 operands, f32 acc) + IN + LeakyReLU ---
        h = jnp.dot(w1, xc.astype(jnp.bfloat16),
                    preferred_element_type=jnp.float32)     # (B, S)
        h = _leaky_relu(_instance_norm_rows(h))

        # --- depthwise 3x3 conv, padding=1, in registers ---
        # tap(dy,dx)[b, y*W + x] = h[b, (y+dy)*W + (x+dx)], zero outside the image.
        # Implemented as a cyclic roll along the flat spatial (lane) axis (XLU)
        # plus the hoisted edge masks.  Keep this stage in f32 (safe on v5e).
        terms = []
        for k, (dy, dx) in enumerate(_TAPS):
            d = dy * W + dx
            t = h if d == 0 else pltpu.roll(h, (-d) % S, axis=1)
            m = keep[(dy, dx)]
            if m is not None:
                t = t * m
            terms.append(t * wdw[:, k:k + 1])
        # Pairwise (tree) reduction of the 9 taps -- breaks the serial add chain.
        while len(terms) > 1:
            nxt = [terms[i] + terms[i + 1] for i in range(0, len(terms) - 1, 2)]
            if len(terms) % 2:
                nxt.append(terms[-1])
            terms = nxt
        h2 = _leaky_relu(_instance_norm_rows(terms[0]))      # (B, S)

        # --- 1x1 project conv (MXU, bf16 operands) + IN + residual ---
        out = jnp.dot(w2, h2.astype(jnp.bfloat16),
                      preferred_element_type=jnp.float32)    # (C, S)
        o_ref[n] = (_instance_norm_rows(out) + xc).astype(o_ref.dtype)


def _pick_samples_per_step(N, C, Bc, S, budget_bytes=8 * 1024 * 1024):
    # Rough f32 residency per sample: x/out at C rows; h / tap terms / h2 at B rows.
    per_sample = (4 * Bc + 2 * C) * S * 4
    return int(max(1, min(N, 8, budget_bytes // max(per_sample, 1))))


def _inverted_res_block_flat(x_flat, w1b, wdw9, w2b, H, W, Nb):
    # x_flat: (N, C, H*W) with N a multiple of Nb.  One grid step per Nb samples;
    # weights have constant index_maps so they stay VMEM-resident across steps.
    N, C, S = x_flat.shape
    Bc = w1b.shape[0]
    assert N % Nb == 0
    kernel = functools.partial(_inverted_res_block_kernel, H=H, W=W)
    return pl.pallas_call(
        kernel,
        out_shape=jax.ShapeDtypeStruct((N, C, S), x_flat.dtype),
        grid_spec=pltpu.PrefetchScalarGridSpec(
            num_scalar_prefetch=0,
            grid=(N // Nb,),
            in_specs=[
                pl.BlockSpec((Nb, C, S), lambda g: (g, 0, 0)),
                pl.BlockSpec((Bc, C), lambda g: (0, 0)),
                pl.BlockSpec((Bc, 9), lambda g: (0, 0)),
                pl.BlockSpec((C, Bc), lambda g: (0, 0)),
            ],
            out_specs=pl.BlockSpec((Nb, C, S), lambda g: (g, 0, 0)),
        ),
        compiler_params=pltpu.CompilerParams(
            dimension_semantics=("parallel",),          # samples independent
            vmem_limit_bytes=48 * 1024 * 1024,          # v5e default is only 16 MiB
        ),
    )(x_flat, w1b, wdw9, w2b)


@jax.jit
def inverted_res_block(x_nchw, w1, wdw, w2):
    # PyTorch-style NCHW interface.  The kernel is channel-major, so
    # NCHW -> (N, C, H*W) is a free contiguous reshape (no transposes).
    N, C, H, W = x_nchw.shape
    Bc = w1.shape[0]
    S = H * W

    # Pre-cast the two 1x1 weights to bf16 once (MXU operands); taps stay f32.
    w1b = jnp.reshape(w1, (Bc, C)).astype(jnp.bfloat16)
    w2b = jnp.reshape(w2, (C, Bc)).astype(jnp.bfloat16)
    wdw9 = jnp.reshape(wdw, (Bc, 9)).astype(jnp.float32)

    Nb = _pick_samples_per_step(N, C, Bc, S)
    Np = ((N + Nb - 1) // Nb) * Nb
    x_flat = x_nchw.reshape(N, C, S)
    if Np != N:
        # Zero padding is safe: InstanceNorm of an all-zero channel stays finite.
        x_flat = jnp.pad(x_flat, ((0, Np - N), (0, 0), (0, 0)))

    y = _inverted_res_block_flat(x_flat, w1b, wdw9, w2b, H, W, Nb)
    if Np != N:
        y = y[:N]
    return y.reshape(N, C, H, W)


def reference_nchw(x, w1, wdw, w2):
    # Pure-JAX reference with the same precision policy (bf16 MXU operands,
    # f32 accumulation, f32 InstanceNorm statistics, f32 depthwise taps).
    def inorm(t):
        m = t.mean(axis=(2, 3), keepdims=True)
        v = ((t - m) ** 2).mean(axis=(2, 3), keepdims=True)
        return (t - m) * jax.lax.rsqrt(v + EPS)

    def lrelu(t):
        return jnp.where(t >= 0, t, NEG_SLOPE * t)

    N, C, H, W = x.shape
    h = jnp.einsum('bc,nchw->nbhw', w1.astype(jnp.bfloat16), x.astype(jnp.bfloat16),
                   preferred_element_type=jnp.float32)
    h = lrelu(inorm(h))
    hp = jnp.pad(h, ((0, 0), (0, 0), (1, 1), (1, 1)))
    acc = jnp.zeros_like(h)
    for ky in range(3):
        for kx in range(3):
            acc = acc + hp[:, :, ky:ky + H, kx:kx + W] * wdw[:, ky, kx][None, :, None, None]
    h2 = lrelu(inorm(acc))
    out = jnp.einsum('cb,nbhw->nchw', w2.astype(jnp.bfloat16), h2.astype(jnp.bfloat16),
                     preferred_element_type=jnp.float32)
    return inorm(out) + x


if __name__ == "__main__":
    # Small shapes consistent with the module (channels=out_channels, expand_ratio=2).
    N, C, H, W = 2, 32, 16, 16
    expand_ratio = 2
    B = round(expand_ratio * C)

    key = jax.random.PRNGKey(0)
    kx, k1, kd, k2 = jax.random.split(key, 4)

    # Weights in native PyTorch layouts (squeezed 1x1 / depthwise kernels):
    #   conv_block.conv.weight: (B, C, 1, 1) -> (B, C)
    #   depthwise_conv.weight : (B, 1, 3, 3) -> (B, 3, 3)
    #   conv.weight           : (C, B, 1, 1) -> (C, B)
    x = jax.random.normal(kx, (N, C, H, W), jnp.float32)
    w1 = jax.random.normal(k1, (B, C), jnp.float32) * 0.1
    wdw = jax.random.normal(kd, (B, 3, 3), jnp.float32) * 0.1
    w2 = jax.random.normal(k2, (C, B), jnp.float32) * 0.1

    y = jax.block_until_ready(inverted_res_block(x, w1, wdw, w2))

    y_ref = reference_nchw(x, w1, wdw, w2)
    assert y.shape == (N, C, H, W)
    err = float(jnp.max(jnp.abs(y - y_ref)))
    assert jnp.allclose(y, y_ref, atol=1e-2, rtol=1e-2), err

    print("KERNEL_OK")
</pallas_src>

<mosaic_0001>
module attributes {stable_mosaic.version = 11 : i64} {
  func.func @_inverted_res_block_kernel(%arg0: i32, %arg1: memref<2x32x256xf32, #tpu.memory_space<vmem>>, %arg2: memref<64x32xbf16, #tpu.memory_space<vmem>>, %arg3: memref<64x9xf32, #tpu.memory_space<vmem>>, %arg4: memref<32x64xbf16, #tpu.memory_space<vmem>>, %arg5: memref<2x32x256xf32, #tpu.memory_space<vmem>>) attributes {dimension_semantics = [#tpu.dimension_semantics<parallel>], iteration_bounds = array<i64: 1>, scalar_prefetch = 0 : i64, scratch_operands = 0 : i64, tpu.core_type = #tpu.core_type<tc>, window_params = [{transform_indices = @transform_0, window_bounds = array<i64: 2, 32, 256>}, {pipeline_mode = #tpu.pipeline_mode<synchronous>, transform_indices = @transform_1, window_bounds = array<i64: 64, 32>}, {pipeline_mode = #tpu.pipeline_mode<synchronous>, transform_indices = @transform_2, window_bounds = array<i64: 64, 9>}, {pipeline_mode = #tpu.pipeline_mode<synchronous>, transform_indices = @transform_3, window_bounds = array<i64: 32, 64>}, {transform_indices = @transform_4, window_bounds = array<i64: 2, 32, 256>}]} {
    %c0 = arith.constant 0 : index
    %c0_0 = arith.constant 0 : index
    %0 = vector.load %arg2[%c0, %c0_0] : memref<64x32xbf16, #tpu.memory_space<vmem>>, vector<64x32xbf16>
    %c0_1 = arith.constant 0 : index
    %c0_2 = arith.constant 0 : index
    %1 = vector.load %arg4[%c0_1, %c0_2] : memref<32x64xbf16, #tpu.memory_space<vmem>>, vector<32x64xbf16>
    %c0_3 = arith.constant 0 : index
    %c0_4 = arith.constant 0 : index
    %2 = vector.load %arg3[%c0_3, %c0_4] : memref<64x9xf32, #tpu.memory_space<vmem>>, vector<64x9xf32>
    %3 = tpu.iota {dimensions = array<i32: 1>} : vector<1x256xi32>
    %c16_i32 = arith.constant 16 : i32
    %c0_i32 = arith.constant 0 : i32
    %4 = arith.cmpi eq, %c16_i32, %c0_i32 : i32
    %c1_i32 = arith.constant 1 : i32
    %5 = arith.select %4, %c1_i32, %c16_i32 : i32
    %6 = vector.broadcast %5 : i32 to vector<1x256xi32>
    %7 = arith.remsi %3, %6 : vector<1x256xi32>
    %c0_i32_5 = arith.constant 0 : i32
    %8 = vector.broadcast %c0_i32_5 : i32 to vector<1x256xi32>
    %9 = arith.cmpi ne, %7, %8 : vector<1x256xi32>
    %c0_i32_6 = arith.constant 0 : i32
    %10 = vector.broadcast %c0_i32_6 : i32 to vector<1x256xi32>
    %11 = arith.cmpi slt, %7, %10 : vector<1x256xi32>
    %c0_i32_7 = arith.constant 0 : i32
    %12 = arith.cmpi slt, %5, %c0_i32_7 : i32
    %13 = vector.broadcast %12 : i1 to vector<1x256xi1>
    %14 = vector.broadcast %13 : vector<1x256xi1> to vector<1x256xi1>
    %15 = arith.xori %11, %14 : vector<1x256xi1>
    %16 = arith.andi %15, %9 : vector<1x256xi1>
    %17 = vector.broadcast %5 : i32 to vector<1x256xi32>
    %18 = arith.addi %7, %17 : vector<1x256xi32>
    %19 = arith.select %16, %18, %7 : vector<1x256xi1>, vector<1x256xi32>
    %c0_i32_8 = arith.constant 0 : i32
    %20 = vector.broadcast %c0_i32_8 : i32 to vector<1x256xi32>
    %21 = arith.cmpi ne, %19, %20 : vector<1x256xi32>
    %22 = arith.extui %21 : vector<1x256xi1> to vector<1x256xi32>
    %23 = arith.sitofp %22 : vector<1x256xi32> to vector<1x256xf32>
    %c15_i32 = arith.constant 15 : i32
    %24 = vector.broadcast %c15_i32 : i32 to vector<1x256xi32>
    %25 = arith.cmpi ne, %19, %24 : vector<1x256xi32>
    %26 = arith.extui %25 : vector<1x256xi1> to vector<1x256xi32>
    %27 = arith.sitofp %26 : vector<1x256xi32> to vector<1x256xf32>
    %c16_i32_9 = arith.constant 16 : i32
    %28 = vector.broadcast %c16_i32_9 : i32 to vector<1x256xi32>
    %29 = arith.cmpi sge, %3, %28 : vector<1x256xi32>
    %30 = arith.extui %29 : vector<1x256xi1> to vector<1x256xi32>
    %31 = arith.sitofp %30 : vector<1x256xi32> to vector<1x256xf32>
    %c240_i32 = arith.constant 240 : i32
    %32 = vector.broadcast %c240_i32 : i32 to vector<1x256xi32>
    %33 = arith.cmpi slt, %3, %32 : vector<1x256xi32>
    %34 = arith.extui %33 : vector<1x256xi1> to vector<1x256xi32>
    %35 = arith.sitofp %34 : vector<1x256xi32> to vector<1x256xf32>
    %36 = arith.mulf %31, %23 : vector<1x256xf32>
    %37 = arith.mulf %31, %27 : vector<1x256xf32>
    %38 = arith.mulf %35, %23 : vector<1x256xf32>
    %39 = arith.mulf %35, %27 : vector<1x256xf32>
    %c0_10 = arith.constant 0 : index
    %c0_11 = arith.constant 0 : index
    %c0_12 = arith.constant 0 : index
    %40 = vector.load %arg1[%c0_10, %c0_11, %c0_12] : memref<2x32x256xf32, #tpu.memory_space<vmem>>, vector<1x32x256xf32>
    %41 = vector.shape_cast %40 : vector<1x32x256xf32> to vector<32x256xf32>
    %42 = arith.truncf %41 : vector<32x256xf32> to vector<32x256xbf16>
    %cst = arith.constant dense<0.000000e+00> : vector<64x256xf32>
    %43 = tpu.matmul %0, %42, %cst {dimension_numbers = #tpu.dot_dimension_numbers<[1], [0], [0], [1], [0, 0, 1, 1], [], []>} : vector<64x32xbf16>, vector<32x256xbf16>, vector<64x256xf32> -> vector<64x256xf32>
    %cst_13 = arith.constant dense<0.000000e+00> : vector<64xf32>
    %44 = vector.multi_reduction <add>, %43, %cst_13 [1] : vector<64x256xf32> to vector<64xf32>
    %45 = vector.shape_cast %44 : vector<64xf32> to vector<64x1xf32>
    %cst_14 = arith.constant 2.560000e+02 : f32
    %46 = vector.broadcast %cst_14 : f32 to vector<64x1xf32>
    %47 = arith.divf %45, %46 : vector<64x1xf32>
    %48 = vector.broadcast %47 : vector<64x1xf32> to vector<64x256xf32>
    %49 = arith.subf %43, %48 : vector<64x256xf32>
    %50 = arith.mulf %49, %49 : vector<64x256xf32>
    %cst_15 = arith.constant dense<0.000000e+00> : vector<64xf32>
    %51 = vector.multi_reduction <add>, %50, %cst_15 [1] : vector<64x256xf32> to vector<64xf32>
    %52 = vector.shape_cast %51 : vector<64xf32> to vector<64x1xf32>
    %cst_16 = arith.constant 2.560000e+02 : f32
    %53 = vector.broadcast %cst_16 : f32 to vector<64x1xf32>
    %54 = arith.divf %52, %53 : vector<64x1xf32>
    %cst_17 = arith.constant 9.99999974E-6 : f32
    %55 = vector.broadcast %cst_17 : f32 to vector<64x1xf32>
    %56 = arith.addf %54, %55 : vector<64x1xf32>
    %57 = math.rsqrt %56 : vector<64x1xf32>
    %58 = vector.broadcast %57 : vector<64x1xf32> to vector<64x256xf32>
    %59 = arith.mulf %49, %58 : vector<64x256xf32>
    %cst_18 = arith.constant 0.000000e+00 : f32
    %60 = vector.broadcast %cst_18 : f32 to vector<64x256xf32>
    %61 = arith.cmpf oge, %59, %60 : vector<64x256xf32>
    %cst_19 = arith.constant 2.000000e-01 : f32
    %62 = vector.broadcast %cst_19 : f32 to vector<64x256xf32>
    %63 = arith.mulf %62, %59 : vector<64x256xf32>
    %64 = arith.select %61, %59, %63 : vector<64x256xi1>, vector<64x256xf32>
    %c17_i32 = arith.constant 17 : i32
    %65 = tpu.dynamic_rotate %64 by %c17_i32 dim 1 : vector<64x256xf32>, i32 -> vector<64x256xf32>
    %66 = vector.broadcast %36 : vector<1x256xf32> to vector<64x256xf32>
    %67 = arith.mulf %65, %66 : vector<64x256xf32>
    %68 = vector.extract_strided_slice %2 {offsets = [0, 0], sizes = [64, 1], strides = [1, 1]} : vector<64x9xf32> to vector<64x1xf32>
    %69 = vector.broadcast %68 : vector<64x1xf32> to vector<64x256xf32>
    %70 = arith.mulf %67, %69 : vector<64x256xf32>
    %c16_i32_20 = arith.constant 16 : i32
    %71 = tpu.dynamic_rotate %64 by %c16_i32_20 dim 1 : vector<64x256xf32>, i32 -> vector<64x256xf32>
    %72 = vector.broadcast %31 : vector<1x256xf32> to vector<64x256xf32>
    %73 = arith.mulf %71, %72 : vector<64x256xf32>
    %74 = vector.extract_strided_slice %2 {offsets = [0, 1], sizes = [64, 1], strides = [1, 1]} : vector<64x9xf32> to vector<64x1xf32>
    %75 = vector.broadcast %74 : vector<64x1xf32> to vector<64x256xf32>
    %76 = arith.mulf %73, %75 : vector<64x256xf32>
    %c15_i32_21 = arith.constant 15 : i32
    %77 = tpu.dynamic_rotate %64 by %c15_i32_21 dim 1 : vector<64x256xf32>, i32 -> vector<64x256xf32>
    %78 = vector.broadcast %37 : vector<1x256xf32> to vector<64x256xf32>
    %79 = arith.mulf %77, %78 : vector<64x256xf32>
    %80 = vector.extract_strided_slice %2 {offsets = [0, 2], sizes = [64, 1], strides = [1, 1]} : vector<64x9xf32> to vector<64x1xf32>
    %81 = vector.broadcast %80 : vector<64x1xf32> to vector<64x256xf32>
    %82 = arith.mulf %79, %81 : vector<64x256xf32>
    %c1_i32_22 = arith.constant 1 : i32
    %83 = tpu.dynamic_rotate %64 by %c1_i32_22 dim 1 : vector<64x256xf32>, i32 -> vector<64x256xf32>
    %84 = vector.broadcast %23 : vector<1x256xf32> to vector<64x256xf32>
    %85 = arith.mulf %83, %84 : vector<64x256xf32>
    %86 = vector.extract_strided_slice %2 {offsets = [0, 3], sizes = [64, 1], strides = [1, 1]} : vector<64x9xf32> to vector<64x1xf32>
    %87 = vector.broadcast %86 : vector<64x1xf32> to vector<64x256xf32>
    %88 = arith.mulf %85, %87 : vector<64x256xf32>
    %89 = vector.extract_strided_slice %2 {offsets = [0, 4], sizes = [64, 1], strides = [1, 1]} : vector<64x9xf32> to vector<64x1xf32>
    %90 = vector.broadcast %89 : vector<64x1xf32> to vector<64x256xf32>
    %91 = arith.mulf %64, %90 : vector<64x256xf32>
    %c255_i32 = arith.constant 255 : i32
    %92 = tpu.dynamic_rotate %64 by %c255_i32 dim 1 : vector<64x256xf32>, i32 -> vector<64x256xf32>
    %93 = vector.broadcast %27 : vector<1x256xf32> to vector<64x256xf32>
    %94 = arith.mulf %92, %93 : vector<64x256xf32>
    %95 = vector.extract_strided_slice %2 {offsets = [0, 5], sizes = [64, 1], strides = [1, 1]} : vector<64x9xf32> to vector<64x1xf32>
    %96 = vector.broadcast %95 : vector<64x1xf32> to vector<64x256xf32>
    %97 = arith.mulf %94, %96 : vector<64x256xf32>
    %c241_i32 = arith.constant 241 : i32
    %98 = tpu.dynamic_rotate %64 by %c241_i32 dim 1 : vector<64x256xf32>, i32 -> vector<64x256xf32>
    %99 = vector.broadcast %38 : vector<1x256xf32> to vector<64x256xf32>
    %100 = arith.mulf %98, %99 : vector<64x256xf32>
    %101 = vector.extract_strided_slice %2 {offsets = [0, 6], sizes = [64, 1], strides = [1, 1]} : vector<64x9xf32> to vector<64x1xf32>
    %102 = vector.broadcast %101 : vector<64x1xf32> to vector<64x256xf32>
    %103 = arith.mulf %100, %102 : vector<64x256xf32>
    %c240_i32_23 = arith.constant 240 : i32
    %104 = tpu.dynamic_rotate %64 by %c240_i32_23 dim 1 : vector<64x256xf32>, i32 -> vector<64x256xf32>
    %105 = vector.broadcast %35 : vector<1x256xf32> to vector<64x256xf32>
    %106 = arith.mulf %104, %105 : vector<64x256xf32>
    %107 = vector.extract_strided_slice %2 {offsets = [0, 7], sizes = [64, 1], strides = [1, 1]} : vector<64x9xf32> to vector<64x1xf32>
    %108 = vector.broadcast %107 : vector<64x1xf32> to vector<64x256xf32>
    %109 = arith.mulf %106, %108 : vector<64x256xf32>
    %c239_i32 = arith.constant 239 : i32
    %110 = tpu.dynamic_rotate %64 by %c239_i32 dim 1 : vector<64x256xf32>, i32 -> vector<64x256xf32>
    %111 = vector.broadcast %39 : vector<1x256xf32> to vector<64x256xf32>
    %112 = arith.mulf %110, %111 : vector<64x256xf32>
    %113 = vector.extract_strided_slice %2 {offsets = [0, 8], sizes = [64, 1], strides = [1, 1]} : vector<64x9xf32> to vector<64x1xf32>
    %114 = vector.broadcast %113 : vector<64x1xf32> to vector<64x256xf32>
    %115 = arith.mulf %112, %114 : vector<64x256xf32>
    %116 = arith.addf %70, %76 : vector<64x256xf32>
    %117 = arith.addf %82, %88 : vector<64x256xf32>
    %118 = arith.addf %91, %97 : vector<64x256xf32>
    %119 = arith.addf %103, %109 : vector<64x256xf32>
    %120 = arith.addf %116, %117 : vector<64x256xf32>
    %121 = arith.addf %118, %119 : vector<64x256xf32>
    %122 = arith.addf %120, %121 : vector<64x256xf32>
    %123 = arith.addf %122, %115 : vector<64x256xf32>
    %cst_24 = arith.constant dense<0.000000e+00> : vector<64xf32>
    %124 = vector.multi_reduction <add>, %123, %cst_24 [1] : vector<64x256xf32> to vector<64xf32>
    %125 = vector.shape_cast %124 : vector<64xf32> to vector<64x1xf32>
    %cst_25 = arith.constant 2.560000e+02 : f32
    %126 = vector.broadcast %cst_25 : f32 to vector<64x1xf32>
    %127 = arith.divf %125, %126 : vector<64x1xf32>
    %128 = vector.broadcast %127 : vector<64x1xf32> to vector<64x256xf32>
    %129 = arith.subf %123, %128 : vector<64x256xf32>
    %130 = arith.mulf %129, %129 : vector<64x256xf32>
    %cst_26 = arith.constant dense<0.000000e+00> : vector<64xf32>
    %131 = vector.multi_reduction <add>, %130, %cst_26 [1] : vector<64x256xf32> to vector<64xf32>
    %132 = vector.shape_cast %131 : vector<64xf32> to vector<64x1xf32>
    %cst_27 = arith.constant 2.560000e+02 : f32
    %133 = vector.broadcast %cst_27 : f32 to vector<64x1xf32>
    %134 = arith.divf %132, %133 : vector<64x1xf32>
    %cst_28 = arith.constant 9.99999974E-6 : f32
    %135 = vector.broadcast %cst_28 : f32 to vector<64x1xf32>
    %136 = arith.addf %134, %135 : vector<64x1xf32>
    %137 = math.rsqrt %136 : vector<64x1xf32>
    %138 = vector.broadcast %137 : vector<64x1xf32> to vector<64x256xf32>
    %139 = arith.mulf %129, %138 : vector<64x256xf32>
    %cst_29 = arith.constant 0.000000e+00 : f32
    %140 = vector.broadcast %cst_29 : f32 to vector<64x256xf32>
    %141 = arith.cmpf oge, %139, %140 : vector<64x256xf32>
    %cst_30 = arith.constant 2.000000e-01 : f32
    %142 = vector.broadcast %cst_30 : f32 to vector<64x256xf32>
    %143 = arith.mulf %142, %139 : vector<64x256xf32>
    %144 = arith.select %141, %139, %143 : vector<64x256xi1>, vector<64x256xf32>
    %145 = arith.truncf %144 : vector<64x256xf32> to vector<64x256xbf16>
    %cst_31 = arith.constant dense<0.000000e+00> : vector<32x256xf32>
    %146 = tpu.matmul %1, %145, %cst_31 {dimension_numbers = #tpu.dot_dimension_numbers<[1], [0], [0], [1], [0, 0, 1, 1], [], []>} : vector<32x64xbf16>, vector<64x256xbf16>, vector<32x256xf32> -> vector<32x256xf32>
    %cst_32 = arith.constant dense<0.000000e+00> : vector<32xf32>
    %147 = vector.multi_reduction <add>, %146, %cst_32 [1] : vector<32x256xf32> to vector<32xf32>
    %148 = vector.shape_cast %147 : vector<32xf32> to vector<32x1xf32>
    %cst_33 = arith.constant 2.560000e+02 : f32
    %149 = vector.broadcast %cst_33 : f32 to vector<32x1xf32>
    %150 = arith.divf %148, %149 : vector<32x1xf32>
    %151 = vector.broadcast %150 : vector<32x1xf32> to vector<32x256xf32>
    %152 = arith.subf %146, %151 : vector<32x256xf32>
    %153 = arith.mulf %152, %152 : vector<32x256xf32>
    %cst_34 = arith.constant dense<0.000000e+00> : vector<32xf32>
    %154 = vector.multi_reduction <add>, %153, %cst_34 [1] : vector<32x256xf32> to vector<32xf32>
    %155 = vector.shape_cast %154 : vector<32xf32> to vector<32x1xf32>
    %cst_35 = arith.constant 2.560000e+02 : f32
    %156 = vector.broadcast %cst_35 : f32 to vector<32x1xf32>
    %157 = arith.divf %155, %156 : vector<32x1xf32>
    %cst_36 = arith.constant 9.99999974E-6 : f32
    %158 = vector.broadcast %cst_36 : f32 to vector<32x1xf32>
    %159 = arith.addf %157, %158 : vector<32x1xf32>
    %160 = math.rsqrt %159 : vector<32x1xf32>
    %161 = vector.broadcast %160 : vector<32x1xf32> to vector<32x256xf32>
    %162 = arith.mulf %152, %161 : vector<32x256xf32>
    %163 = arith.addf %162, %41 : vector<32x256xf32>
    %c0_37 = arith.constant 0 : index
    %c0_38 = arith.constant 0 : index
    %c0_39 = arith.constant 0 : index
    %164 = vector.load %arg5[%c0_37, %c0_38, %c0_39] : memref<2x32x256xf32, #tpu.memory_space<vmem>>, vector<1x32x256xf32>
    %165 = vector.shape_cast %164 : vector<1x32x256xf32> to vector<32x256xf32>
    %166 = vector.shape_cast %163 : vector<32x256xf32> to vector<1x32x256xf32>
    tpu.vector_store %arg5[%c0_37, %c0_38, %c0_39], %166 {strides = array<i32>} : memref<2x32x256xf32, #tpu.memory_space<vmem>>, vector<1x32x256xf32>,
    %c1 = arith.constant 1 : index
    %c0_40 = arith.constant 0 : index
    %c0_41 = arith.constant 0 : index
    %167 = vector.load %arg1[%c1, %c0_40, %c0_41] : memref<2x32x256xf32, #tpu.memory_space<vmem>>, vector<1x32x256xf32>
    %168 = vector.shape_cast %167 : vector<1x32x256xf32> to vector<32x256xf32>
    %169 = arith.truncf %168 : vector<32x256xf32> to vector<32x256xbf16>
    %cst_42 = arith.constant dense<0.000000e+00> : vector<64x256xf32>
    %170 = tpu.matmul %0, %169, %cst_42 {dimension_numbers = #tpu.dot_dimension_numbers<[1], [0], [0], [1], [0, 0, 1, 1], [], []>} : vector<64x32xbf16>, vector<32x256xbf16>, vector<64x256xf32> -> vector<64x256xf32>
    %cst_43 = arith.constant dense<0.000000e+00> : vector<64xf32>
    %171 = vector.multi_reduction <add>, %170, %cst_43 [1] : vector<64x256xf32> to vector<64xf32>
    %172 = vector.shape_cast %171 : vector<64xf32> to vector<64x1xf32>
    %cst_44 = arith.constant 2.560000e+02 : f32
    %173 = vector.broadcast %cst_44 : f32 to vector<64x1xf32>
    %174 = arith.divf %172, %173 : vector<64x1xf32>
    %175 = vector.broadcast %174 : vector<64x1xf32> to vector<64x256xf32>
    %176 = arith.subf %170, %175 : vector<64x256xf32>
    %177 = arith.mulf %176, %176 : vector<64x256xf32>
    %cst_45 = arith.constant dense<0.000000e+00> : vector<64xf32>
    %178 = vector.multi_reduction <add>, %177, %cst_45 [1] : vector<64x256xf32> to vector<64xf32>
    %179 = vector.shape_cast %178 : vector<64xf32> to vector<64x1xf32>
    %cst_46 = arith.constant 2.560000e+02 : f32
    %180 = vector.broadcast %cst_46 : f32 to vector<64x1xf32>
    %181 = arith.divf %179, %180 : vector<64x1xf32>
    %cst_47 = arith.constant 9.99999974E-6 : f32
    %182 = vector.broadcast %cst_47 : f32 to vector<64x1xf32>
    %183 = arith.addf %181, %182 : vector<64x1xf32>
    %184 = math.rsqrt %183 : vector<64x1xf32>
    %185 = vector.broadcast %184 : vector<64x1xf32> to vector<64x256xf32>
    %186 = arith.mulf %176, %185 : vector<64x256xf32>
    %cst_48 = arith.constant 0.000000e+00 : f32
    %187 = vector.broadcast %cst_48 : f32 to vector<64x256xf32>
    %188 = arith.cmpf oge, %186, %187 : vector<64x256xf32>
    %cst_49 = arith.constant 2.000000e-01 : f32
    %189 = vector.broadcast %cst_49 : f32 to vector<64x256xf32>
    %190 = arith.mulf %189, %186 : vector<64x256xf32>
    %191 = arith.select %188, %186, %190 : vector<64x256xi1>, vector<64x256xf32>
    %c17_i32_50 = arith.constant 17 : i32
    %192 = tpu.dynamic_rotate %191 by %c17_i32_50 dim 1 : vector<64x256xf32>, i32 -> vector<64x256xf32>
    %193 = vector.broadcast %36 : vector<1x256xf32> to vector<64x256xf32>
    %194 = arith.mulf %192, %193 : vector<64x256xf32>
    %195 = vector.extract_strided_slice %2 {offsets = [0, 0], sizes = [64, 1], strides = [1, 1]} : vector<64x9xf32> to vector<64x1xf32>
    %196 = vector.broadcast %195 : vector<64x1xf32> to vector<64x256xf32>
    %197 = arith.mulf %194, %196 : vector<64x256xf32>
    %c16_i32_51 = arith.constant 16 : i32
    %198 = tpu.dynamic_rotate %191 by %c16_i32_51 dim 1 : vector<64x256xf32>, i32 -> vector<64x256xf32>
    %199 = vector.broadcast %31 : vector<1x256xf32> to vector<64x256xf32>
    %200 = arith.mulf %198, %199 : vector<64x256xf32>
    %201 = vector.extract_strided_slice %2 {offsets = [0, 1], sizes = [64, 1], strides = [1, 1]} : vector<64x9xf32> to vector<64x1xf32>
    %202 = vector.broadcast %201 : vector<64x1xf32> to vector<64x256xf32>
    %203 = arith.mulf %200, %202 : vector<64x256xf32>
    %c15_i32_52 = arith.constant 15 : i32
    %204 = tpu.dynamic_rotate %191 by %c15_i32_52 dim 1 : vector<64x256xf32>, i32 -> vector<64x256xf32>
    %205 = vector.broadcast %37 : vector<1x256xf32> to vector<64x256xf32>
    %206 = arith.mulf %204, %205 : vector<64x256xf32>
    %207 = vector.extract_strided_slice %2 {offsets = [0, 2], sizes = [64, 1], strides = [1, 1]} : vector<64x9xf32> to vector<64x1xf32>
    %208 = vector.broadcast %207 : vector<64x1xf32> to vector<64x256xf32>
    %209 = arith.mulf %206, %208 : vector<64x256xf32>
    %c1_i32_53 = arith.constant 1 : i32
    %210 = tpu.dynamic_rotate %191 by %c1_i32_53 dim 1 : vector<64x256xf32>, i32 -> vector<64x256xf32>
    %211 = vector.broadcast %23 : vector<1x256xf32> to vector<64x256xf32>
    %212 = arith.mulf %210, %211 : vector<64x256xf32>
    %213 = vector.extract_strided_slice %2 {offsets = [0, 3], sizes = [64, 1], strides = [1, 1]} : vector<64x9xf32> to vector<64x1xf32>
    %214 = vector.broadcast %213 : vector<64x1xf32> to vector<64x256xf32>
    %215 = arith.mulf %212, %214 : vector<64x256xf32>
    %216 = vector.extract_strided_slice %2 {offsets = [0, 4], sizes = [64, 1], strides = [1, 1]} : vector<64x9xf32> to vector<64x1xf32>
    %217 = vector.broadcast %216 : vector<64x1xf32> to vector<64x256xf32>
    %218 = arith.mulf %191, %217 : vector<64x256xf32>
    %c255_i32_54 = arith.constant 255 : i32
    %219 = tpu.dynamic_rotate %191 by %c255_i32_54 dim 1 : vector<64x256xf32>, i32 -> vector<64x256xf32>
    %220 = vector.broadcast %27 : vector<1x256xf32> to vector<64x256xf32>
    %221 = arith.mulf %219, %220 : vector<64x256xf32>
    %222 = vector.extract_strided_slice %2 {offsets = [0, 5], sizes = [64, 1], strides = [1, 1]} : vector<64x9xf32> to vector<64x1xf32>
    %223 = vector.broadcast %222 : vector<64x1xf32> to vector<64x256xf32>
    %224 = arith.mulf %221, %223 : vector<64x256xf32>
    %c241_i32_55 = arith.constant 241 : i32
    %225 = tpu.dynamic_rotate %191 by %c241_i32_55 dim 1 : vector<64x256xf32>, i32 -> vector<64x256xf32>
    %226 = vector.broadcast %38 : vector<1x256xf32> to vector<64x256xf32>
    %227 = arith.mulf %225, %226 : vector<64x256xf32>
    %228 = vector.extract_strided_slice %2 {offsets = [0, 6], sizes = [64, 1], strides = [1, 1]} : vector<64x9xf32> to vector<64x1xf32>
    %229 = vector.broadcast %228 : vector<64x1xf32> to vector<64x256xf32>
    %230 = arith.mulf %227, %229 : vector<64x256xf32>
    %c240_i32_56 = arith.constant 240 : i32
    %231 = tpu.dynamic_rotate %191 by %c240_i32_56 dim 1 : vector<64x256xf32>, i32 -> vector<64x256xf32>
    %232 = vector.broadcast %35 : vector<1x256xf32> to vector<64x256xf32>
    %233 = arith.mulf %231, %232 : vector<64x256xf32>
    %234 = vector.extract_strided_slice %2 {offsets = [0, 7], sizes = [64, 1], strides = [1, 1]} : vector<64x9xf32> to vector<64x1xf32>
    %235 = vector.broadcast %234 : vector<64x1xf32> to vector<64x256xf32>
    %236 = arith.mulf %233, %235 : vector<64x256xf32>
    %c239_i32_57 = arith.constant 239 : i32
    %237 = tpu.dynamic_rotate %191 by %c239_i32_57 dim 1 : vector<64x256xf32>, i32 -> vector<64x256xf32>
    %238 = vector.broadcast %39 : vector<1x256xf32> to vector<64x256xf32>
    %239 = arith.mulf %237, %238 : vector<64x256xf32>
    %240 = vector.extract_strided_slice %2 {offsets = [0, 8], sizes = [64, 1], strides = [1, 1]} : vector<64x9xf32> to vector<64x1xf32>
    %241 = vector.broadcast %240 : vector<64x1xf32> to vector<64x256xf32>
    %242 = arith.mulf %239, %241 : vector<64x256xf32>
    %243 = arith.addf %197, %203 : vector<64x256xf32>
    %244 = arith.addf %209, %215 : vector<64x256xf32>
    %245 = arith.addf %218, %224 : vector<64x256xf32>
    %246 = arith.addf %230, %236 : vector<64x256xf32>
    %247 = arith.addf %243, %244 : vector<64x256xf32>
    %248 = arith.addf %245, %246 : vector<64x256xf32>
    %249 = arith.addf %247, %248 : vector<64x256xf32>
    %250 = arith.addf %249, %242 : vector<64x256xf32>
    %cst_58 = arith.constant dense<0.000000e+00> : vector<64xf32>
    %251 = vector.multi_reduction <add>, %250, %cst_58 [1] : vector<64x256xf32> to vector<64xf32>
    %252 = vector.shape_cast %251 : vector<64xf32> to vector<64x1xf32>
    %cst_59 = arith.constant 2.560000e+02 : f32
    %253 = vector.broadcast %cst_59 : f32 to vector<64x1xf32>
    %254 = arith.divf %252, %253 : vector<64x1xf32>
    %255 = vector.broadcast %254 : vector<64x1xf32> to vector<64x256xf32>
    %256 = arith.subf %250, %255 : vector<64x256xf32>
    %257 = arith.mulf %256, %256 : vector<64x256xf32>
    %cst_60 = arith.constant dense<0.000000e+00> : vector<64xf32>
    %258 = vector.multi_reduction <add>, %257, %cst_60 [1] : vector<64x256xf32> to vector<64xf32>
    %259 = vector.shape_cast %258 : vector<64xf32> to vector<64x1xf32>
    %cst_61 = arith.constant 2.560000e+02 : f32
    %260 = vector.broadcast %cst_61 : f32 to vector<64x1xf32>
    %261 = arith.divf %259, %260 : vector<64x1xf32>
    %cst_62 = arith.constant 9.99999974E-6 : f32
    %262 = vector.broadcast %cst_62 : f32 to vector<64x1xf32>
    %263 = arith.addf %261, %262 : vector<64x1xf32>
    %264 = math.rsqrt %263 : vector<64x1xf32>
    %265 = vector.broadcast %264 : vector<64x1xf32> to vector<64x256xf32>
    %266 = arith.mulf %256, %265 : vector<64x256xf32>
    %cst_63 = arith.constant 0.000000e+00 : f32
    %267 = vector.broadcast %cst_63 : f32 to vector<64x256xf32>
    %268 = arith.cmpf oge, %266, %267 : vector<64x256xf32>
    %cst_64 = arith.constant 2.000000e-01 : f32
    %269 = vector.broadcast %cst_64 : f32 to vector<64x256xf32>
    %270 = arith.mulf %269, %266 : vector<64x256xf32>
    %271 = arith.select %268, %266, %270 : vector<64x256xi1>, vector<64x256xf32>
    %272 = arith.truncf %271 : vector<64x256xf32> to vector<64x256xbf16>
    %cst_65 = arith.constant dense<0.000000e+00> : vector<32x256xf32>
    %273 = tpu.matmul %1, %272, %cst_65 {dimension_numbers = #tpu.dot_dimension_numbers<[1], [0], [0], [1], [0, 0, 1, 1], [], []>} : vector<32x64xbf16>, vector<64x256xbf16>, vector<32x256xf32> -> vector<32x256xf32>
    %cst_66 = arith.constant dense<0.000000e+00> : vector<32xf32>
    %274 = vector.multi_reduction <add>, %273, %cst_66 [1] : vector<32x256xf32> to vector<32xf32>
    %275 = vector.shape_cast %274 : vector<32xf32> to vector<32x1xf32>
    %cst_67 = arith.constant 2.560000e+02 : f32
    %276 = vector.broadcast %cst_67 : f32 to vector<32x1xf32>
    %277 = arith.divf %275, %276 : vector<32x1xf32>
    %278 = vector.broadcast %277 : vector<32x1xf32> to vector<32x256xf32>
    %279 = arith.subf %273, %278 : vector<32x256xf32>
    %280 = arith.mulf %279, %279 : vector<32x256xf32>
    %cst_68 = arith.constant dense<0.000000e+00> : vector<32xf32>
    %281 = vector.multi_reduction <add>, %280, %cst_68 [1] : vector<32x256xf32> to vector<32xf32>
    %282 = vector.shape_cast %281 : vector<32xf32> to vector<32x1xf32>
    %cst_69 = arith.constant 2.560000e+02 : f32
    %283 = vector.broadcast %cst_69 : f32 to vector<32x1xf32>
    %284 = arith.divf %282, %283 : vector<32x1xf32>
    %cst_70 = arith.constant 9.99999974E-6 : f32
    %285 = vector.broadcast %cst_70 : f32 to vector<32x1xf32>
    %286 = arith.addf %284, %285 : vector<32x1xf32>
    %287 = math.rsqrt %286 : vector<32x1xf32>
    %288 = vector.broadcast %287 : vector<32x1xf32> to vector<32x256xf32>
    %289 = arith.mulf %279, %288 : vector<32x256xf32>
    %290 = arith.addf %289, %168 : vector<32x256xf32>
    %c1_71 = arith.constant 1 : index
    %c0_72 = arith.constant 0 : index
    %c0_73 = arith.constant 0 : index
    %291 = vector.load %arg5[%c1_71, %c0_72, %c0_73] : memref<2x32x256xf32, #tpu.memory_space<vmem>>, vector<1x32x256xf32>
    %292 = vector.shape_cast %291 : vector<1x32x256xf32> to vector<32x256xf32>
    %293 = vector.shape_cast %290 : vector<32x256xf32> to vector<1x32x256xf32>
    tpu.vector_store %arg5[%c1_71, %c0_72, %c0_73], %293 {strides = array<i32>} : memref<2x32x256xf32, #tpu.memory_space<vmem>>, vector<1x32x256xf32>,
    return
  }
  func.func @transform_0(%arg0: i32) -> (i32, i32, i32) {
    %c0_i32 = arith.constant 0 : i32
    %c0_i32_0 = arith.constant 0 : i32
    %c0_i32_1 = arith.constant 0 : i32
    return %arg0, %c0_i32, %c0_i32_0 : i32, i32, i32
  }
  func.func @transform_1(%arg0: i32) -> (i32, i32) {
    %c0_i32 = arith.constant 0 : i32
    %c0_i32_0 = arith.constant 0 : i32
    %c0_i32_1 = arith.constant 0 : i32
    return %c0_i32, %c0_i32_0 : i32, i32
  }
  func.func @transform_2(%arg0: i32) -> (i32, i32) {
    %c0_i32 = arith.constant 0 : i32
    %c0_i32_0 = arith.constant 0 : i32
    %c0_i32_1 = arith.constant 0 : i32
    return %c0_i32, %c0_i32_0 : i32, i32
  }
  func.func @transform_3(%arg0: i32) -> (i32, i32) {
    %c0_i32 = arith.constant 0 : i32
    %c0_i32_0 = arith.constant 0 : i32
    %c0_i32_1 = arith.constant 0 : i32
    return %c0_i32, %c0_i32_0 : i32, i32
  }
  func.func @transform_4(%arg0: i32) -> (i32, i32, i32) {
    %c0_i32 = arith.constant 0 : i32
    %c0_i32_0 = arith.constant 0 : i32
    %c0_i32_1 = arith.constant 0 : i32
    return %arg0, %c0_i32, %c0_i32_0 : i32, i32, i32
  }
}

</mosaic_0001>

<bundles_post_ra>
// kernel: inverted_res_block.1
= control target key start
LH: loop header
LB: loop body
LE: loop exit
PB: predicated region body
PF: predicated region fallthrough
CT: control target
= control target key end

     0   :  { %v3736_v0 = vmov 0   ;;  %vm129_vm0 = vcmask 261120   ;;  %v3737_v22 = vmov 1   ;;  %v3738_v24 = vmov 2   ;;  %s3745_s29 = smov 16   ;;  %s3746_s30 = smov 17   ;;  %s7503_s2 = inlined_call_operand.vmem [shape: f32[64,9], index: 2, kind: input, shape index: {}]   ;;  %s7504_s0 = inlined_call_operand.vmem [shape: f32[2,32,256], index: 0, kind: input, shape index: {}]   ;;  %s7505_s1 = inlined_call_operand.vmem [shape: bf16[64,32], index: 1, kind: input, shape index: {}]   ;;  %s7506_s3 = inlined_call_operand.vmem [shape: bf16[32,64], index: 3, kind: input, shape index: {}]   ;;  %s7507_s4 = inlined_call_operand.vmem [shape: f32[2,32,256], index: 4, kind: output, shape index: {}]  }
   0x1   :  { %3585 = vset.pattern.permute.xlu2 %v3736_v0  ;;  %3583 = vset.pattern.permute.xlu1 %v3736_v0  ;;  %v3783_v1 = vld [vmem:[%s7503_s2 + $0x10] sm:$0xff]  ;;  %v3788_v2 = vld [vmem:[%s7503_s2] sm:$0xff]  ;;  %v3793_v3 = vld [vmem:[%s7503_s2 + $0x8] sm:$0xff]  ;;  %v3739_v26 = vmov 3   ;;  %v3740_v28 = vmov 4   ;;  %v7510_v29 = vmov 5  }
   0x2   :  { %532 = vperm.xlu2 %3585, %v3783_v1   ;;  %522 = vperm.xlu1 %3583, %v3788_v2   ;;  %v101_v4 = vld [vmem:[%s7504_s0 + $0x20] sm:$0xff]  ;;  %v103_v5 = vld [vmem:[%s7504_s0 + $0x30] sm:$0xff]  ;;  %v102_v6 = vld [vmem:[%s7504_s0 + $0x28] sm:$0xff]  ;;  %v7512_v32 = vmov 6   ;;  %v7508_v35 = vmov 7   ;;  %s3747_s5 = smov 1  }
   0x3   :  { %3584 = vset.pattern.permute.xlu0 %v3736_v0  ;;  %v107_v7 = vpack.c.bf16 %v103_v5, %v101_v4  ;;  %v104_v8 = vld [vmem:[%s7504_s0 + $0x38] sm:$0xff]  ;;  %v97_v9 = vld [vmem:[%s7504_s0] sm:$0xff]  ;;  %v99_v10 = vld [vmem:[%s7504_s0 + $0x10] sm:$0xff]  ;;  %s3748_s6 = smov 15   ;;  %s3749_s7 = smov 127  }
   0x4   :  { %527 = vperm.xlu0 %3584, %v3793_v3   ;;  %v108_v11 = vpack.c.bf16 %v104_v8, %v102_v6  ;;  %v98_v12 = vld [vmem:[%s7504_s0 + $0x8] sm:$0xff]  ;;  %v100_v13 = vld [vmem:[%s7504_s0 + $0x18] sm:$0xff]  ;;  %v105_v14 = vpack.c.bf16 %v99_v10, %v97_v9  ;;  %v3825_v16 = vld [vmem:[%s7503_s2 + $0x20] sm:$0xff]  ;;  %s3750_s8 = smov 113   ;;  %s3751_s9 = smov 112  }
   0x5   :  { %148 = vmatpush.bf16.msra.mxu0 %v107_v7  ;;  %v106_v15 = vpack.c.bf16 %v100_v13, %v98_v12  ;;  %v3830_v17 = vld [vmem:[%s7503_s2 + $0x18] sm:$0xff]  ;;  %v3558_v18 = vld [vmem:[%s7505_s1] sm:$0xff]  ;;  %v3838_v19 = vld [vmem:[%s7503_s2 + $0x30] sm:$0xff]  ;;  %s3752_s10 = smov 111  }
   0x6   :  { %177 = vmatpush.bf16.msra.mxu1 %v108_v11  ;;  %v3848_v20 = vld [vmem:[%s7503_s2 + $0x38] sm:$0xff]  ;;  %v3853_v21 = vld [vmem:[%s7503_s2 + $0x28] sm:$0xff]  ;;  %v3560_v25 = vld [vmem:[%s7505_s1 + $0x10] sm:$0xff] }
   0x7   :  { %v3559_v23 = vld [vmem:[%s7505_s1 + $0x8] sm:$0xff]  ;;  %v3561_v27 = vld [vmem:[%s7505_s1 + $0x18] sm:$0xff] }
   0x9   :  { %149 = vmatpush.bf16.msra.mxu0 %v105_v14 }
   0xa   :  { %178 = vmatpush.bf16.msra.mxu1 %v106_v15  ;;  %542 = vperm.xlu2 %3585, %v3825_v16  }
   0xb   :  { %537 = vperm.xlu1 %3583, %v3830_v17  }
   0xc   :  { %3510 = vmatmul.msk.bf16.vlgmr.msra.gmra.mxu0 %vm129_vm0, %v3558_v18  ;;  %552 = vperm.xlu0 %3584, %v3838_v19  }
   0xd   :  { %3514 = vmatmul.msk.bf16.vlgmr.msra.gmra.mxu1 %vm129_vm0, %v3558_v18 }
  0x12   :  { %557 = vperm.xlu2 %3585, %v3848_v20  }
  0x13   :  { %547 = vperm.xlu1 %3583, %v3853_v21  }
  0x14   :  { %3586 = vset.pattern.permute.xlu0 %v3737_v22 }
  0x15   :  { %642 = vperm.xlu0 %3586, %v3788_v2  }
  0x1a   :  { %3587 = vset.pattern.permute.xlu2 %v3737_v22 }
  0x1b   :  { %3588 = vset.pattern.permute.xlu1 %v3737_v22  ;;  %646 = vperm.xlu2 %3587, %v3793_v3   ;;  %v3744_v22 = vmov 256.0  }
  0x1c   :  { %650 = vperm.xlu1 %3588, %v3783_v1   ;;  %3511 = vmatmul.msk.bf16.gmra.mxu0 %vm129_vm0, %v3559_v23  ;;  %3624 = vrcp.f32 %v3744_v22 }
  0x1d   :  { %662 = vperm.xlu0 %3586, %v3853_v21   ;;  %3515 = vmatmul.msk.bf16.gmra.mxu1 %vm129_vm0, %v3559_v23 }
  0x23   :  { %654 = vperm.xlu2 %3587, %v3830_v17  }
  0x24   :  { %658 = vperm.xlu1 %3588, %v3825_v16  }
  0x25   :  { %3591 = vset.pattern.permute.xlu0 %v3738_v24 }
  0x26   :  { %763 = vperm.xlu0 %3591, %v3783_v1  }
  0x2b   :  { %666 = vperm.xlu2 %3587, %v3838_v19  }
  0x2c   :  { %670 = vperm.xlu1 %3588, %v3848_v20   ;;  %3512 = vmatmul.msk.bf16.gmra.mxu0 %vm129_vm0, %v3560_v25 }
  0x2d   :  { %3516 = vmatmul.msk.bf16.gmra.mxu1 %vm129_vm0, %v3560_v25 }
  0x2e   :  { %783 = vperm.xlu0 %3591, %v3848_v20  }
  0x33   :  { %3589 = vset.pattern.permute.xlu2 %v3738_v24 }
  0x34   :  { %3590 = vset.pattern.permute.xlu1 %v3738_v24  ;;  %755 = vperm.xlu2 %3589, %v3788_v2   ;;  %v3625_v24 = vpop.eup %3624 }
  0x35   :  { %759 = vperm.xlu1 %3590, %v3793_v3   ;;  %vm229_vm1 = vweird.f32 %v3625_v24 }
  0x36   :  { %3593 = vset.pattern.permute.xlu0 %v3739_v26 }
  0x37   :  { %872 = vperm.xlu0 %3593, %v3793_v3  }
  0x3c   :  { %767 = vperm.xlu2 %3589, %v3830_v17   ;;  %3513 = vmatmul.msk.bf16.gmra.mxu0 %vm129_vm0, %v3561_v27 }
  0x3d   :  { %771 = vperm.xlu1 %3590, %v3825_v16   ;;  %3517 = vmatmul.msk.bf16.gmra.mxu1 %vm129_vm0, %v3561_v27  ;;  %v225_v27 = vmul.f32 256.0, %v3625_v24 }
  0x3f   :  { %892 = vperm.xlu0 %3593, %v3838_v19  }
  0x44   :  { %775 = vperm.xlu2 %3589, %v3853_v21  }
  0x45   :  { %779 = vperm.xlu1 %3590, %v3838_v19  }
  0x47   :  { %3596 = vset.pattern.permute.xlu0 %v3740_v28 }
  0x48   :  { %920 = vperm.xlu0 %3596, %v3793_v3  }
  0x4c   :  { %3594 = vset.pattern.permute.xlu2 %v3739_v26 }
  0x4d   :  { %3592 = vset.pattern.permute.xlu1 %v3739_v26  ;;  %876 = vperm.xlu2 %3594, %v3783_v1  }
  0x4e   :  { %868 = vperm.xlu1 %3592, %v3788_v2  }
  0x50   :  { %940 = vperm.xlu0 %3596, %v3838_v19  }
  0x55   :  { %884 = vperm.xlu2 %3594, %v3825_v16  }
  0x56   :  { %880 = vperm.xlu1 %3592, %v3830_v17  }
  0x58   :  { %3598 = vset.pattern.permute.xlu0 %v7510_v29 }
  0x59   :  { %1053 = vperm.xlu0 %3598, %v3838_v19  }
  0x5c   :  { %v3906_v30 = vpop.permute.xlu2 %532 }
  0x5d   :  { %896 = vperm.xlu2 %3594, %v3848_v20   ;;  %7794 = vst [vmem:[#allocation2_spill] sm:$0xff] %v3906_v30 }
  0x5e   :  { %888 = vperm.xlu1 %3592, %v3853_v21  }
  0x64   :  { %v3914_v33 = vpop.permute.xlu2 %542 }
  0x65   :  { %3597 = vset.pattern.permute.xlu2 %v3740_v28  ;;  %7796 = vst [vmem:[#allocation4_spill] sm:$0xff] %v3914_v33 }
  0x66   :  { %3595 = vset.pattern.permute.xlu1 %v3740_v28  ;;  %924 = vperm.xlu2 %3597, %v3783_v1  }
  0x67   :  { %916 = vperm.xlu1 %3595, %v3788_v2  }
  0x6c   :  { %v3928_v39 = vpop.permute.xlu2 %557 }
  0x6d   :  { %7798 = vst [vmem:[#allocation6_spill] sm:$0xff] %v3928_v39 }
  0x6e   :  { %932 = vperm.xlu2 %3597, %v3825_v16  }
  0x6f   :  { %928 = vperm.xlu1 %3595, %v3830_v17  }
  0x74   :  { %v3908_v31 = vpop.permute.xlu1 %522 }
  0x75   :  { %7795 = vst [vmem:[#allocation3_spill] sm:$0xff] %v3908_v31  ;;  %v3952_v48 = vpop.permute.xlu2 %646 }
  0x76   :  { %944 = vperm.xlu2 %3597, %v3848_v20   ;;  %v3942_v44 = vpop.permute.xlu0 %527  ;;  %7802 = vst [vmem:[#allocation10_spill] sm:$0xff] %v3952_v48 }
  0x77   :  { %936 = vperm.xlu1 %3595, %v3853_v21   ;;  %7800 = vst [vmem:[#allocation8_spill] sm:$0xff] %v3942_v44 }
  0x7d   :  { %v3916_v34 = vpop.permute.xlu1 %537  ;;  %v3962_v53 = vpop.permute.xlu2 %654 }
  0x7e   :  { %3599 = vset.pattern.permute.xlu2 %v7510_v29  ;;  %7797 = vst [vmem:[#allocation5_spill] sm:$0xff] %v3916_v34  ;;  %v3954_v49 = vpop.permute.xlu0 %552 }
  0x7f   :  { %3600 = vset.pattern.permute.xlu1 %v7512_v32  ;;  %1057 = vperm.xlu2 %3599, %v3848_v20   ;;  %7803 = vst [vmem:[#allocation11_spill] sm:$0xff] %v3954_v49 }
  0x80   :  { %1166 = vperm.xlu1 %3600, %v3838_v19   ;;  %7805 = vst [vmem:[#allocation13_spill] sm:$0xff] %v3962_v53 }
  0x85   :  { %v3931_v40 = vpop.permute.xlu1 %547  ;;  %v3973_v58 = vpop.permute.xlu2 %666 }
  0x86   :  { %7799 = vst [vmem:[#allocation7_spill] sm:$0xff] %v3931_v40  ;;  %v4504_v40 = vld [vmem:[%s7503_s2 + $0x28] sm:$0xff] }
  0x87   :  { %3601 = vset.pattern.permute.xlu2 %v7512_v32  ;;  %v3967_v55 = vpop.permute.xlu0 %642  ;;  %7808 = vst [vmem:[#allocation16_spill] sm:$0xff] %v3973_v58 }
  0x88   :  { %3602 = vset.pattern.permute.xlu1 %v7508_v35  ;;  %1170 = vperm.xlu2 %3601, %v3848_v20   ;;  %7806 = vst [vmem:[#allocation14_spill] sm:$0xff] %v3967_v55 }
  0x89   :  { %1279 = vperm.xlu1 %3602, %v3838_v19   ;;  %v3922_v36 = vpop.f32.mrf.mxu0 }
  0x8a   :  { %v3924_v37 = vpop.f32.mrf.mxu1 }
  0x8b   :  { %v200_v38 = vadd.f32 %v3924_v37, %v3922_v36 }
  0x8d   :  { %201 = vadd.xlane.f32.xlu0 %v200_v38  ;;  %v226_v38 = vsub.f32 1.0, %v225_v27 }
  0x8e   :  { %v3950_v47 = vpop.permute.xlu1 %650  ;;  %v3989_v1 = vpop.permute.xlu2 %755 }
  0x8f   :  { %7801 = vst [vmem:[#allocation9_spill] sm:$0xff] %v3950_v47  ;;  %v3981_v61 = vpop.permute.xlu0 %662 }
  0x90   :  { %3604 = vset.pattern.permute.xlu2 %v7510_v29  ;;  %7809 = vst [vmem:[#allocation17_spill] sm:$0xff] %v3981_v61 }
  0x91   :  { %3605 = vset.pattern.permute.xlu1 %v7512_v32  ;;  %v3934_v41 = vpop.f32.mrf.mxu0  ;;  %1049 = vperm.xlu2 %3604, %v3853_v21   ;;  %7811 = vst [vmem:[#allocation19_spill] sm:$0xff] %v3989_v1 }
  0x92   :  { %v3937_v42 = vpop.f32.mrf.mxu1  ;;  %1158 = vperm.xlu1 %3605, %v3825_v16  }
  0x93   :  { %v203_v43 = vadd.f32 %v3937_v42, %v3934_v41 }
  0x95   :  { %204 = vadd.xlane.f32.xlu0 %v203_v43 }
  0x96   :  { %v3960_v52 = vpop.permute.xlu1 %658  ;;  %v4003_v8 = vpop.permute.xlu2 %767 }
  0x97   :  { %7804 = vst [vmem:[#allocation12_spill] sm:$0xff] %v3960_v52  ;;  %v7932_v52 = vmov 7  }
  0x98   :  { %v3995_v4 = vpop.permute.xlu0 %763  ;;  %7814 = vst [vmem:[#allocation22_spill] sm:$0xff] %v4003_v8 }
  0x99   :  { %v3944_v45 = vpop.f32.mrf.mxu0  ;;  %3606 = vset.pattern.permute.xlu2 %v7512_v32  ;;  %7812 = vst [vmem:[#allocation20_spill] sm:$0xff] %v3995_v4 }
  0x9a   :  { %v3947_v46 = vpop.f32.mrf.mxu1  ;;  %3607 = vset.pattern.permute.xlu1 %v7508_v35 }
  0x9b   :  { %v206_v63 = vadd.f32 %v3947_v46, %v3944_v45 }
  0x9e   :  { %v3971_v57 = vpop.permute.xlu1 %670  ;;  %v4015_v14 = vpop.permute.xlu2 %775 }
  0x9f   :  { %7807 = vst [vmem:[#allocation15_spill] sm:$0xff] %v3971_v57 }
  0xa0   :  { %v4009_v11 = vpop.permute.xlu0 %783  ;;  %7817 = vst [vmem:[#allocation25_spill] sm:$0xff] %v4015_v14 }
  0xa1   :  { %v3956_v50 = vpop.f32.mrf.mxu0  ;;  %7815 = vst [vmem:[#allocation23_spill] sm:$0xff] %v4009_v11 }
  0xa2   :  { %v3958_v51 = vpop.f32.mrf.mxu1 }
  0xa3   :  { %v209_v6 = vadd.f32 %v3958_v51, %v3956_v50 }
  0xa7   :  { %v3987_v0 = vpop.permute.xlu1 %759  ;;  %v4021_v17 = vpop.permute.xlu2 %876 }
  0xa8   :  { %7810 = vst [vmem:[#allocation18_spill] sm:$0xff] %v3987_v0 }
  0xa9   :  { %1045 = vperm.xlu0 %3598, %v3825_v16   ;;  %v3965_v54 = vpop.f32.mrf.mxu0  ;;  %v4017_v15 = vpop.permute.xlu0 %872  ;;  %7820 = vst [vmem:[#allocation28_spill] sm:$0xff] %v4021_v17 }
  0xaa   :  { %v3969_v56 = vpop.f32.mrf.mxu1  ;;  %7818 = vst [vmem:[#allocation26_spill] sm:$0xff] %v4017_v15 }
  0xab   :  { %v212_v62 = vadd.f32 %v3969_v56, %v3965_v54 }
  0xaf   :  { %v4001_v7 = vpop.permute.xlu1 %771  ;;  %v4029_v21 = vpop.permute.xlu2 %884 }
  0xb0   :  { %7813 = vst [vmem:[#allocation21_spill] sm:$0xff] %v4001_v7 }
  0xb1   :  { %3603 = vset.pattern.permute.xlu0 %v7508_v35  ;;  %v3976_v59 = vpop.f32.mrf.mxu0  ;;  %v4025_v19 = vpop.permute.xlu0 %892  ;;  %7823 = vst [vmem:[#allocation31_spill] sm:$0xff] %v4029_v21  ;;  %v3712_v21 = vld [vmem:[%s7503_s2 + $0x30] sm:$0xff] }
  0xb2   :  { %1283 = vperm.xlu0 %3603, %v3848_v20   ;;  %v3979_v60 = vpop.f32.mrf.mxu1  ;;  %7821 = vst [vmem:[#allocation29_spill] sm:$0xff] %v4025_v19 }
  0xb3   :  { %v215_v5 = vadd.f32 %v3979_v60, %v3976_v59 }
  0xb7   :  { %v4013_v13 = vpop.permute.xlu1 %779  ;;  %v4035_v26 = vpop.permute.xlu2 %896 }
  0xb8   :  { %7816 = vst [vmem:[#allocation24_spill] sm:$0xff] %v4013_v13 }
  0xb9   :  { %v3991_v2 = vpop.f32.mrf.mxu0  ;;  %7826 = vst [vmem:[#allocation34_spill] sm:$0xff] %v4035_v26 }
  0xba   :  { %213 = vadd.xlane.f32.xlu2 %v212_v62  ;;  %v3993_v3 = vpop.f32.mrf.mxu1  ;;  %v4031_v23 = vpop.permute.xlu0 %920 }
  0xbb   :  { %v218_v18 = vadd.f32 %v3993_v3, %v3991_v2  ;;  %7824 = vst [vmem:[#allocation32_spill] sm:$0xff] %v4031_v23 }
  0xbc   :  { %207 = vadd.xlane.f32.xlu1 %v206_v63  ;;  %v227_v63 = vmul.f32 %v3625_v24, %v226_v38 }
  0xc0   :  { %v4019_v16 = vpop.permute.xlu1 %868  ;;  %v4041_v62 = vpop.permute.xlu2 %924 }
  0xc1   :  { %v4005_v9 = vpop.f32.mrf.mxu0  ;;  %7819 = vst [vmem:[#allocation27_spill] sm:$0xff] %v4019_v16 }
  0xc2   :  { %216 = vadd.xlane.f32.xlu2 %v215_v5  ;;  %v4007_v10 = vpop.f32.mrf.mxu1  ;;  %v4037_v28 = vpop.permute.xlu0 %940  ;;  %7829 = vst [vmem:[#allocation37_spill] sm:$0xff] %v4041_v62 }
  0xc3   :  { %v221_v12 = vadd.f32 %v4007_v10, %v4005_v9  ;;  %7827 = vst [vmem:[#allocation35_spill] sm:$0xff] %v4037_v28 }
  0xc4   :  { %210 = vadd.xlane.f32.xlu1 %v209_v6  ;;  %v228_v6 = vadd.f32 %v3625_v24, %v227_v63 }
  0xc8   :  { %v4027_v20 = vpop.permute.xlu1 %880  ;;  %v4049_v22 = vpop.permute.xlu2 %932 }
  0xc9   :  { %7822 = vst [vmem:[#allocation30_spill] sm:$0xff] %v4027_v20 }
  0xca   :  { %7833 = vst [vmem:[#allocation41_spill] sm:$0xff] %v4049_v22 }
  0xcb   :  { %v4043_v5 = vpop.permute.xlu0 %1053 }
  0xcc   :  { %222 = vadd.xlane.f32.xlu1 %v221_v12  ;;  %7830 = vst [vmem:[#allocation38_spill] sm:$0xff] %v4043_v5  ;;  %v4045_v12 = vsel %vm229_vm1, %v3625_v24, %v228_v6 }
  0xcd   :  { %7831 = vst [vmem:[#allocation39_spill] sm:$0xff] %v4045_v12 }
  0xd0   :  { %v4033_v25 = vpop.permute.xlu1 %888  ;;  %v4064_v48 = vpop.permute.xlu2 %944 }
  0xd1   :  { %7825 = vst [vmem:[#allocation33_spill] sm:$0xff] %v4033_v25 }
  0xd2   :  { %7835 = vst [vmem:[#allocation43_spill] sm:$0xff] %v4064_v48 }
  0xd9   :  { %v4039_v43 = vpop.permute.xlu1 %916  ;;  %v4077_v0 = vpop.permute.xlu2 %1057 }
  0xda   :  { %7828 = vst [vmem:[#allocation36_spill] sm:$0xff] %v4039_v43 }
  0xdb   :  { %7836 = vst [vmem:[#allocation44_spill] sm:$0xff] %v4077_v0 }
  0xdc   :  { %219 = vadd.xlane.f32.xlu0 %v218_v18 }
  0xe1   :  { %v4047_v18 = vpop.permute.xlu1 %928 }
  0xe2   :  { %7832 = vst [vmem:[#allocation40_spill] sm:$0xff] %v4047_v18 }
  0xe9   :  { %v4062_v44 = vpop.permute.xlu1 %936 }
  0xea   :  { %7834 = vst [vmem:[#allocation42_spill] sm:$0xff] %v4062_v44 }
  0xf2   :  { %v4079_v15 = vpop.permute.xlu1 %1166 }
  0xf3   :  { %7837 = vst [vmem:[#allocation45_spill] sm:$0xff] %v4079_v15 }
 0x100   :  { %v202_v35 = vpop.xlane.xlu0 %201 }
 0x101   :  { %v231_v29 = vmul.f32 %v4045_v12, %v202_v35 }
 0x103   :  { %v4053_v27 = vsub.f32 %v3922_v36, %v231_v29  ;;  %v4056_v32 = vsub.f32 %v3924_v37, %v231_v29 }
 0x105   :  { %v255_v38 = vmul.f32 %v4053_v27, %v4053_v27  ;;  %v256_v24 = vmul.f32 %v4056_v32, %v4056_v32 }
 0x107   :  { %v271_v63 = vadd.f32 %v256_v24, %v255_v38 }
 0x108   :  { %v205_v6 = vpop.xlane.xlu0 %204 }
 0x109   :  { %v232_v35 = vmul.f32 %v4045_v12, %v205_v6  ;;  %272 = vadd.xlane.f32.xlu2 %v271_v63  ;;  %v4081_v6 = vpop.permute.xlu2 %1170  ;;  %v4083_v63 = vpop.permute.xlu1 %1279 }
 0x10a   :  { %7838 = vst [vmem:[#allocation46_spill] sm:$0xff] %v4081_v6 }
 0x10b   :  { %v4068_v36 = vsub.f32 %v3934_v41, %v232_v35  ;;  %v4071_v29 = vsub.f32 %v3937_v42, %v232_v35  ;;  %7839 = vst [vmem:[#allocation47_spill] sm:$0xff] %v4083_v63 }
 0x10d   :  { %v257_v37 = vmul.f32 %v4068_v36, %v4068_v36  ;;  %v258_v38 = vmul.f32 %v4071_v29, %v4071_v29 }
 0x10f   :  { %v274_v24 = vadd.f32 %v258_v38, %v257_v37 }
 0x111   :  { %275 = vadd.xlane.f32.xlu0 %v274_v24  ;;  %v4085_v41 = vpop.permute.xlu2 %1049  ;;  %v4087_v42 = vpop.permute.xlu1 %1158 }
 0x112   :  { %7840 = vst [vmem:[#allocation48_spill] sm:$0xff] %v4085_v41 }
 0x113   :  { %7841 = vst [vmem:[#allocation49_spill] sm:$0xff] %v4087_v42 }
 0x12d   :  { %v214_v35 = vpop.xlane.xlu2 %213 }
 0x12e   :  { %v235_v23 = vmul.f32 %v4045_v12, %v214_v35 }
 0x12f   :  { %v208_v17 = vpop.xlane.xlu1 %207 }
 0x130   :  { %v4091_v4 = vsub.f32 %v3965_v54, %v235_v23  ;;  %v4094_v37 = vsub.f32 %v3969_v56, %v235_v23  ;;  %v233_v38 = vmul.f32 %v4045_v12, %v208_v17 }
 0x132   :  { %v4098_v24 = vsub.f32 %v3944_v45, %v233_v38  ;;  %v4101_v30 = vsub.f32 %v3947_v46, %v233_v38  ;;  %v263_v62 = vmul.f32 %v4091_v4, %v4091_v4  ;;  %v264_v35 = vmul.f32 %v4094_v37, %v4094_v37 }
 0x134   :  { %v283_v43 = vadd.f32 %v264_v35, %v263_v62  ;;  %v259_v54 = vmul.f32 %v4098_v24, %v4098_v24  ;;  %v260_v56 = vmul.f32 %v4101_v30, %v4101_v30 }
 0x135   :  { %v217_v17 = vpop.xlane.xlu2 %216 }
 0x136   :  { %v236_v45 = vmul.f32 %v4045_v12, %v217_v17  ;;  %284 = vadd.xlane.f32.xlu0 %v283_v43  ;;  %v277_v23 = vadd.f32 %v260_v56, %v259_v54  ;;  %v4133_v17 = vpop.permute.xlu0 %1045 }
 0x137   :  { %v211_v46 = vpop.xlane.xlu1 %210  ;;  %7842 = vst [vmem:[#allocation50_spill] sm:$0xff] %v4133_v17 }
 0x138   :  { %v4113_v38 = vsub.f32 %v3976_v59, %v236_v45  ;;  %v4116_v47 = vsub.f32 %v3979_v60, %v236_v45  ;;  %v234_v62 = vmul.f32 %v4045_v12, %v211_v46  ;;  %278 = vadd.xlane.f32.xlu1 %v277_v23 }
 0x13a   :  { %v4120_v35 = vsub.f32 %v3956_v50, %v234_v62  ;;  %v4123_v31 = vsub.f32 %v3958_v51, %v234_v62  ;;  %v265_v43 = vmul.f32 %v4113_v38, %v4113_v38  ;;  %v266_v54 = vmul.f32 %v4116_v47, %v4116_v47 }
 0x13c   :  { %v261_v59 = vmul.f32 %v4120_v35, %v4120_v35  ;;  %v262_v60 = vmul.f32 %v4123_v31, %v4123_v31  ;;  %v286_v56 = vadd.f32 %v266_v54, %v265_v43 }
 0x13e   :  { %v280_v50 = vadd.f32 %v262_v60, %v261_v59  ;;  %v4146_v54 = vpop.permute.xlu0 %1283 }
 0x13f   :  { %v223_v45 = vpop.xlane.xlu1 %222  ;;  %7843 = vst [vmem:[#allocation51_spill] sm:$0xff] %v4146_v54 }
 0x140   :  { %v238_v51 = vmul.f32 %v4045_v12, %v223_v45  ;;  %281 = vadd.xlane.f32.xlu2 %v280_v50  ;;  %287 = vadd.xlane.f32.xlu1 %v286_v56 }
 0x142   :  { %v4137_v23 = vsub.f32 %v4005_v9, %v238_v51  ;;  %v4140_v46 = vsub.f32 %v4007_v10, %v238_v51 }
 0x144   :  { %v269_v62 = vmul.f32 %v4137_v23, %v4137_v23  ;;  %v270_v43 = vmul.f32 %v4140_v46, %v4140_v46 }
 0x146   :  { %v292_v59 = vadd.f32 %v270_v43, %v269_v62 }
 0x148   :  { %293 = vadd.xlane.f32.xlu0 %v292_v59 }
 0x14f   :  { %v220_v60 = vpop.xlane.xlu0 %219 }
 0x150   :  { %v237_v50 = vmul.f32 %v4045_v12, %v220_v60 }
 0x152   :  { %v4150_v56 = vsub.f32 %v3991_v2, %v237_v50  ;;  %v4153_v9 = vsub.f32 %v3993_v3, %v237_v50 }
 0x154   :  { %v267_v10 = vmul.f32 %v4150_v56, %v4150_v56  ;;  %v268_v45 = vmul.f32 %v4153_v9, %v4153_v9 }
 0x156   :  { %v289_v51 = vadd.f32 %v268_v45, %v267_v10 }
 0x158   :  { %290 = vadd.xlane.f32.xlu2 %v289_v51 }
 0x17c   :  { %v273_v55 = vpop.xlane.xlu2 %272 }
 0x17d   :  { %v295_v62 = vmul.f32 %v273_v55, %v4045_v12 }
 0x17f   :  { %v303_v43 = vadd.f32 1e-05, %v295_v62 }
 0x181   :  { %3626 = vrsqrt.f32 %v303_v43  ;;  %vm317_vm3 = vweird.f32 %v303_v43 }
 0x184   :  { %v276_v59 = vpop.xlane.xlu0 %275 }
 0x185   :  { %v296_v2 = vmul.f32 %v276_v59, %v4045_v12 }
 0x187   :  { %v3627_v60 = vpop.eup %3626  ;;  %v304_v16 = vadd.f32 1e-05, %v296_v2 }
 0x188   :  { %v312_v3 = vmul.f32 %v3627_v60, %v303_v43  ;;  %vm318_vm2 = vweird.f32 %v3627_v60 }
 0x189   :  { %3628 = vrsqrt.f32 %v304_v16  ;;  %vm319_vm4 = vmor %vm317_vm3, %vm318_vm2  ;;  %vm327_vm8 = vweird.f32 %v304_v16 }
 0x18a   :  { %v313_v50 = vmul.f32 %v3627_v60, %v312_v3 }
 0x18c   :  { %v314_v1 = vmul.f32 0.5, %v313_v50 }
 0x18e   :  { %v315_v41 = vsub.f32 1.5, %v314_v1 }
 0x18f   :  { %v3629_v58 = vpop.eup %3628 }
 0x190   :  { %v316_v15 = vmul.f32 %v3627_v60, %v315_v41  ;;  %v322_v10 = vmul.f32 %v3629_v58, %v304_v16  ;;  %vm328_vm7 = vweird.f32 %v3629_v58 }
 0x191   :  { %vm329_vm9 = vmor %vm327_vm8, %vm328_vm7 }
 0x192   :  { %v320_v45 = vsel %vm319_vm4, %v3627_v60, %v316_v15  ;;  %v323_v55 = vmul.f32 %v3629_v58, %v322_v10 }
 0x193   :  { %v391_v51 = vmul.f32 %v320_v45, %v4053_v27  ;;  %v392_v62 = vmul.f32 %v320_v45, %v4056_v32 }
 0x194   :  { %v324_v59 = vmul.f32 0.5, %v323_v55 }
 0x195   :  { %vm407_vm5 = vcmp.ge.f32.partialorder %v391_v51, 0.0  ;;  %vm408_vm6 = vcmp.ge.f32.partialorder %v392_v62, 0.0  ;;  %v423_v2 = vmul.f32 0.2, %v391_v51  ;;  %v424_v19 = vmul.f32 0.2, %v392_v62 }
 0x196   :  { %v325_v3 = vsub.f32 1.5, %v324_v59 }
 0x197   :  { %v4163_v50 = vsel %vm407_vm5, %v391_v51, %v423_v2  ;;  %v4165_v1 = vsel %vm408_vm6, %v392_v62, %v424_v19 }
 0x198   :  { %7844 = vst [vmem:[#allocation52_spill] sm:$0xff] %v4163_v50  ;;  %v326_v41 = vmul.f32 %v3629_v58, %v325_v3  ;;  %592 = vrot.lane.b32.xlu2 %v4165_v1, %s3745_s29  ;;  %455 = vrot.lane.b32.xlu1 %v4163_v50, %s3746_s30 }
 0x199   :  { %7845 = vst [vmem:[#allocation53_spill] sm:$0xff] %v4165_v1  ;;  %471 = vrot.lane.b32.xlu0 %v4165_v1, %s3746_s30 }
 0x19a   :  { %v330_v32 = vsel %vm329_vm9, %v3629_v58, %v326_v41 }
 0x19b   :  { %v393_v15 = vmul.f32 %v330_v32, %v4068_v36  ;;  %v394_v27 = vmul.f32 %v330_v32, %v4071_v29 }
 0x19d   :  { %v425_v19 = vmul.f32 0.2, %v393_v15  ;;  %vm409_vm10 = vcmp.ge.f32.partialorder %v393_v15, 0.0  ;;  %v426_v58 = vmul.f32 0.2, %v394_v27  ;;  %vm410_vm11 = vcmp.ge.f32.partialorder %v394_v27, 0.0 }
 0x19f   :  { %v4181_v16 = vsel %vm409_vm10, %v393_v15, %v425_v19  ;;  %v4190_v10 = vsel %vm410_vm11, %v394_v27, %v426_v58 }
 0x1a0   :  { %802 = vrot.lane.b32.xlu2 %v4163_v50, %s3747_s5  ;;  %576 = vrot.lane.b32.xlu1 %v4163_v50, %s3745_s29  ;;  %7846 = vst [vmem:[#allocation54_spill] sm:$0xff] %v4181_v16 }
 0x1a1   :  { %689 = vrot.lane.b32.xlu0 %v4163_v50, %s3748_s6  ;;  %7847 = vst [vmem:[#allocation55_spill] sm:$0xff] %v4190_v10 }
 0x1a8   :  { %457 = vrot.lane.b32.xlu2 %v4181_v16, %s3746_s30  ;;  %705 = vrot.lane.b32.xlu1 %v4165_v1, %s3748_s6 }
 0x1a9   :  { %818 = vrot.lane.b32.xlu0 %v4165_v1, %s3747_s5 }
 0x1ab   :  { %v279_v36 = vpop.xlane.xlu1 %278 }
 0x1ac   :  { %v297_v43 = vmul.f32 %v279_v36, %v4045_v12  ;;  %v285_v36 = vpop.xlane.xlu0 %284 }
 0x1ae   :  { %v305_v60 = vadd.f32 1e-05, %v297_v43 }
 0x1b0   :  { %3630 = vrsqrt.f32 %v305_v60  ;;  %473 = vrot.lane.b32.xlu2 %v4190_v10, %s3746_s30  ;;  %963 = vrot.lane.b32.xlu1 %v4163_v50, %s3749_s7  ;;  %vm337_vm13 = vweird.f32 %v305_v60 }
 0x1b1   :  { %578 = vrot.lane.b32.xlu0 %v4181_v16, %s3745_s29 }
 0x1b3   :  { %v282_v29 = vpop.xlane.xlu2 %281 }
 0x1b4   :  { %v298_v45 = vmul.f32 %v282_v29, %v4045_v12 }
 0x1b6   :  { %v3631_v55 = vpop.eup %3630  ;;  %v306_v51 = vadd.f32 1e-05, %v298_v45  ;;  %v299_v45 = vmul.f32 %v285_v36, %v4045_v12 }
 0x1b7   :  { %v332_v62 = vmul.f32 %v3631_v55, %v305_v60  ;;  %vm338_vm12 = vweird.f32 %v3631_v55 }
 0x1b8   :  { %3632 = vrsqrt.f32 %v306_v51  ;;  %691 = vrot.lane.b32.xlu2 %v4181_v16, %s3748_s6  ;;  %594 = vrot.lane.b32.xlu1 %v4190_v10, %s3745_s29  ;;  %vm339_vm14 = vmor %vm337_vm13, %vm338_vm12  ;;  %vm347_vm3 = vweird.f32 %v306_v51 }
 0x1b9   :  { %v333_v59 = vmul.f32 %v3631_v55, %v332_v62  ;;  %707 = vrot.lane.b32.xlu0 %v4190_v10, %s3748_s6 }
 0x1bb   :  { %v334_v2 = vmul.f32 0.5, %v333_v59 }
 0x1bd   :  { %v335_v3 = vsub.f32 1.5, %v334_v2 }
 0x1be   :  { %v3633_v41 = vpop.eup %3632 }
 0x1bf   :  { %v336_v32 = vmul.f32 %v3631_v55, %v335_v3  ;;  %v342_v15 = vmul.f32 %v3633_v41, %v306_v51  ;;  %vm348_vm2 = vweird.f32 %v3633_v41 }
 0x1c0   :  { %820 = vrot.lane.b32.xlu2 %v4190_v10, %s3747_s5  ;;  %804 = vrot.lane.b32.xlu1 %v4181_v16, %s3747_s5  ;;  %vm349_vm4 = vmor %vm347_vm3, %vm348_vm2 }
 0x1c1   :  { %v340_v19 = vsel %vm339_vm14, %v3631_v55, %v336_v32  ;;  %965 = vrot.lane.b32.xlu0 %v4181_v16, %s3749_s7  ;;  %v343_v43 = vmul.f32 %v3633_v41, %v342_v15 }
 0x1c2   :  { %v395_v27 = vmul.f32 %v340_v19, %v4098_v24  ;;  %v396_v58 = vmul.f32 %v340_v19, %v4101_v30  ;;  %v307_v30 = vadd.f32 1e-05, %v299_v45 }
 0x1c3   :  { %v344_v55 = vmul.f32 0.5, %v343_v43 }
 0x1c4   :  { %vm411_vm15 = vcmp.ge.f32.partialorder %v395_v27, 0.0  ;;  %vm412_vm1 = vcmp.ge.f32.partialorder %v396_v58, 0.0  ;;  %v427_v60 = vmul.f32 0.2, %v395_v27  ;;  %v428_v29 = vmul.f32 0.2, %v396_v58 }
 0x1c5   :  { %v345_v24 = vsub.f32 1.5, %v344_v55  ;;  %3634 = vrsqrt.f32 %v307_v30  ;;  %vm357_vm8 = vweird.f32 %v307_v30 }
 0x1c6   :  { %v4214_v62 = vsel %vm411_vm15, %v395_v27, %v427_v60  ;;  %v4216_v59 = vsel %vm412_vm1, %v396_v58, %v428_v29  ;;  %v288_v60 = vpop.xlane.xlu1 %287 }
 0x1c7   :  { %7848 = vst [vmem:[#allocation56_spill] sm:$0xff] %v4214_v62  ;;  %v346_v2 = vmul.f32 %v3633_v41, %v345_v24  ;;  %v300_v29 = vmul.f32 %v288_v60, %v4045_v12  ;;  %v294_v60 = vpop.xlane.xlu0 %293 }
 0x1c8   :  { %7849 = vst [vmem:[#allocation57_spill] sm:$0xff] %v4216_v59  ;;  %475 = vrot.lane.b32.xlu1 %v4216_v59, %s3746_s30  ;;  %580 = vrot.lane.b32.xlu2 %v4214_v62, %s3745_s29 }
 0x1c9   :  { %459 = vrot.lane.b32.xlu0 %v4214_v62, %s3746_s30  ;;  %v350_v3 = vsel %vm349_vm4, %v3633_v41, %v346_v2  ;;  %v308_v24 = vadd.f32 1e-05, %v300_v29 }
 0x1ca   :  { %v397_v15 = vmul.f32 %v350_v3, %v4120_v35  ;;  %v398_v27 = vmul.f32 %v350_v3, %v4123_v31 }
 0x1cb   :  { %v3635_v32 = vpop.eup %3634  ;;  %v291_v55 = vpop.xlane.xlu2 %290  ;;  %3636 = vrsqrt.f32 %v308_v24  ;;  %vm367_vm13 = vweird.f32 %v308_v24 }
 0x1cc   :  { %v352_v19 = vmul.f32 %v3635_v32, %v307_v30  ;;  %v429_v58 = vmul.f32 0.2, %v397_v15  ;;  %vm413_vm5 = vcmp.ge.f32.partialorder %v397_v15, 0.0  ;;  %v430_v51 = vmul.f32 0.2, %v398_v27 }
 0x1cd   :  { %vm414_vm6 = vcmp.ge.f32.partialorder %v398_v27, 0.0  ;;  %vm358_vm7 = vweird.f32 %v3635_v32 }
 0x1ce   :  { %v353_v36 = vmul.f32 %v3635_v32, %v352_v19  ;;  %v4238_v41 = vsel %vm413_vm5, %v397_v15, %v429_v58  ;;  %v4240_v43 = vsel %vm414_vm6, %v398_v27, %v430_v51  ;;  %vm359_vm9 = vmor %vm357_vm8, %vm358_vm7 }
 0x1cf   :  { %7850 = vst [vmem:[#allocation58_spill] sm:$0xff] %v4240_v43 }
 0x1d0   :  { %693 = vrot.lane.b32.xlu1 %v4214_v62, %s3748_s6  ;;  %709 = vrot.lane.b32.xlu2 %v4216_v59, %s3748_s6  ;;  %v354_v35 = vmul.f32 0.5, %v353_v36 }
 0x1d1   :  { %596 = vrot.lane.b32.xlu0 %v4216_v59, %s3745_s29 }
 0x1d2   :  { %v355_v31 = vsub.f32 1.5, %v354_v35 }
 0x1d4   :  { %v356_v45 = vmul.f32 %v3635_v32, %v355_v31 }
 0x1d6   :  { %v360_v2 = vsel %vm359_vm9, %v3635_v32, %v356_v45  ;;  %v3637_v32 = vpop.eup %3636 }
 0x1d7   :  { %v399_v3 = vmul.f32 %v360_v2, %v4091_v4  ;;  %v400_v15 = vmul.f32 %v360_v2, %v4094_v37  ;;  %v362_v58 = vmul.f32 %v3637_v32, %v308_v24  ;;  %vm368_vm12 = vweird.f32 %v3637_v32 }
 0x1d8   :  { %822 = vrot.lane.b32.xlu1 %v4216_v59, %s3747_s5  ;;  %967 = vrot.lane.b32.xlu2 %v4214_v62, %s3749_s7  ;;  %v301_v2 = vmul.f32 %v291_v55, %v4045_v12  ;;  %vm369_vm14 = vmor %vm367_vm13, %vm368_vm12 }
 0x1d9   :  { %806 = vrot.lane.b32.xlu0 %v4214_v62, %s3747_s5  ;;  %v431_v30 = vmul.f32 0.2, %v399_v3  ;;  %v432_v27 = vmul.f32 0.2, %v400_v15  ;;  %vm415_vm10 = vcmp.ge.f32.partialorder %v399_v3, 0.0  ;;  %vm416_vm11 = vcmp.ge.f32.partialorder %v400_v15, 0.0 }
 0x1da   :  { %v363_v51 = vmul.f32 %v3637_v32, %v362_v58  ;;  %v309_v55 = vadd.f32 1e-05, %v301_v2 }
 0x1db   :  { %v4265_v4 = vsel %vm415_vm10, %v399_v3, %v431_v30  ;;  %v4267_v37 = vsel %vm416_vm11, %v400_v15, %v432_v27 }
 0x1dc   :  { %v364_v35 = vmul.f32 0.5, %v363_v51  ;;  %3638 = vrsqrt.f32 %v309_v55  ;;  %vm377_vm3 = vweird.f32 %v309_v55 }
 0x1de   :  { %v365_v29 = vsub.f32 1.5, %v364_v35 }
 0x1e0   :  { %582 = vrot.lane.b32.xlu1 %v4238_v41, %s3745_s29  ;;  %461 = vrot.lane.b32.xlu2 %v4238_v41, %s3746_s30  ;;  %v366_v45 = vmul.f32 %v3637_v32, %v365_v29 }
 0x1e1   :  { %477 = vrot.lane.b32.xlu0 %v4240_v43, %s3746_s30 }
 0x1e2   :  { %v370_v27 = vsel %vm369_vm14, %v3637_v32, %v366_v45 }
 0x1e3   :  { %v402_v58 = vmul.f32 %v370_v27, %v4116_v47  ;;  %v401_v51 = vmul.f32 %v370_v27, %v4113_v38  ;;  %v3639_v38 = vpop.eup %3638 }
 0x1e4   :  { %v372_v27 = vmul.f32 %v3639_v38, %v309_v55  ;;  %vm378_vm2 = vweird.f32 %v3639_v38 }
 0x1e5   :  { %v434_v32 = vmul.f32 0.2, %v402_v58  ;;  %vm418_vm15 = vcmp.ge.f32.partialorder %v402_v58, 0.0  ;;  %v433_v47 = vmul.f32 0.2, %v401_v51  ;;  %vm417_vm1 = vcmp.ge.f32.partialorder %v401_v51, 0.0  ;;  %vm379_vm4 = vmor %vm377_vm3, %vm378_vm2 }
 0x1e7   :  { %v4312_v45 = vsel %vm418_vm15, %v402_v58, %v434_v32  ;;  %v4314_v2 = vsel %vm417_vm1, %v401_v51, %v433_v47  ;;  %v373_v58 = vmul.f32 %v3639_v38, %v372_v27 }
 0x1e8   :  { %711 = vrot.lane.b32.xlu1 %v4240_v43, %s3748_s6  ;;  %598 = vrot.lane.b32.xlu2 %v4240_v43, %s3745_s29  ;;  %7860 = vst [vmem:[#allocation68_spill] sm:$0xff] %v4312_v45 }
 0x1e9   :  { %695 = vrot.lane.b32.xlu0 %v4238_v41, %s3748_s6  ;;  %7861 = vst [vmem:[#allocation69_spill] sm:$0xff] %v4314_v2  ;;  %v374_v51 = vmul.f32 0.5, %v373_v58 }
 0x1f0   :  { %969 = vrot.lane.b32.xlu1 %v4238_v41, %s3749_s7  ;;  %808 = vrot.lane.b32.xlu2 %v4238_v41, %s3747_s5 }
 0x1f1   :  { %824 = vrot.lane.b32.xlu0 %v4240_v43, %s3747_s5 }
 0x1f2   :  { %v4263_v19 = vpop.permute.xlu2 %592 }
 0x1f3   :  { %7851 = vst [vmem:[#allocation59_spill] sm:$0xff] %v4263_v19  ;;  %v375_v19 = vsub.f32 1.5, %v374_v51 }
 0x1f5   :  { %v376_v27 = vmul.f32 %v3639_v38, %v375_v19 }
 0x1f7   :  { %v380_v51 = vsel %vm379_vm4, %v3639_v38, %v376_v27 }
 0x1f8   :  { %463 = vrot.lane.b32.xlu1 %v4265_v4, %s3746_s30  ;;  %479 = vrot.lane.b32.xlu2 %v4267_v37, %s3746_s30 }
 0x1f9   :  { %584 = vrot.lane.b32.xlu0 %v4265_v4, %s3745_s29 }
 0x1fa   :  { %v4275_v36 = vpop.permute.xlu2 %802 }
 0x1fb   :  { %7852 = vst [vmem:[#allocation60_spill] sm:$0xff] %v4275_v36 }
 0x200   :  { %600 = vrot.lane.b32.xlu1 %v4267_v37, %s3745_s29  ;;  %697 = vrot.lane.b32.xlu2 %v4265_v4, %s3748_s6 }
 0x201   :  { %713 = vrot.lane.b32.xlu0 %v4267_v37, %s3748_s6 }
 0x202   :  { %v4283_v31 = vpop.permute.xlu2 %457 }
 0x203   :  { %7853 = vst [vmem:[#allocation61_spill] sm:$0xff] %v4283_v31 }
 0x208   :  { %810 = vrot.lane.b32.xlu1 %v4265_v4, %s3747_s5  ;;  %826 = vrot.lane.b32.xlu2 %v4267_v37, %s3747_s5 }
 0x209   :  { %1084 = vrot.lane.b32.xlu0 %v4265_v4, %s3750_s8 }
 0x20a   :  { %v4292_v3 = vpop.permute.xlu2 %473  ;;  %v4294_v15 = vpop.permute.xlu1 %455 }
 0x20b   :  { %7854 = vst [vmem:[#allocation62_spill] sm:$0xff] %v4292_v3  ;;  %v4296_v30 = vpop.permute.xlu0 %471 }
 0x20c   :  { %7855 = vst [vmem:[#allocation63_spill] sm:$0xff] %v4294_v15 }
 0x20d   :  { %7856 = vst [vmem:[#allocation64_spill] sm:$0xff] %v4296_v30 }
 0x210   :  { %1100 = vrot.lane.b32.xlu1 %v4267_v37, %s3750_s8  ;;  %971 = vrot.lane.b32.xlu2 %v4265_v4, %s3749_s7 }
 0x211   :  { %1213 = vrot.lane.b32.xlu0 %v4267_v37, %s3751_s9 }
 0x212   :  { %v4306_v24 = vpop.permute.xlu2 %691  ;;  %v4308_v35 = vpop.permute.xlu1 %576 }
 0x213   :  { %7857 = vst [vmem:[#allocation65_spill] sm:$0xff] %v4306_v24  ;;  %v4310_v29 = vpop.permute.xlu0 %689 }
 0x214   :  { %7858 = vst [vmem:[#allocation66_spill] sm:$0xff] %v4308_v35 }
 0x215   :  { %7859 = vst [vmem:[#allocation67_spill] sm:$0xff] %v4310_v29 }
 0x218   :  { %987 = vrot.lane.b32.xlu2 %v4267_v37, %s3749_s7  ;;  %481 = vrot.lane.b32.xlu1 %v4312_v45, %s3746_s30 }
 0x219   :  { %465 = vrot.lane.b32.xlu0 %v4314_v2, %s3746_s30 }
 0x21a   :  { %v4322_v24 = vpop.permute.xlu2 %820  ;;  %v4324_v3 = vpop.permute.xlu1 %705 }
 0x21b   :  { %7862 = vst [vmem:[#allocation70_spill] sm:$0xff] %v4322_v24  ;;  %v4326_v31 = vpop.permute.xlu0 %818 }
 0x21c   :  { %7863 = vst [vmem:[#allocation71_spill] sm:$0xff] %v4324_v3 }
 0x21d   :  { %7864 = vst [vmem:[#allocation72_spill] sm:$0xff] %v4326_v31 }
 0x220   :  { %1197 = vrot.lane.b32.xlu2 %v4265_v4, %s3751_s9  ;;  %699 = vrot.lane.b32.xlu1 %v4314_v2, %s3748_s6 }
 0x221   :  { %602 = vrot.lane.b32.xlu0 %v4312_v45, %s3745_s29 }
 0x222   :  { %v4334_v32 = vpop.permute.xlu2 %580  ;;  %v4336_v47 = vpop.permute.xlu1 %963 }
 0x223   :  { %7865 = vst [vmem:[#allocation73_spill] sm:$0xff] %v4334_v32  ;;  %v4338_v24 = vpop.permute.xlu0 %578  ;;  %v404_v32 = vmul.f32 %v380_v51, %v4153_v9  ;;  %v403_v9 = vmul.f32 %v380_v51, %v4150_v56 }
 0x224   :  { %7866 = vst [vmem:[#allocation74_spill] sm:$0xff] %v4336_v47 }
 0x225   :  { %7867 = vst [vmem:[#allocation75_spill] sm:$0xff] %v4338_v24  ;;  %v302_v24 = vmul.f32 %v294_v60, %v4045_v12  ;;  %v436_v27 = vmul.f32 0.2, %v404_v32  ;;  %vm420_vm5 = vcmp.ge.f32.partialorder %v404_v32, 0.0  ;;  %vm419_vm6 = vcmp.ge.f32.partialorder %v403_v9, 0.0 }
 0x227   :  { %v310_v38 = vadd.f32 1e-05, %v302_v24  ;;  %v4367_v60 = vsel %vm420_vm5, %v404_v32, %v436_v27 }
 0x228   :  { %828 = vrot.lane.b32.xlu1 %v4312_v45, %s3747_s5  ;;  %586 = vrot.lane.b32.xlu2 %v4314_v2, %s3745_s29  ;;  %7874 = vst [vmem:[#allocation82_spill] sm:$0xff] %v4367_v60 }
 0x229   :  { %812 = vrot.lane.b32.xlu0 %v4314_v2, %s3747_s5  ;;  %3640 = vrsqrt.f32 %v310_v38  ;;  %vm387_vm8 = vweird.f32 %v310_v38 }
 0x22a   :  { %v4346_v58 = vpop.permute.xlu2 %709  ;;  %v4348_v35 = vpop.permute.xlu1 %594 }
 0x22b   :  { %7868 = vst [vmem:[#allocation76_spill] sm:$0xff] %v4346_v58  ;;  %v4350_v47 = vpop.permute.xlu0 %707 }
 0x22c   :  { %7869 = vst [vmem:[#allocation77_spill] sm:$0xff] %v4348_v35  ;;  %v435_v35 = vmul.f32 0.2, %v403_v9 }
 0x22d   :  { %7870 = vst [vmem:[#allocation78_spill] sm:$0xff] %v4350_v47 }
 0x22e   :  { %v4381_v32 = vsel %vm419_vm6, %v403_v9, %v435_v35 }
 0x22f   :  { %v3641_v56 = vpop.eup %3640  ;;  %7877 = vst [vmem:[#allocation85_spill] sm:$0xff] %v4381_v32 }
 0x230   :  { %973 = vrot.lane.b32.xlu1 %v4314_v2, %s3749_s7  ;;  %715 = vrot.lane.b32.xlu2 %v4312_v45, %s3748_s6  ;;  %v382_v51 = vmul.f32 %v3641_v56, %v310_v38  ;;  %vm388_vm7 = vweird.f32 %v3641_v56 }
 0x231   :  { %1102 = vrot.lane.b32.xlu0 %v4312_v45, %s3750_s8  ;;  %vm389_vm9 = vmor %vm387_vm8, %vm388_vm7 }
 0x232   :  { %v4360_v19 = vpop.permute.xlu2 %967  ;;  %v4362_v55 = vpop.permute.xlu1 %804  ;;  %v383_v58 = vmul.f32 %v3641_v56, %v382_v51 }
 0x233   :  { %7871 = vst [vmem:[#allocation79_spill] sm:$0xff] %v4360_v19  ;;  %v4364_v47 = vpop.permute.xlu0 %965 }
 0x234   :  { %7872 = vst [vmem:[#allocation80_spill] sm:$0xff] %v4362_v55  ;;  %v384_v35 = vmul.f32 0.5, %v383_v58 }
 0x235   :  { %7873 = vst [vmem:[#allocation81_spill] sm:$0xff] %v4364_v47 }
 0x238   :  { %989 = vrot.lane.b32.xlu1 %v4312_v45, %s3749_s7  ;;  %1086 = vrot.lane.b32.xlu2 %v4314_v2, %s3750_s8 }
 0x239   :  { %483 = vrot.lane.b32.xlu0 %v4367_v60, %s3746_s30 }
 0x23a   :  { %v4375_v12 = vpop.permute.xlu2 %461  ;;  %v4377_v47 = vpop.permute.xlu1 %475 }
 0x23b   :  { %7875 = vst [vmem:[#allocation83_spill] sm:$0xff] %v4377_v47  ;;  %v4379_v24 = vpop.permute.xlu0 %459 }
 0x23c   :  { %7876 = vst [vmem:[#allocation84_spill] sm:$0xff] %v4379_v24 }
 0x240   :  { %1199 = vrot.lane.b32.xlu1 %v4314_v2, %s3751_s9  ;;  %1215 = vrot.lane.b32.xlu2 %v4312_v45, %s3751_s9 }
 0x241   :  { %701 = vrot.lane.b32.xlu0 %v4381_v32, %s3748_s6 }
 0x242   :  { %v4389_v27 = vpop.permute.xlu2 %598  ;;  %v4391_v55 = vpop.permute.xlu1 %693 }
 0x243   :  { %7878 = vst [vmem:[#allocation86_spill] sm:$0xff] %v4391_v55  ;;  %v4393_v19 = vpop.permute.xlu0 %596  ;;  %v385_v55 = vsub.f32 1.5, %v384_v35 }
 0x244   :  { %7879 = vst [vmem:[#allocation87_spill] sm:$0xff] %v4393_v19 }
 0x245   :  { %v386_v51 = vmul.f32 %v3641_v56, %v385_v55 }
 0x247   :  { %v390_v35 = vsel %vm389_vm9, %v3641_v56, %v386_v51 }
 0x248   :  { %588 = vrot.lane.b32.xlu1 %v4381_v32, %s3745_s29  ;;  %467 = vrot.lane.b32.xlu2 %v4381_v32, %s3746_s30  ;;  %v406_v56 = vmul.f32 %v390_v35, %v4140_v46 }
 0x249   :  { %830 = vrot.lane.b32.xlu0 %v4367_v60, %s3747_s5 }
 0x24a   :  { %v4401_v9 = vpop.permute.xlu2 %808  ;;  %v4403_v24 = vpop.permute.xlu1 %822  ;;  %v438_v3 = vmul.f32 0.2, %v406_v56  ;;  %vm422_vm11 = vcmp.ge.f32.partialorder %v406_v56, 0.0 }
 0x24b   :  { %7880 = vst [vmem:[#allocation88_spill] sm:$0xff] %v4401_v9  ;;  %v4405_v47 = vpop.permute.xlu0 %806 }
 0x24c   :  { %7881 = vst [vmem:[#allocation89_spill] sm:$0xff] %v4403_v24  ;;  %v4447_v46 = vsel %vm422_vm11, %v406_v56, %v438_v3 }
 0x24d   :  { %7882 = vst [vmem:[#allocation90_spill] sm:$0xff] %v4405_v47  ;;  %v405_v47 = vmul.f32 %v390_v35, %v4137_v23 }
 0x24f   :  { %v437_v30 = vmul.f32 0.2, %v405_v47  ;;  %vm421_vm10 = vcmp.ge.f32.partialorder %v405_v47, 0.0 }
 0x250   :  { %717 = vrot.lane.b32.xlu1 %v4367_v60, %s3748_s6  ;;  %604 = vrot.lane.b32.xlu2 %v4367_v60, %s3745_s29 }
 0x251   :  { %975 = vrot.lane.b32.xlu0 %v4381_v32, %s3749_s7  ;;  %v4433_v23 = vsel %vm421_vm10, %v405_v47, %v437_v30 }
 0x252   :  { %v4413_v58 = vpop.permute.xlu2 %479  ;;  %v4415_v19 = vpop.permute.xlu1 %582 }
 0x253   :  { %7883 = vst [vmem:[#allocation91_spill] sm:$0xff] %v4413_v58  ;;  %v4417_v24 = vpop.permute.xlu0 %477 }
 0x258   :  { %991 = vrot.lane.b32.xlu1 %v4367_v60, %s3749_s7  ;;  %814 = vrot.lane.b32.xlu2 %v4381_v32, %s3747_s5 }
 0x259   :  { %1104 = vrot.lane.b32.xlu0 %v4367_v60, %s3750_s8 }
 0x25a   :  { %v4426_v55 = vpop.permute.xlu2 %697  ;;  %v4428_v15 = vpop.permute.xlu1 %711 }
 0x25b   :  { %7884 = vst [vmem:[#allocation92_spill] sm:$0xff] %v4426_v55  ;;  %v4430_v38 = vpop.permute.xlu0 %695 }
 0x260   :  { %1201 = vrot.lane.b32.xlu1 %v4381_v32, %s3751_s9  ;;  %1088 = vrot.lane.b32.xlu2 %v4381_v32, %s3750_s8 }
 0x261   :  { %590 = vrot.lane.b32.xlu0 %v4433_v23, %s3745_s29 }
 0x262   :  { %v4441_v51 = vpop.permute.xlu2 %826  ;;  %v4443_v36 = vpop.permute.xlu1 %969 }
 0x263   :  { %7885 = vst [vmem:[#allocation93_spill] sm:$0xff] %v4441_v51  ;;  %v4445_v31 = vpop.permute.xlu0 %824  ;;  %v38_v51 = vlaneseq }
 0x264   :  { %7886 = vst [vmem:[#allocation94_spill] sm:$0xff] %v4443_v36 }
 0x265   :  { %7887 = vst [vmem:[#allocation95_spill] sm:$0xff] %v4445_v31 }
 0x268   :  { %1314 = vrot.lane.b32.xlu1 %v4381_v32, %s3752_s10  ;;  %1217 = vrot.lane.b32.xlu2 %v4367_v60, %s3751_s9 }
 0x269   :  { %719 = vrot.lane.b32.xlu0 %v4447_v46, %s3748_s6 }
 0x26a   :  { %v4455_v30 = vpop.permute.xlu2 %971  ;;  %v4457_v47 = vpop.permute.xlu1 %463 }
 0x26b   :  { %7888 = vst [vmem:[#allocation96_spill] sm:$0xff] %v4455_v30  ;;  %v4459_v35 = vpop.permute.xlu0 %584 }
 0x26c   :  { %7889 = vst [vmem:[#allocation97_spill] sm:$0xff] %v4457_v47  ;;  %v4681_v47 = vand.u32 127, %v38_v51 }
 0x26d   :  { %7890 = vst [vmem:[#allocation98_spill] sm:$0xff] %v4459_v35 }
 0x26e   :  { %vm77_vm13 = vcmp.ge.s32.totalorder %v4681_v47, 16  ;;  %vm7773_vm3 = vcmp.lt.s32.totalorder %v4681_v47, 17  ;;  %vm608_vm4 = vcmp.lt.s32.totalorder %v4681_v47, 16  ;;  %vm834_vm5 = vcmp.lt.s32.totalorder %v4681_v47, 1 }
 0x26f   :  { %vm721_vm6 = vcmp.lt.s32.totalorder %v4681_v47, 15  ;;  %vm7772_vm7 = vcmp.lt.s32.totalorder %v4681_v47, 112  ;;  %vm7774_vm8 = vcmp.lt.s32.totalorder %v4681_v47, 127  ;;  %vm1108_vm9 = vcmp.lt.s32.totalorder %v4681_v47, 113 }
 0x270   :  { %469 = vrot.lane.b32.xlu1 %v4433_v23, %s3746_s30  ;;  %1330 = vrot.lane.b32.xlu2 %v4367_v60, %s3752_s10  ;;  %vm7771_vm10 = vcmp.lt.s32.totalorder %v4681_v47, 111 }
 0x271   :  { %993 = vrot.lane.b32.xlu0 %v4447_v46, %s3749_s7 }
 0x272   :  { %v4467_v3 = vpop.permute.xlu2 %987  ;;  %v4469_v56 = vpop.permute.xlu1 %600 }
 0x273   :  { %7891 = vst [vmem:[#allocation99_spill] sm:$0xff] %v4467_v3  ;;  %v4471_v29 = vpop.permute.xlu0 %713 }
 0x274   :  { %7892 = vst [vmem:[#allocation100_spill] sm:$0xff] %v4469_v56  ;;  %v40_v56 = vadd.s32 128, %v4681_v47 }
 0x275   :  { %7893 = vst [vmem:[#allocation101_spill] sm:$0xff] %v4471_v29 }
 0x276   :  { %v52_v31 = vand.u32 15, %v40_v56  ;;  %vm84_vm15 = vcmp.lt.s32.totalorder %v40_v56, 240 }
 0x278   :  { %606 = vrot.lane.b32.xlu1 %v4447_v46, %s3745_s29  ;;  %485 = vrot.lane.b32.xlu2 %v4447_v46, %s3746_s30  ;;  %vm66_vm1 = vcmp.ne.s32.totalorder %v52_v31, 0  ;;  %vm72_vm2 = vcmp.ne.s32.totalorder %v52_v31, 15 }
 0x279   :  { %1203 = vrot.lane.b32.xlu0 %v4433_v23, %s3751_s9 }
 0x27a   :  { %v4479_v36 = vpop.permute.xlu2 %1197  ;;  %v4481_v63 = vpop.permute.xlu1 %810 }
 0x27b   :  { %7894 = vst [vmem:[#allocation102_spill] sm:$0xff] %v4479_v36  ;;  %v4483_v5 = vpop.permute.xlu0 %1084 }
 0x27c   :  { %7895 = vst [vmem:[#allocation103_spill] sm:$0xff] %v4481_v63 }
 0x27d   :  { %7896 = vst [vmem:[#allocation104_spill] sm:$0xff] %v4483_v5  ;;  %v7905_v5 = vmov 6  }
 0x280   :  { %816 = vrot.lane.b32.xlu1 %v4433_v23, %s3747_s5  ;;  %703 = vrot.lane.b32.xlu2 %v4433_v23, %s3748_s6 }
 0x281   :  { %1316 = vrot.lane.b32.xlu0 %v4433_v23, %s3752_s10 }
 0x282   :  { %v4491_v13 = vpop.permute.xlu2 %586  ;;  %v4493_v49 = vpop.permute.xlu1 %1100 }
 0x283   :  { %7897 = vst [vmem:[#allocation105_spill] sm:$0xff] %v4491_v13  ;;  %v4495_v14 = vpop.permute.xlu0 %1213 }
 0x284   :  { %7898 = vst [vmem:[#allocation106_spill] sm:$0xff] %v4493_v49 }
 0x285   :  { %7899 = vst [vmem:[#allocation107_spill] sm:$0xff] %v4495_v14 }
 0x288   :  { %1090 = vrot.lane.b32.xlu1 %v4433_v23, %s3750_s8  ;;  %832 = vrot.lane.b32.xlu2 %v4447_v46, %s3747_s5 }
 0x289   :  { %1275 = vperm.xlu0 %3603, %v4504_v40  }
 0x28a   :  { %v4507_v42 = vpop.permute.xlu2 %715  ;;  %v4509_v25 = vpop.permute.xlu1 %481 }
 0x28b   :  { %7900 = vst [vmem:[#allocation108_spill] sm:$0xff] %v4507_v42  ;;  %v4511_v61 = vpop.permute.xlu0 %465 }
 0x28c   :  { %7901 = vst [vmem:[#allocation109_spill] sm:$0xff] %v4509_v25 }
 0x28d   :  { %7902 = vst [vmem:[#allocation110_spill] sm:$0xff] %v4511_v61 }
 0x290   :  { %1219 = vrot.lane.b32.xlu1 %v4447_v46, %s3751_s9  ;;  %977 = vrot.lane.b32.xlu2 %v4433_v23, %s3749_s7 }
 0x291   :  { %1096 = vrot.lane.b32.xlu0 %v4216_v59, %s3750_s8 }
 0x292   :  { %v4519_v14 = vpop.permute.xlu2 %1086  ;;  %v4521_v36 = vpop.permute.xlu1 %699  ;;  %3611 = vset.pattern.permute.xlu0 %v7905_v5 }
 0x293   :  { %7903 = vst [vmem:[#allocation111_spill] sm:$0xff] %v4519_v14  ;;  %v4524_v42 = vpop.permute.xlu0 %602 }
 0x294   :  { %7904 = vst [vmem:[#allocation112_spill] sm:$0xff] %v4521_v36  ;;  %v3707_v36 = vld [vmem:[%s7503_s2 + $0x20] sm:$0xff] }
 0x295   :  { %7906 = vst [vmem:[#allocation113_spill] sm:$0xff] %v4524_v42 }
 0x298   :  { %1332 = vrot.lane.b32.xlu1 %v4447_v46, %s3752_s10  ;;  %1106 = vrot.lane.b32.xlu2 %v4447_v46, %s3750_s8 }
 0x299   :  { %1195 = vrot.lane.b32.xlu0 %v4238_v41, %s3751_s9 }
 0x29a   :  { %v4532_v61 = vpop.permute.xlu2 %1215  ;;  %v4534_v25 = vpop.permute.xlu1 %828 }
 0x29b   :  { %7907 = vst [vmem:[#allocation114_spill] sm:$0xff] %v4532_v61  ;;  %v4536_v14 = vpop.permute.xlu0 %812  ;;  %v4557_v61 = vld [vmem:[%s7503_s2 + $0x10] sm:$0xff] }
 0x29c   :  { %7908 = vst [vmem:[#allocation115_spill] sm:$0xff] %v4534_v25  ;;  %v7590_v25 = vmov 8  }
 0x29d   :  { %7909 = vst [vmem:[#allocation116_spill] sm:$0xff] %v4536_v14 }
 0x2a0   :  { %1271 = vperm.xlu1 %3607, %v3707_v36   ;;  %1162 = vperm.xlu2 %3606, %v4504_v40  }
 0x2a1   :  { %1328 = vrot.lane.b32.xlu0 %v4312_v45, %s3752_s10 }
 0x2a2   :  { %v4544_v49 = vpop.permute.xlu2 %467  ;;  %v4546_v42 = vpop.permute.xlu1 %973 }
 0x2a3   :  { %7910 = vst [vmem:[#allocation117_spill] sm:$0xff] %v4544_v49  ;;  %v4548_v13 = vpop.permute.xlu0 %1102 }
 0x2a4   :  { %7911 = vst [vmem:[#allocation118_spill] sm:$0xff] %v4546_v42 }
 0x2a5   :  { %7912 = vst [vmem:[#allocation119_spill] sm:$0xff] %v4548_v13  ;;  %v7915_v13 = vmov 5  }
 0x2a8   :  { %985 = vrot.lane.b32.xlu1 %v4240_v43, %s3749_s7  ;;  %983 = vrot.lane.b32.xlu2 %v4216_v59, %s3749_s7 }
 0x2a9   :  { %1150 = vperm.xlu0 %3611, %v4557_v61   ;;  %3608 = vset.pattern.permute.xlu2 %v7590_v25 }
 0x2aa   :  { %v4561_v49 = vpop.permute.xlu2 %604  ;;  %v4563_v42 = vpop.permute.xlu1 %989  ;;  %3610 = vset.pattern.permute.xlu1 %v7915_v13 }
 0x2ab   :  { %7913 = vst [vmem:[#allocation120_spill] sm:$0xff] %v4561_v49  ;;  %v4566_v14 = vpop.permute.xlu0 %483 }
 0x2ac   :  { %7914 = vst [vmem:[#allocation121_spill] sm:$0xff] %v4563_v42 }
 0x2ad   :  { %7916 = vst [vmem:[#allocation122_spill] sm:$0xff] %v4566_v14 }
 0x2b0   :  { %1082 = vrot.lane.b32.xlu1 %v4238_v41, %s3750_s8  ;;  %1080 = vrot.lane.b32.xlu2 %v4214_v62, %s3750_s8 }
 0x2b1   :  { %981 = vrot.lane.b32.xlu0 %v4190_v10, %s3749_s7 }
 0x2b2   :  { %v4574_v7 = vpop.permute.xlu2 %814  ;;  %v4576_v25 = vpop.permute.xlu1 %1199 }
 0x2b3   :  { %7917 = vst [vmem:[#allocation123_spill] sm:$0xff] %v4574_v7  ;;  %v4578_v49 = vpop.permute.xlu0 %701 }
 0x2b4   :  { %7918 = vst [vmem:[#allocation124_spill] sm:$0xff] %v4576_v25 }
 0x2b5   :  { %7919 = vst [vmem:[#allocation125_spill] sm:$0xff] %v4578_v49 }
 0x2b8   :  { %1193 = vrot.lane.b32.xlu1 %v4214_v62, %s3751_s9  ;;  %1098 = vrot.lane.b32.xlu2 %v4240_v43, %s3750_s8 }
 0x2b9   :  { %1092 = vrot.lane.b32.xlu0 %v4165_v1, %s3750_s8 }
 0x2ba   :  { %v4586_v42 = vpop.permute.xlu2 %1088  ;;  %v4588_v14 = vpop.permute.xlu1 %588 }
 0x2bb   :  { %7920 = vst [vmem:[#allocation126_spill] sm:$0xff] %v4586_v42  ;;  %v4590_v17 = vpop.permute.xlu0 %830 }
 0x2bc   :  { %7921 = vst [vmem:[#allocation127_spill] sm:$0xff] %v4588_v14  ;;  %v3709_v14 = vld [vmem:[%s7503_s2 + $0x38] sm:$0xff] }
 0x2bd   :  { %7922 = vst [vmem:[#allocation128_spill] sm:$0xff] %v4590_v17 }
 0x2c0   :  { %1211 = vrot.lane.b32.xlu1 %v4240_v43, %s3751_s9  ;;  %1209 = vrot.lane.b32.xlu2 %v4216_v59, %s3751_s9 }
 0x2c1   :  { %1191 = vrot.lane.b32.xlu0 %v4181_v16, %s3751_s9 }
 0x2c2   :  { %v4598_v25 = vpop.permute.xlu2 %1217  ;;  %v4600_v7 = vpop.permute.xlu1 %717 }
 0x2c3   :  { %7923 = vst [vmem:[#allocation129_spill] sm:$0xff] %v4598_v25  ;;  %v4602_v49 = vpop.permute.xlu0 %975 }
 0x2c4   :  { %7924 = vst [vmem:[#allocation130_spill] sm:$0xff] %v4600_v7  ;;  %v7930_v7 = vmov 8  }
 0x2c5   :  { %7925 = vst [vmem:[#allocation131_spill] sm:$0xff] %v4602_v49  ;;  %v4624_v49 = vld [vmem:[%s7503_s2] sm:$0xff] }
 0x2c8   :  { %1310 = vrot.lane.b32.xlu1 %v4265_v4, %s3752_s10  ;;  %1396 = vperm.xlu2 %3608, %v3709_v14  }
 0x2c9   :  { %1324 = vrot.lane.b32.xlu0 %v4240_v43, %s3752_s10 }
 0x2ca   :  { %v4611_v42 = vpop.permute.xlu2 %1330  ;;  %v4613_v17 = vpop.permute.xlu1 %991 }
 0x2cb   :  { %7926 = vst [vmem:[#allocation132_spill] sm:$0xff] %v4611_v42  ;;  %v4615_v25 = vpop.permute.xlu0 %1104 }
 0x2cc   :  { %7927 = vst [vmem:[#allocation133_spill] sm:$0xff] %v4613_v17  ;;  %v3711_v17 = vld [vmem:[%s7503_s2 + $0x18] sm:$0xff] }
 0x2cd   :  { %7928 = vst [vmem:[#allocation134_spill] sm:$0xff] %v4615_v25 }
 0x2d0   :  { %1326 = vrot.lane.b32.xlu1 %v4267_v37, %s3752_s10  ;;  %1312 = vrot.lane.b32.xlu2 %v4314_v2, %s3752_s10 }
 0x2d1   :  { %1142 = vperm.xlu0 %3611, %v4624_v49   ;;  %3609 = vset.pattern.permute.xlu2 %v7915_v13 }
 0x2d2   :  { %v4628_v14 = vpop.permute.xlu2 %485  ;;  %v4630_v42 = vpop.permute.xlu1 %1201 }
 0x2d3   :  { %7929 = vst [vmem:[#allocation135_spill] sm:$0xff] %v4630_v42  ;;  %v4632_v25 = vpop.permute.xlu0 %590 }
 0x2d8   :  { %1041 = vperm.xlu1 %3610, %v3711_v17   ;;  %1037 = vperm.xlu2 %3609, %v4557_v61  }
 0x2d9   :  { %3618 = vset.pattern.permute.xlu0 %v7930_v7 }
 0x2da   :  { %1392 = vperm.xlu0 %3618, %v3712_v21   ;;  %v4642_v33 = vpop.permute.xlu2 %703  ;;  %v4644_v20 = vpop.permute.xlu1 %1314 }
 0x2db   :  { %7931 = vst [vmem:[#allocation136_spill] sm:$0xff] %v4644_v20  ;;  %v4646_v42 = vpop.permute.xlu0 %719 }
 0x2dc   :  { %v729_v53 = vsel %vm721_vm6, %v4642_v33, %v4646_v42 }
 0x2e0   :  { %3613 = vset.pattern.permute.xlu1 %v7932_v52  ;;  %3612 = vset.pattern.permute.xlu2 %v7905_v5 }
 0x2e1   :  { %1263 = vperm.xlu1 %3613, %v4557_v61   ;;  %1154 = vperm.xlu2 %3612, %v3711_v17  }
 0x2e2   :  { %1384 = vperm.xlu0 %3618, %v3707_v36   ;;  %v4651_v8 = vpop.permute.xlu2 %832  ;;  %v4653_v34 = vpop.permute.xlu1 %469 }
 0x2e3   :  { %v4655_v55 = vpop.permute.xlu0 %993 }
 0x2e9   :  { %979 = vrot.lane.b32.xlu1 %v4165_v1, %s3749_s7  ;;  %3614 = vset.pattern.permute.xlu2 %v7932_v52 }
 0x2ea   :  { %1267 = vperm.xlu2 %3614, %v3711_v17   ;;  %v978_v21 = vpop.permute.xlu2 %977  ;;  %v4660_v20 = vpop.permute.xlu1 %606  ;;  %1380 = vperm.xlu0 %3618, %v3711_v17  }
 0x2eb   :  { %v4662_v29 = vpop.permute.xlu0 %1203  ;;  %3617 = vset.pattern.permute.xlu1 %v7915_v13  ;;  %v1011_v60 = vsel %vm7774_vm8, %v4655_v55, %v978_v21 }
 0x2f1   :  { %1078 = vrot.lane.b32.xlu1 %v4181_v16, %s3750_s8 }
 0x2f2   :  { %1076 = vrot.lane.b32.xlu2 %v4163_v50, %s3750_s8  ;;  %v1107_v36 = vpop.permute.xlu2 %1106  ;;  %v817_v30 = vpop.permute.xlu1 %816  ;;  %1368 = vperm.xlu0 %3618, %v4624_v49  }
 0x2f3   :  { %v4670_v3 = vpop.permute.xlu0 %1316  ;;  %3615 = vset.pattern.permute.xlu2 %v7930_v7  ;;  %v842_v28 = vsel %vm834_vm5, %v817_v30, %v4651_v8  ;;  %v850_v32 = vsel %vm834_vm5, %v4651_v8, %v817_v30  ;;  %v495_v8 = vsel %vm7773_vm3, %v4653_v34, %v4628_v14 }
 0x2f9   :  { %1189 = vrot.lane.b32.xlu1 %v4163_v50, %s3751_s9 }
 0x2fa   :  { %1094 = vrot.lane.b32.xlu2 %v4190_v10, %s3750_s8  ;;  %v4677_v17 = vpop.permute.xlu2 %1162  ;;  %v1091_v16 = vpop.permute.xlu1 %1090 }
 0x2fb   :  { %7933 = vst [vmem:[#allocation137_spill] sm:$0xff] %v4677_v17  ;;  %v4679_v63 = vpop.permute.xlu0 %1275  ;;  %v45_v17 = vand.u32 15, %v4681_v47  ;;  %v1116_v45 = vsel %vm1108_vm9, %v1091_v16, %v1107_v36  ;;  %v1124_v44 = vsel %vm1108_vm9, %v1107_v36, %v1091_v16  ;;  %v503_v16 = vsel %vm7773_vm3, %v4628_v14, %v4653_v34 }
 0x2fc   :  { %7934 = vst [vmem:[#allocation138_spill] sm:$0xff] %v4679_v63  ;;  %v3754_v63 = vmov 0.0  }
 0x2fd   :  { %vm65_vm12 = vcmp.ne.s32.totalorder %v45_v17, 0  ;;  %vm71_vm14 = vcmp.ne.s32.totalorder %v45_v17, 15  ;;  %v4709_v17 = vsel %vm84_vm15, 1.0, %v3754_v63  ;;  %v4711_v56 = vsel %vm66_vm1, 1.0, %v3754_v63 }
 0x2fe   :  { %v4707_v9 = vsel %vm71_vm14, 1.0, %v3754_v63  ;;  %7941 = vst [vmem:[#allocation145_spill] sm:$0xff] %v4711_v56  ;;  %v4726_v31 = vsel %vm72_vm2, 1.0, %v3754_v63 }
 0x301   :  { %1207 = vrot.lane.b32.xlu1 %v4190_v10, %s3751_s9 }
 0x302   :  { %1205 = vrot.lane.b32.xlu2 %v4165_v1, %s3751_s9  ;;  %v4687_v58 = vpop.permute.xlu2 %983  ;;  %v1220_v50 = vpop.permute.xlu1 %1219  ;;  %v4703_v1 = vsel %vm77_vm13, 1.0, %v3754_v63 }
 0x303   :  { %7935 = vst [vmem:[#allocation139_spill] sm:$0xff] %v4687_v58  ;;  %v4690_v35 = vpop.permute.xlu0 %1096 }
 0x304   :  { %7936 = vst [vmem:[#allocation140_spill] sm:$0xff] %v4690_v35  ;;  %v4701_v35 = vsel %vm65_vm12, 1.0, %v3754_v63  ;;  %v1003_v63 = vsel %vm7774_vm8, %v978_v21, %v4655_v55 }
 0x305   :  { %7938 = vst [vmem:[#allocation142_spill] sm:$0xff] %v4701_v35  ;;  %v865_v34 = vmul.f32 %v4701_v35, %v850_v32  ;;  %v1139_v14 = vmul.f32 %v4701_v35, %v1116_v45 }
 0x306   :  { %7939 = vst [vmem:[#allocation143_spill] sm:$0xff] %v4703_v1 }
 0x307   :  { %v1187_v32 = vmul.f32 %v4081_v6, %v1139_v14 }
 0x309   :  { %1306 = vrot.lane.b32.xlu1 %v4214_v62, %s3752_s10  ;;  %v4731_v62 = vmul.f32 %v4709_v17, %v4711_v56 }
 0x30a   :  { %1388 = vperm.xlu2 %3615, %v4504_v40   ;;  %v4697_v51 = vpop.permute.xlu2 %1080  ;;  %v4699_v58 = vpop.permute.xlu1 %1332  ;;  %v4715_v40 = vmul.f32 %v4703_v1, %v4701_v35 }
 0x30b   :  { %7937 = vst [vmem:[#allocation141_spill] sm:$0xff] %v4697_v51  ;;  %v4705_v10 = vpop.permute.xlu0 %1195  ;;  %v4722_v51 = vmul.f32 %v4703_v1, %v4707_v9 }
 0x30c   :  { %7940 = vst [vmem:[#allocation144_spill] sm:$0xff] %v4705_v10  ;;  %v1237_v10 = vsel %vm7772_vm7, %v1220_v50, %v4662_v29 }
 0x30d   :  { %7942 = vst [vmem:[#allocation146_spill] sm:$0xff] %v4715_v40  ;;  %v1253_v30 = vmul.f32 %v4709_v17, %v1237_v10  ;;  %v866_v10 = vmul.f32 %v4711_v56, %v842_v28 }
 0x30e   :  { %7943 = vst [vmem:[#allocation147_spill] sm:$0xff] %v4722_v51 }
 0x311   :  { %1322 = vrot.lane.b32.xlu1 %v4216_v59, %s3752_s10  ;;  %v737_v59 = vsel %vm721_vm6, %v4646_v42, %v4642_v33  ;;  %v1027_v33 = vmul.f32 %v4726_v31, %v1011_v60  ;;  %v624_v42 = vsel %vm608_vm4, %v4660_v20, %v4632_v25  ;;  %v753_v60 = vmul.f32 %v4726_v31, %v729_v53 }
 0x312   :  { %1308 = vrot.lane.b32.xlu2 %v4238_v41, %s3752_s10  ;;  %v4761_v55 = vpop.permute.xlu2 %1098  ;;  %v4763_v21 = vpop.permute.xlu1 %1271  ;;  %v639_v2 = vmul.f32 %v4703_v1, %v624_v42  ;;  %v913_v53 = vmul.f32 %v4035_v26, %v865_v34 }
 0x313   :  { %7944 = vst [vmem:[#allocation148_spill] sm:$0xff] %v4761_v55  ;;  %v4778_v36 = vpop.permute.xlu0 %1328  ;;  %3616 = vset.pattern.permute.xlu2 %v7915_v13  ;;  %v1026_v55 = vmul.f32 %v4707_v9, %v1003_v63  ;;  %v1140_v13 = vmul.f32 %v1124_v44, %v4731_v62  ;;  %v752_v63 = vmul.f32 %v737_v59, %v4722_v51 }
 0x314   :  { %7945 = vst [vmem:[#allocation149_spill] sm:$0xff] %v4763_v21  ;;  %v1229_v21 = vsel %vm7772_vm7, %v4662_v29, %v1220_v50  ;;  %v1301_v50 = vmul.f32 %v4146_v54, %v1253_v30  ;;  %v519_v29 = vmul.f32 %v4711_v56, %v495_v8  ;;  %v1075_v45 = vmul.f32 %v4077_v0, %v1027_v33  ;;  %v4814_v8 = vld [vmem:[%s7503_s2 + $0x8] sm:$0xff] }
 0x315   :  { %7946 = vst [vmem:[#allocation150_spill] sm:$0xff] %v4778_v36  ;;  %v518_v36 = vmul.f32 %v503_v16, %v4715_v40  ;;  %v1300_v43 = vmul.f32 %v4146_v54, %v1229_v21  ;;  %v1074_v28 = vmul.f32 %v4077_v0, %v1026_v55  ;;  %v616_v44 = vsel %vm608_vm4, %v4632_v25, %v4660_v20 }
 0x316   :  { %v914_v59 = vmul.f32 %v4035_v26, %v866_v10  ;;  %v1188_v21 = vmul.f32 %v4081_v6, %v1140_v13  ;;  %v800_v55 = vmul.f32 %v4009_v11, %v752_v63  ;;  %v801_v16 = vmul.f32 %v4009_v11, %v753_v60  ;;  %v7978_v11 = vld [vmem:[#allocation96_spill] sm:$0xff] }
 0x317   :  { %v961_v20 = vmul.f32 %v4064_v48, %v4433_v23  ;;  %v962_v25 = vmul.f32 %v4064_v48, %v4447_v46  ;;  %v687_v42 = vmul.f32 %v3971_v57, %v639_v2  ;;  %v688_v34 = vmul.f32 %v3971_v57, %v616_v44  ;;  %v7981_v57 = vld [vmem:[#allocation101_spill] sm:$0xff]  ;;  %v7982_v48 = vld [vmem:[#allocation92_spill] sm:$0xff] }
 0x318   :  { %v1477_v10 = vadd.f32 %v1300_v43, %v1187_v32  ;;  %v1478_v14 = vadd.f32 %v1301_v50, %v1188_v21  ;;  %v574_v23 = vmul.f32 %v3928_v39, %v518_v36  ;;  %v575_v46 = vmul.f32 %v3928_v39, %v519_v29  ;;  %v7980_v39 = vld [vmem:[#allocation52_spill] sm:$0xff] }
 0x319   :  { %1033 = vperm.xlu1 %3617, %v4814_v8   ;;  %v1461_v63 = vadd.f32 %v1074_v28, %v961_v20  ;;  %v1462_v60 = vadd.f32 %v1075_v45, %v962_v25  ;;  %v1445_v54 = vadd.f32 %v913_v53, %v800_v55  ;;  %v1446_v6 = vadd.f32 %v914_v59, %v801_v16 }
 0x31a   :  { %1029 = vperm.xlu2 %3616, %v4624_v49   ;;  %v4824_v30 = vpop.permute.xlu2 %1209  ;;  %v4826_v33 = vpop.permute.xlu1 %985  ;;  %v4837_v0 = vmul.f32 %v4709_v17, %v4726_v31  ;;  %v1342_v43 = vsel %vm7771_vm10, %v4670_v3, %v4699_v58  ;;  %v1350_v2 = vsel %vm7771_vm10, %v4699_v58, %v4670_v3  ;;  %v1429_v36 = vadd.f32 %v687_v42, %v574_v23 }
 0x31b   :  { %7947 = vst [vmem:[#allocation151_spill] sm:$0xff] %v4824_v30  ;;  %v4830_v13 = vpop.permute.xlu0 %1150  ;;  %v1430_v50 = vadd.f32 %v688_v34, %v575_v46  ;;  %v1509_v29 = vadd.f32 %v1477_v10, %v1461_v63  ;;  %v1510_v28 = vadd.f32 %v1478_v14, %v1462_v60  ;;  %v1365_v45 = vmul.f32 %v4707_v9, %v1342_v43  ;;  %v7959_v63 = vld [vmem:[#allocation69_spill] sm:$0xff]  ;;  %v7960_v60 = vld [vmem:[#allocation42_spill] sm:$0xff] }
 0x31c   :  { %7948 = vst [vmem:[#allocation152_spill] sm:$0xff] %v4830_v13  ;;  %v1366_v44 = vmul.f32 %v1350_v2, %v4837_v0  ;;  %v1493_v53 = vadd.f32 %v1445_v54, %v1429_v36  ;;  %v491_v10 = vsel %vm7773_vm3, %v4375_v12, %v4417_v24  ;;  %v499_v14 = vsel %vm7773_vm3, %v4417_v24, %v4375_v12  ;;  %v7957_v24 = vld [vmem:[#allocation58_spill] sm:$0xff]  ;;  %v7961_v2 = vld [vmem:[#allocation68_spill] sm:$0xff]  ;;  %v8007_v13 = vld [vmem:[#allocation109_spill] sm:$0xff] }
 0x31d   :  { %7949 = vst [vmem:[#allocation153_spill] sm:$0xff] %v4837_v0  ;;  %v1494_v59 = vadd.f32 %v1446_v6, %v1430_v50  ;;  %v4890_v23 = vmul.f32 %v4049_v22, %v4265_v4  ;;  %v725_v46 = vsel %vm721_vm6, %v4430_v38, %v4428_v15  ;;  %v733_v12 = vsel %vm721_vm6, %v4428_v15, %v4430_v38  ;;  %v7962_v50 = vld [vmem:[#allocation85_spill] sm:$0xff]  ;;  %v7964_v15 = vld [vmem:[#allocation82_spill] sm:$0xff] }
 0x31e   :  { %v1525_v55 = vadd.f32 %v1509_v29, %v1493_v53  ;;  %v4908_v4 = vmul.f32 %v4047_v18, %v4238_v41  ;;  %v4916_v43 = vmul.f32 %v7960_v60, %v7959_v63  ;;  %v4920_v36 = vmul.f32 %v7960_v60, %v7961_v2  ;;  %v7963_v29 = vld [vmem:[#allocation35_spill] sm:$0xff]  ;;  %v7966_v53 = vld [vmem:[#allocation13_spill] sm:$0xff]  ;;  %v8008_v30 = vld [vmem:[#allocation110_spill] sm:$0xff] }
 0x31f   :  { %v1526_v16 = vadd.f32 %v1510_v28, %v1494_v59  ;;  %v4924_v28 = vmul.f32 %v7963_v29, %v7962_v50  ;;  %v4928_v41 = vmul.f32 %v7963_v29, %v7964_v15  ;;  %v510_v38 = vmul.f32 %v499_v14, %v4715_v40  ;;  %v7975_v2 = vld [vmem:[#allocation103_spill] sm:$0xff]  ;;  %v7976_v50 = vld [vmem:[#allocation93_spill] sm:$0xff] }
 0x320   :  { %7956 = vst [vmem:[#allocation160_spill] sm:$0xff] %v4908_v4  ;;  %v847_v15 = vsel %vm834_vm5, %v7976_v50, %v7975_v2  ;;  %v726_v29 = vsel %vm721_vm6, %v7982_v48, %v7981_v57 }
 0x321   :  { %3620 = vset.pattern.permute.xlu1 %v7932_v52  ;;  %v859_v60 = vmul.f32 %v4701_v35, %v847_v15  ;;  %v7987_v15 = vld [vmem:[#allocation22_spill] sm:$0xff] }
 0x322   :  { %3619 = vset.pattern.permute.xlu2 %v7905_v5  ;;  %v4851_v32 = vpop.permute.xlu2 %1396  ;;  %1255 = vperm.xlu1 %3620, %v4624_v49   ;;  %v4854_v21 = vpop.permute.xlu1 %1082  ;;  %v620_v49 = vsel %vm608_vm4, %v4389_v27, %v4415_v19 }
 0x323   :  { %7950 = vst [vmem:[#allocation154_spill] sm:$0xff] %v4851_v32  ;;  %1146 = vperm.xlu2 %3619, %v4814_v8   ;;  %v1413_v58 = vmul.f32 %v4851_v32, %v1365_v45  ;;  %v1414_v3 = vmul.f32 %v4851_v32, %v1366_v44  ;;  %v4859_v20 = vpop.permute.xlu0 %981  ;;  %v631_v34 = vmul.f32 %v4703_v1, %v620_v49  ;;  %v7970_v49 = vld [vmem:[#allocation98_spill] sm:$0xff]  ;;  %v7977_v32 = vld [vmem:[#allocation99_spill] sm:$0xff] }
 0x324   :  { %7951 = vst [vmem:[#allocation155_spill] sm:$0xff] %v4859_v20  ;;  %v511_v45 = vmul.f32 %v4711_v56, %v491_v10  ;;  %v4936_v44 = vsel %vm608_vm4, %v4415_v19, %v4389_v27  ;;  %v7971_v10 = vld [vmem:[#allocation100_spill] sm:$0xff] }
 0x325   :  { %v4861_v54 = vadd.f32 %v1525_v55, %v1413_v58  ;;  %v4863_v6 = vadd.f32 %v1526_v16, %v1414_v3  ;;  %7965 = vst [vmem:[#allocation69_spill] sm:$0xff] %v4936_v44  ;;  %v4939_v59 = vmul.f32 %v7966_v53, %v631_v34  ;;  %v744_v58 = vmul.f32 %v733_v12, %v4722_v51  ;;  %v7968_v55 = vld [vmem:[#allocation88_spill] sm:$0xff]  ;;  %v7969_v16 = vld [vmem:[#allocation95_spill] sm:$0xff] }
 0x326   :  { %v745_v3 = vmul.f32 %v4726_v31, %v725_v46  ;;  %v621_v14 = vsel %vm608_vm4, %v7971_v10, %v7970_v49  ;;  %v838_v27 = vsel %vm834_vm5, %v7968_v55, %v7969_v16  ;;  %v7973_v34 = vld [vmem:[#allocation91_spill] sm:$0xff]  ;;  %v7974_v46 = vld [vmem:[#allocation97_spill] sm:$0xff] }
 0x327   :  { %7952 = vst [vmem:[#allocation156_spill] sm:$0xff] %v4861_v54  ;;  %v1564_v5 = vadd.f32 %v4863_v6, %v4861_v54  ;;  %v492_v12 = vsel %vm7773_vm3, %v7974_v46, %v7973_v34  ;;  %v500_v63 = vsel %vm7773_vm3, %v7973_v34, %v7974_v46  ;;  %v839_v34 = vsel %vm834_vm5, %v7975_v2, %v7976_v50  ;;  %v7979_v46 = vld [vmem:[#allocation54_spill] sm:$0xff] }
 0x328   :  { %7953 = vst [vmem:[#allocation157_spill] sm:$0xff] %v4863_v6  ;;  %v858_v2 = vmul.f32 %v4711_v56, %v838_v27  ;;  %v512_v50 = vmul.f32 %v500_v63, %v4715_v40  ;;  %v7991_v6 = vld [vmem:[#allocation30_spill] sm:$0xff] }
 0x329   :  { %1565 = vadd.xlane.f32.xlu0 %v1564_v5  ;;  %7967 = vst [vmem:[#allocation68_spill] sm:$0xff] %v4939_v59  ;;  %v846_v5 = vsel %vm834_vm5, %v7969_v16, %v7968_v55  ;;  %v1000_v55 = vsel %vm7774_vm8, %v7978_v11, %v7977_v32  ;;  %v1008_v16 = vsel %vm7774_vm8, %v7977_v32, %v7978_v11 }
 0x32a   :  { %v4871_v25 = vpop.permute.xlu2 %1312  ;;  %3622 = vset.pattern.permute.xlu1 %v7930_v7  ;;  %v4874_v42 = vpop.permute.xlu1 %1193  ;;  %v857_v26 = vmul.f32 %v4701_v35, %v846_v5  ;;  %v734_v11 = vsel %vm721_vm6, %v7981_v57, %v7982_v48  ;;  %v633_v32 = vmul.f32 %v4703_v1, %v621_v14  ;;  %v613_v5 = vsel %vm608_vm4, %v7970_v49, %v7971_v10 }
 0x32b   :  { %7954 = vst [vmem:[#allocation158_spill] sm:$0xff] %v4874_v42  ;;  %3621 = vset.pattern.permute.xlu2 %v7932_v52  ;;  %1376 = vperm.xlu1 %3622, %v4557_v61   ;;  %v4894_v52 = vmul.f32 %v4049_v22, %v4267_v37  ;;  %v4896_v61 = vpop.permute.xlu0 %1092  ;;  %v4912_v37 = vmul.f32 %v4047_v18, %v7957_v24  ;;  %v8009_v42 = vld [vmem:[#allocation108_spill] sm:$0xff] }
 0x32c   :  { %1259 = vperm.xlu2 %3621, %v4814_v8   ;;  %7955 = vst [vmem:[#allocation159_spill] sm:$0xff] %v4896_v61  ;;  %v513_v22 = vmul.f32 %v4711_v56, %v492_v12  ;;  %v1020_v18 = vmul.f32 %v4707_v9, %v1000_v55  ;;  %v1021_v48 = vmul.f32 %v4726_v31, %v1008_v16  ;;  %v7990_v16 = vld [vmem:[#allocation12_spill] sm:$0xff]  ;;  %v8012_v61 = vld [vmem:[#allocation107_spill] sm:$0xff] }
 0x32d   :  { %7958 = vst [vmem:[#allocation58_spill] sm:$0xff] %v4912_v37  ;;  %v860_v57 = vmul.f32 %v4711_v56, %v839_v34  ;;  %v746_v63 = vmul.f32 %v734_v11, %v4722_v51  ;;  %v747_v49 = vmul.f32 %v4726_v31, %v726_v29  ;;  %v5020_v12 = vmul.f32 %v7987_v15, %v744_v58  ;;  %v7994_v11 = vld [vmem:[#allocation4_spill] sm:$0xff] }
 0x32e   :  { %v5023_v55 = vmul.f32 %v7987_v15, %v745_v3  ;;  %v681_v34 = vmul.f32 %v7990_v16, %v633_v32  ;;  %v5028_v54 = vmul.f32 %v7991_v6, %v857_v26  ;;  %v568_v29 = vmul.f32 %v7994_v11, %v512_v50  ;;  %v7996_v3 = vld [vmem:[#allocation50_spill] sm:$0xff]  ;;  %v7998_v26 = vld [vmem:[#allocation21_spill] sm:$0xff] }
 0x32f   :  { %7988 = vst [vmem:[#allocation98_spill] sm:$0xff] %v5020_v12  ;;  %v569_v58 = vmul.f32 %v7994_v11, %v513_v22  ;;  %v1068_v15 = vmul.f32 %v7996_v3, %v1020_v18  ;;  %v1069_v32 = vmul.f32 %v7996_v3, %v1021_v48  ;;  %v8000_v50 = vld [vmem:[#allocation113_spill] sm:$0xff]  ;;  %v8004_v3 = vld [vmem:[#allocation104_spill] sm:$0xff] }
 0x330   :  { %7989 = vst [vmem:[#allocation100_spill] sm:$0xff] %v5023_v55  ;;  %v8002_v18 = vld [vmem:[#allocation53_spill] sm:$0xff]  ;;  %v1423_v22 = vadd.f32 %v681_v34, %v568_v29  ;;  %v493_v34 = vsel %vm7773_vm3, %v8008_v30, %v8007_v13  ;;  %v8036_v55 = vld [vmem:[#allocation134_spill] sm:$0xff] }
 0x331   :  { %7992 = vst [vmem:[#allocation91_spill] sm:$0xff] %v5028_v54  ;;  %v8037_v54 = vld [vmem:[#allocation126_spill] sm:$0xff] }
 0x332   :  { %v4951_v24 = vpop.permute.xlu2 %1037  ;;  %v4953_v19 = vpop.permute.xlu1 %1211  ;;  %v1115_v12 = vsel %vm1108_vm9, %v8037_v54, %v8036_v55 }
 0x333   :  { %7972 = vst [vmem:[#allocation85_spill] sm:$0xff] %v4951_v24  ;;  %1304 = vrot.lane.b32.xlu1 %v7979_v46, %s3752_s10  ;;  %v5017_v10 = vpop.permute.xlu0 %1191  ;;  %v794_v46 = vmul.f32 %v7998_v26, %v746_v63  ;;  %v8001_v24 = vld [vmem:[#allocation55_spill] sm:$0xff] }
 0x334   :  { %1302 = vrot.lane.b32.xlu2 %v7980_v39, %s3752_s10  ;;  %7986 = vst [vmem:[#allocation95_spill] sm:$0xff] %v5017_v10  ;;  %v5103_v39 = vadd.f32 %v1069_v32, %v4894_v52  ;;  %v8016_v32 = vld [vmem:[#allocation33_spill] sm:$0xff] }
 0x335   :  { %3623 = vset.pattern.permute.xlu2 %v7930_v7  ;;  %v7983_v7 = vld [vmem:[#allocation5_spill] sm:$0xff] }
 0x336   :  { %v5010_v14 = vmul.f32 %v7983_v7, %v510_v38  ;;  %v5013_v27 = vmul.f32 %v7983_v7, %v511_v45  ;;  %v682_v38 = vmul.f32 %v7990_v16, %v613_v5  ;;  %v5031_v45 = vmul.f32 %v7991_v6, %v858_v2  ;;  %v7995_v7 = vld [vmem:[#allocation31_spill] sm:$0xff]  ;;  %v7999_v6 = vld [vmem:[#allocation105_spill] sm:$0xff] }
 0x337   :  { %v907_v10 = vmul.f32 %v7995_v7, %v859_v60  ;;  %v908_v5 = vmul.f32 %v7995_v7, %v860_v57  ;;  %v795_v2 = vmul.f32 %v7998_v26, %v747_v49  ;;  %v622_v60 = vsel %vm608_vm4, %v8000_v50, %v7999_v6  ;;  %v8003_v57 = vld [vmem:[#allocation106_spill] sm:$0xff]  ;;  %v8005_v7 = vld [vmem:[#allocation116_spill] sm:$0xff]  ;;  %v8006_v49 = vld [vmem:[#allocation115_spill] sm:$0xff] }
 0x338   :  { %7984 = vst [vmem:[#allocation82_spill] sm:$0xff] %v5010_v14  ;;  %v1424_v48 = vadd.f32 %v682_v38, %v569_v58  ;;  %v1113_v63 = vsel %vm1108_vm9, %v8004_v3, %v8003_v57  ;;  %v848_v26 = vsel %vm834_vm5, %v8006_v49, %v8005_v7  ;;  %v501_v38 = vsel %vm7773_vm3, %v8007_v13, %v8008_v30 }
 0x339   :  { %7985 = vst [vmem:[#allocation88_spill] sm:$0xff] %v5013_v27  ;;  %v1439_v11 = vadd.f32 %v907_v10, %v794_v46  ;;  %v1440_v29 = vadd.f32 %v908_v5, %v795_v2  ;;  %v635_v58 = vmul.f32 %v4703_v1, %v622_v60  ;;  %v8010_v46 = vld [vmem:[#allocation112_spill] sm:$0xff]  ;;  %v1133_v30 = vmul.f32 %v4701_v35, %v1113_v63 }
 0x33a   :  { %7993 = vst [vmem:[#allocation97_spill] sm:$0xff] %v5031_v45  ;;  %v5035_v20 = vpop.permute.xlu1 %1310  ;;  %v727_v10 = vsel %vm721_vm6, %v8010_v46, %v8009_v42  ;;  %v614_v13 = vsel %vm608_vm4, %v7999_v6, %v8000_v50  ;;  %v861_v5 = vmul.f32 %v4701_v35, %v848_v26  ;;  %v514_v60 = vmul.f32 %v501_v38, %v4715_v40  ;;  %v8034_v45 = vld [vmem:[#allocation128_spill] sm:$0xff] }
 0x33b   :  { %v5041_v16 = vpop.permute.xlu2 %1154  ;;  %1320 = vrot.lane.b32.xlu1 %v8001_v24, %s3752_s10  ;;  %v1121_v24 = vsel %vm1108_vm9, %v8003_v57, %v8004_v3  ;;  %v735_v3 = vsel %vm721_vm6, %v8009_v42, %v8010_v46  ;;  %v8011_v57 = vld [vmem:[#allocation102_spill] sm:$0xff]  ;;  %v515_v42 = vmul.f32 %v4711_v56, %v493_v34  ;;  %v840_v46 = vsel %vm834_vm5, %v8005_v7, %v8006_v49  ;;  %v8014_v34 = vld [vmem:[#allocation17_spill] sm:$0xff] }
 0x33c   :  { %7997 = vst [vmem:[#allocation103_spill] sm:$0xff] %v5041_v16  ;;  %1318 = vrot.lane.b32.xlu2 %v8002_v18, %s3752_s10  ;;  %v1234_v18 = vsel %vm7772_vm7, %v8012_v61, %v8011_v57  ;;  %v1134_v2 = vmul.f32 %v1121_v24, %v4731_v62  ;;  %v5100_v63 = vadd.f32 %v1068_v15, %v4890_v23  ;;  %v5107_v24 = vpop.permute.xlu0 %1324 }
 0x33d   :  { %v748_v6 = vmul.f32 %v735_v3, %v4722_v51  ;;  %v749_v26 = vmul.f32 %v4726_v31, %v727_v10  ;;  %8013 = vst [vmem:[#allocation93_spill] sm:$0xff] %v5107_v24  ;;  %v683_v38 = vmul.f32 %v8014_v34, %v635_v58  ;;  %v684_v27 = vmul.f32 %v8014_v34, %v614_v13  ;;  %v8021_v13 = vld [vmem:[#allocation119_spill] sm:$0xff]  ;;  %v8032_v24 = vld [vmem:[#allocation129_spill] sm:$0xff] }
 0x33e   :  { %v5113_v59 = vadd.f32 %v1439_v11, %v1423_v22  ;;  %v5115_v7 = vadd.f32 %v1440_v29, %v1424_v48  ;;  %v5121_v23 = vsel %vm7772_vm7, %v8011_v57, %v8012_v61  ;;  %v5124_v52 = vmul.f32 %v4709_v17, %v1234_v18  ;;  %v8018_v11 = vld [vmem:[#allocation49_spill] sm:$0xff]  ;;  %v8019_v29 = vld [vmem:[#allocation7_spill] sm:$0xff] }
 0x33f   :  { %v862_v15 = vmul.f32 %v4711_v56, %v840_v46  ;;  %v909_v49 = vmul.f32 %v8016_v32, %v861_v5  ;;  %v5132_v22 = vmul.f32 %v8018_v11, %v1133_v30  ;;  %v5135_v48 = vmul.f32 %v8018_v11, %v1134_v2  ;;  %v8020_v18 = vld [vmem:[#allocation25_spill] sm:$0xff]  ;;  %v8022_v5 = vld [vmem:[#allocation111_spill] sm:$0xff]  ;;  %v8024_v46 = vld [vmem:[#allocation122_spill] sm:$0xff] }
 0x340   :  { %8015 = vst [vmem:[#allocation99_spill] sm:$0xff] %v5115_v7  ;;  %v570_v61 = vmul.f32 %v8019_v29, %v514_v60  ;;  %v571_v10 = vmul.f32 %v8019_v29, %v515_v42  ;;  %v796_v3 = vmul.f32 %v8020_v18, %v748_v6  ;;  %v5141_v57 = vmul.f32 %v8020_v18, %v749_v26  ;;  %v8023_v42 = vld [vmem:[#allocation117_spill] sm:$0xff]  ;;  %v8026_v18 = vld [vmem:[#allocation118_spill] sm:$0xff] }
 0x341   :  { %v1122_v30 = vsel %vm1108_vm9, %v8021_v13, %v8022_v5  ;;  %v502_v6 = vsel %vm7773_vm3, %v8024_v46, %v8023_v42  ;;  %v8025_v26 = vld [vmem:[#allocation121_spill] sm:$0xff]  ;;  %v5164_v34 = vmul.f32 %v8016_v32, %v862_v15  ;;  %v8030_v32 = vld [vmem:[#allocation131_spill] sm:$0xff] }
 0x342   :  { %v5109_v50 = vpop.permute.xlu1 %1326  ;;  %v5151_v2 = vadd.f32 %v683_v38, %v570_v61  ;;  %v5153_v60 = vadd.f32 %v684_v27, %v571_v10  ;;  %v1001_v29 = vsel %vm7774_vm8, %v8026_v18, %v8025_v26  ;;  %v5166_v11 = vadd.f32 %v909_v49, %v796_v3  ;;  %v8027_v38 = vld [vmem:[#allocation125_spill] sm:$0xff]  ;;  %v8028_v61 = vld [vmem:[#allocation130_spill] sm:$0xff] }
 0x343   :  { %v494_v27 = vsel %vm7773_vm3, %v8023_v42, %v8024_v46  ;;  %v736_v10 = vsel %vm721_vm6, %v8028_v61, %v8027_v38  ;;  %v1009_v15 = vsel %vm7774_vm8, %v8025_v26, %v8026_v18  ;;  %v728_v49 = vsel %vm721_vm6, %v8027_v38, %v8028_v61  ;;  %v8029_v46 = vld [vmem:[#allocation133_spill] sm:$0xff]  ;;  %v8035_v38 = vld [vmem:[#allocation123_spill] sm:$0xff] }
 0x344   :  { %1372 = vperm.xlu2 %3623, %v4814_v8   ;;  %v5129_v58 = vpop.permute.xlu2 %1267  ;;  %v1114_v8 = vsel %vm1108_vm9, %v8022_v5, %v8021_v13  ;;  %v1136_v5 = vmul.f32 %v1122_v30, %v4731_v62  ;;  %v516_v3 = vmul.f32 %v502_v6, %v4715_v40  ;;  %v1022_v42 = vmul.f32 %v4707_v9, %v1001_v29  ;;  %v8031_v30 = vld [vmem:[#allocation135_spill] sm:$0xff] }
 0x345   :  { %8017 = vst [vmem:[#allocation96_spill] sm:$0xff] %v5129_v58  ;;  %v1135_v13 = vmul.f32 %v4701_v35, %v1114_v8  ;;  %v1002_v8 = vsel %vm7774_vm8, %v8030_v32, %v8029_v46  ;;  %v1236_v14 = vsel %vm7772_vm7, %v8032_v24, %v8031_v30  ;;  %v517_v26 = vmul.f32 %v4711_v56, %v494_v27 }
 0x346   :  { %v841_v6 = vsel %vm834_vm5, %v8035_v38, %v8034_v45  ;;  %v849_v29 = vsel %vm834_vm5, %v8034_v45, %v8035_v38  ;;  %v750_v61 = vmul.f32 %v736_v10, %v4722_v51  ;;  %v751_v40 = vmul.f32 %v4726_v31, %v728_v49  ;;  %v5221_v45 = vpop.permute.xlu0 %1142  ;;  %v8040_v38 = vld [vmem:[#allocation127_spill] sm:$0xff]  ;;  %v8041_v51 = vld [vmem:[#allocation120_spill] sm:$0xff] }
 0x347   :  { %v1123_v27 = vsel %vm1108_vm9, %v8036_v55, %v8037_v54  ;;  %v1010_v53 = vsel %vm7774_vm8, %v8029_v46, %v8030_v32  ;;  %8038 = vst [vmem:[#allocation92_spill] sm:$0xff] %v5221_v45  ;;  %v1023_v49 = vmul.f32 %v4726_v31, %v1009_v15  ;;  %v623_v44 = vsel %vm608_vm4, %v8041_v51, %v8040_v38  ;;  %v8042_v55 = vld [vmem:[#allocation11_spill] sm:$0xff]  ;;  %v8043_v46 = vld [vmem:[#allocation124_spill] sm:$0xff]  ;;  %v8044_v45 = vld [vmem:[#allocation114_spill] sm:$0xff] }
 0x348   :  { %v1024_v37 = vmul.f32 %v4707_v9, %v1002_v8  ;;  %v1251_v54 = vmul.f32 %v4709_v17, %v1236_v14  ;;  %v572_v4 = vmul.f32 %v8042_v55, %v516_v3  ;;  %v863_v16 = vmul.f32 %v4701_v35, %v849_v29 }
 0x349   :  { %v864_v32 = vmul.f32 %v4711_v56, %v841_v6  ;;  %v1228_v15 = vsel %vm7772_vm7, %v8031_v30, %v8032_v24  ;;  %v1137_v8 = vmul.f32 %v4701_v35, %v1115_v12  ;;  %v1138_v14 = vmul.f32 %v1123_v27, %v4731_v62  ;;  %v8045_v56 = vld [vmem:[#allocation24_spill] sm:$0xff]  ;;  %v8046_v30 = vld [vmem:[#allocation38_spill] sm:$0xff]  ;;  %v8047_v12 = vld [vmem:[#allocation47_spill] sm:$0xff] }
 0x34a   :  { %v5196_v18 = vpop.permute.xlu1 %1041  ;;  %v1025_v3 = vmul.f32 %v4726_v31, %v1010_v53  ;;  %v573_v29 = vmul.f32 %v8042_v55, %v517_v26  ;;  %v637_v6 = vmul.f32 %v4703_v1, %v623_v44  ;;  %v798_v58 = vmul.f32 %v8045_v56, %v750_v61  ;;  %v8048_v26 = vld [vmem:[#allocation29_spill] sm:$0xff] }
 0x34b   :  { %8033 = vst [vmem:[#allocation101_spill] sm:$0xff] %v5196_v18  ;;  %v799_v18 = vmul.f32 %v8045_v56, %v751_v40  ;;  %v615_v24 = vsel %vm608_vm4, %v8040_v38, %v8041_v51  ;;  %v1072_v7 = vmul.f32 %v8046_v30, %v1024_v37  ;;  %v1298_v35 = vmul.f32 %v8047_v12, %v1228_v15  ;;  %v8049_v55 = vld [vmem:[#allocation45_spill] sm:$0xff] }
 0x34c   :  { %v5223_v10 = vpop.permute.xlu2 %1076  ;;  %v1299_v27 = vmul.f32 %v8047_v12, %v1251_v54  ;;  %v1227_v44 = vsel %vm7772_vm7, %v8043_v46, %v8044_v45  ;;  %v911_v40 = vmul.f32 %v8048_v26, %v863_v16  ;;  %v912_v61 = vmul.f32 %v8048_v26, %v864_v32  ;;  %v8050_v38 = vld [vmem:[#allocation149_spill] sm:$0xff]  ;;  %v8052_v12 = vld [vmem:[#allocation16_spill] sm:$0xff] }
 0x34d   :  { %8039 = vst [vmem:[#allocation105_spill] sm:$0xff] %v5223_v10  ;;  %v1235_v10 = vsel %vm7772_vm7, %v8044_v45, %v8043_v46  ;;  %v1185_v56 = vmul.f32 %v8049_v55, %v1137_v8  ;;  %v1186_v51 = vmul.f32 %v8049_v55, %v1138_v14  ;;  %v1073_v37 = vmul.f32 %v8046_v30, %v1025_v3  ;;  %v8053_v3 = vld [vmem:[#allocation137_spill] sm:$0xff]  ;;  %v8054_v55 = vld [vmem:[#allocation138_spill] sm:$0xff] }
 0x34e   :  { %v1249_v53 = vmul.f32 %v4709_v17, %v1235_v10  ;;  %v1294_v54 = vmul.f32 %v8050_v38, %v5121_v23  ;;  %v685_v1 = vmul.f32 %v8052_v12, %v637_v6  ;;  %v686_v45 = vmul.f32 %v8052_v12, %v615_v24  ;;  %v5282_v24 = vpop.permute.xlu0 %1392 }
 0x34f   :  { %v1443_v10 = vadd.f32 %v911_v40, %v798_v58  ;;  %v1444_v46 = vadd.f32 %v912_v61, %v799_v18  ;;  %v1459_v32 = vadd.f32 %v1072_v7, %v4924_v28  ;;  %v1475_v8 = vadd.f32 %v1298_v35, %v1185_v56  ;;  %8055 = vst [vmem:[#allocation106_spill] sm:$0xff] %v5282_v24  ;;  %v8056_v18 = vld [vmem:[#allocation132_spill] sm:$0xff] }
 0x350   :  { %v1476_v26 = vadd.f32 %v1299_v27, %v1186_v51  ;;  %v1295_v14 = vmul.f32 %v8050_v38, %v5124_v52  ;;  %v1183_v30 = vmul.f32 %v8053_v3, %v1135_v13  ;;  %v1184_v23 = vmul.f32 %v8053_v3, %v1136_v5  ;;  %v8057_v40 = vld [vmem:[#allocation136_spill] sm:$0xff] }
 0x351   :  { %v1297_v6 = vmul.f32 %v8054_v55, %v1249_v53  ;;  %v1460_v58 = vadd.f32 %v1073_v37, %v4928_v41  ;;  %v1341_v35 = vsel %vm7771_vm10, %v8057_v40, %v8056_v18  ;;  %v1349_v56 = vsel %vm7771_vm10, %v8056_v18, %v8057_v40  ;;  %v8058_v52 = vld [vmem:[#allocation48_spill] sm:$0xff] }
 0x352   :  { %v1471_v28 = vadd.f32 %v1294_v54, %v5132_v22  ;;  %v1442_v7 = vadd.f32 %v5164_v34, %v5141_v57  ;;  %v1070_v13 = vmul.f32 %v8058_v52, %v1022_v42  ;;  %v1071_v5 = vmul.f32 %v8058_v52, %v1023_v49 }
 0x353   :  { %v5269_v15 = vpop.permute.xlu1 %1263  ;;  %v1428_v41 = vadd.f32 %v686_v45, %v573_v29  ;;  %v1427_v27 = vadd.f32 %v685_v1, %v572_v4  ;;  %v1472_v53 = vadd.f32 %v1295_v14, %v5135_v48  ;;  %v1508_v61 = vadd.f32 %v1476_v26, %v1460_v58 }
 0x354   :  { %8051 = vst [vmem:[#allocation113_spill] sm:$0xff] %v5269_v15  ;;  %v5273_v16 = vpop.permute.xlu2 %1094  ;;  %v1296_v15 = vmul.f32 %v8054_v55, %v1227_v44  ;;  %v1507_v44 = vadd.f32 %v1475_v8, %v1459_v32  ;;  %v1363_v51 = vmul.f32 %v4707_v9, %v1341_v35  ;;  %v1364_v37 = vmul.f32 %v1349_v56, %v4837_v0  ;;  %v8066_v56 = vld [vmem:[#allocation99_spill] sm:$0xff] }
 0x355   :  { %v1474_v40 = vadd.f32 %v1297_v6, %v1184_v23  ;;  %v1491_v54 = vadd.f32 %v1443_v10, %v1427_v27  ;;  %v1492_v34 = vadd.f32 %v1444_v46, %v1428_v41  ;;  %v1489_v57 = vadd.f32 %v5166_v11, %v5151_v2  ;;  %v8059_v2 = vld [vmem:[#allocation94_spill] sm:$0xff]  ;;  %v8065_v6 = vld [vmem:[#allocation144_spill] sm:$0xff] }
 0x356   :  { %v1473_v18 = vadd.f32 %v1296_v15, %v1183_v30  ;;  %v1503_v42 = vadd.f32 %v1471_v28, %v5100_v63  ;;  %v1457_v1 = vadd.f32 %v1070_v13, %v4916_v43  ;;  %v1458_v4 = vadd.f32 %v1071_v5, %v4920_v36  ;;  %v5343_v14 = vpop.permute.xlu0 %1384  ;;  %v8067_v5 = vld [vmem:[#allocation142_spill] sm:$0xff] }
 0x357   :  { %v1411_v49 = vmul.f32 %v5282_v24, %v1363_v51  ;;  %v1412_v29 = vmul.f32 %v5282_v24, %v1364_v37  ;;  %v1523_v30 = vadd.f32 %v1507_v44, %v1491_v54  ;;  %v1524_v26 = vadd.f32 %v1508_v61, %v1492_v34  ;;  %8062 = vst [vmem:[#allocation104_spill] sm:$0xff] %v5343_v14  ;;  %v8110_v24 = vld [vmem:[#allocation76_spill] sm:$0xff] }
 0x358   :  { %v1490_v15 = vadd.f32 %v1442_v7, %v5153_v60  ;;  %v1504_v45 = vadd.f32 %v1472_v53, %v5103_v39  ;;  %v1339_v63 = vsel %vm7771_vm10, %v5035_v20, %v5109_v50  ;;  %v1347_v43 = vsel %vm7771_vm10, %v5109_v50, %v5035_v20  ;;  %v8060_v60 = vld [vmem:[#allocation148_spill] sm:$0xff]  ;;  %v8061_v20 = vld [vmem:[#allocation150_spill] sm:$0xff] }
 0x359   :  { %v1505_v36 = vadd.f32 %v1473_v18, %v1457_v1  ;;  %v1506_v11 = vadd.f32 %v1474_v40, %v1458_v4  ;;  %v999_v10 = vsel %vm7774_vm8, %v8059_v2, %v4826_v33  ;;  %v1007_v39 = vsel %vm7774_vm8, %v4826_v33, %v8059_v2  ;;  %v8068_v18 = vld [vmem:[#allocation101_spill] sm:$0xff] }
 0x35a   :  { %v1112_v46 = vsel %vm1108_vm9, %v4854_v21, %v8060_v60  ;;  %v1519_v32 = vadd.f32 %v1503_v42, %v5113_v59  ;;  %v1340_v50 = vsel %vm7771_vm10, %v4871_v25, %v8061_v20  ;;  %v1348_v8 = vsel %vm7771_vm10, %v8061_v20, %v4871_v25  ;;  %v8073_v20 = vld [vmem:[#allocation58_spill] sm:$0xff] }
 0x35b   :  { %v5301_v22 = vpop.permute.xlu1 %979  ;;  %v5345_v33 = vadd.f32 %v1523_v30, %v1411_v49  ;;  %v5347_v23 = vadd.f32 %v1524_v26, %v1412_v29  ;;  %v1233_v59 = vsel %vm7772_vm7, %v4953_v19, %v8065_v6  ;;  %v1359_v58 = vmul.f32 %v4707_v9, %v1339_v63  ;;  %v8070_v29 = vld [vmem:[#allocation96_spill] sm:$0xff] }
 0x35c   :  { %v5308_v48 = vpop.permute.xlu2 %1205  ;;  %v1360_v35 = vmul.f32 %v1347_v43, %v4837_v0  ;;  %v1520_v28 = vadd.f32 %v1504_v45, %v8066_v56  ;;  %v1018_v7 = vmul.f32 %v4707_v9, %v999_v10  ;;  %v1019_v25 = vmul.f32 %v4726_v31, %v1007_v39  ;;  %v8071_v43 = vld [vmem:[#allocation103_spill] sm:$0xff]  ;;  %v8081_v56 = vld [vmem:[#allocation97_spill] sm:$0xff] }
 0x35d   :  { %8063 = vst [vmem:[#allocation116_spill] sm:$0xff] %v5345_v33  ;;  %v1120_v13 = vsel %vm1108_vm9, %v8060_v60, %v4854_v21  ;;  %v1131_v41 = vmul.f32 %v8067_v5, %v1112_v46  ;;  %v1361_v27 = vmul.f32 %v4707_v9, %v1340_v50  ;;  %v1362_v44 = vmul.f32 %v1348_v8, %v4837_v0 }
 0x35e   :  { %8064 = vst [vmem:[#allocation115_spill] sm:$0xff] %v5347_v23  ;;  %v1407_v61 = vmul.f32 %v5343_v14, %v1359_v58  ;;  %v1408_v51 = vmul.f32 %v5343_v14, %v1360_v35  ;;  %v1245_v37 = vmul.f32 %v4709_v17, %v1233_v59  ;;  %v1066_v40 = vmul.f32 %v8068_v18, %v1018_v7  ;;  %v8076_v59 = vld [vmem:[#allocation69_spill] sm:$0xff]  ;;  %v8080_v35 = vld [vmem:[#allocation100_spill] sm:$0xff] }
 0x35f   :  { %v1067_v54 = vmul.f32 %v8068_v18, %v1019_v25  ;;  %v1561_v21 = vadd.f32 %v5347_v23, %v5345_v33  ;;  %v1132_v42 = vmul.f32 %v1120_v13, %v4731_v62  ;;  %v1225_v1 = vsel %vm7772_vm7, %v8065_v6, %v4953_v19  ;;  %v8072_v19 = vld [vmem:[#allocation160_spill] sm:$0xff]  ;;  %v8077_v58 = vld [vmem:[#allocation13_spill] sm:$0xff]  ;;  %v8082_v25 = vld [vmem:[#allocation82_spill] sm:$0xff] }
 0x360   :  { %v1292_v30 = vmul.f32 %v8070_v29, %v1225_v1  ;;  %v1293_v26 = vmul.f32 %v8070_v29, %v1245_v37  ;;  %v1521_v45 = vadd.f32 %v1505_v36, %v1489_v57  ;;  %v1522_v63 = vadd.f32 %v1506_v11, %v1490_v15  ;;  %v8078_v15 = vld [vmem:[#allocation98_spill] sm:$0xff]  ;;  %v8079_v36 = vld [vmem:[#allocation91_spill] sm:$0xff]  ;;  %v8083_v13 = vld [vmem:[#allocation68_spill] sm:$0xff] }
 0x361   :  { %v1179_v2 = vmul.f32 %v8071_v43, %v1131_v41  ;;  %v1180_v10 = vmul.f32 %v8071_v43, %v1132_v42  ;;  %v5387_v39 = vadd.f32 %v1519_v32, %v1407_v61  ;;  %v5389_v60 = vadd.f32 %v1520_v28, %v1408_v51  ;;  %v8084_v61 = vld [vmem:[#allocation88_spill] sm:$0xff]  ;;  %v8085_v42 = vld [vmem:[#allocation93_spill] sm:$0xff]  ;;  %v8113_v29 = vld [vmem:[#allocation90_spill] sm:$0xff] }
 0x362   :  { %v1453_v46 = vadd.f32 %v1066_v40, %v8072_v19  ;;  %v1454_v50 = vadd.f32 %v1067_v54, %v8073_v20  ;;  %v680_v57 = vmul.f32 %v8077_v58, %v8076_v59  ;;  %v1437_v11 = vadd.f32 %v8079_v36, %v8078_v15  ;;  %v8089_v36 = vld [vmem:[#allocation67_spill] sm:$0xff]  ;;  %v8114_v43 = vld [vmem:[#allocation89_spill] sm:$0xff] }
 0x363   :  { %v5365_v53 = vpop.permute.xlu1 %1078  ;;  %v1438_v32 = vadd.f32 %v8081_v56, %v8080_v35  ;;  %v1469_v7 = vadd.f32 %v1292_v30, %v1179_v2  ;;  %v1470_v28 = vadd.f32 %v1293_v26, %v1180_v10  ;;  %v1421_v41 = vadd.f32 %v8083_v13, %v8082_v25  ;;  %v8091_v56 = vld [vmem:[#allocation72_spill] sm:$0xff] }
 0x364   :  { %v5372_v34 = vpop.permute.xlu2 %1388  ;;  %v1422_v51 = vadd.f32 %v680_v57, %v8084_v61 }
 0x365   :  { %8069 = vst [vmem:[#allocation109_spill] sm:$0xff] %v5372_v34  ;;  %v1409_v4 = vmul.f32 %v5372_v34, %v1361_v27  ;;  %v1410_v49 = vmul.f32 %v5372_v34, %v1362_v44  ;;  %1562 = vadd.xlane.f32.xlu1 %v1561_v21  ;;  %v1555_v44 = vadd.f32 %v5389_v60, %v5387_v39 }
 0x366   :  { %v1501_v54 = vadd.f32 %v1469_v7, %v1453_v46  ;;  %v1502_v21 = vadd.f32 %v1470_v28, %v1454_v50 }
 0x367   :  { %v5393_v8 = vadd.f32 %v1521_v45, %v1409_v4  ;;  %v5395_v6 = vadd.f32 %v1522_v63, %v1410_v49  ;;  %v5418_v49 = vpop.permute.xlu0 %1380  ;;  %v1485_v45 = vadd.f32 %v1437_v11, %v1421_v41  ;;  %v1486_v63 = vadd.f32 %v1438_v32, %v1422_v51  ;;  %v8090_v11 = vld [vmem:[#allocation71_spill] sm:$0xff]  ;;  %v8092_v32 = vld [vmem:[#allocation60_spill] sm:$0xff]  ;;  %v8095_v51 = vld [vmem:[#allocation66_spill] sm:$0xff] }
 0x368   :  { %8086 = vst [vmem:[#allocation112_spill] sm:$0xff] %v5418_v49  ;;  %v730_v35 = vsel %vm721_vm6, %v8090_v11, %v8089_v36  ;;  %v835_v7 = vsel %vm834_vm5, %v8092_v32, %v8091_v56  ;;  %v843_v28 = vsel %vm834_vm5, %v8091_v56, %v8092_v32  ;;  %v722_v25 = vsel %vm721_vm6, %v8089_v36, %v8090_v11  ;;  %v8093_v41 = vld [vmem:[#allocation64_spill] sm:$0xff]  ;;  %v8102_v36 = vld [vmem:[#allocation19_spill] sm:$0xff] }
 0x369   :  { %8074 = vst [vmem:[#allocation110_spill] sm:$0xff] %v5393_v8  ;;  %v1558_v40 = vadd.f32 %v5395_v6, %v5393_v8  ;;  %v1517_v19 = vadd.f32 %v1501_v54, %v1485_v45  ;;  %v1518_v46 = vadd.f32 %v1502_v21, %v1486_v63  ;;  %v8097_v54 = vld [vmem:[#allocation147_spill] sm:$0xff]  ;;  %v739_v45 = vmul.f32 %v4726_v31, %v722_v25  ;;  %v8136_v8 = vld [vmem:[#allocation152_spill] sm:$0xff] }
 0x36a   :  { %8075 = vst [vmem:[#allocation108_spill] sm:$0xff] %v5395_v6  ;;  %v738_v21 = vmul.f32 %v730_v35, %v8097_v54  ;;  %v8103_v35 = vld [vmem:[#allocation27_spill] sm:$0xff] }
 0x36b   :  { %v5405_v27 = vpop.permute.xlu1 %1189  ;;  %v8105_v25 = vld [vmem:[#allocation87_spill] sm:$0xff] }
 0x36c   :  { %v1309_v37 = vpop.permute.xlu2 %1308  ;;  %v786_v11 = vmul.f32 %v8102_v36, %v738_v21 }
 0x36d   :  { %v1338_v1 = vsel %vm7771_vm10, %v1309_v37, %v8085_v42  ;;  %v1346_v4 = vsel %vm7771_vm10, %v8085_v42, %v1309_v37  ;;  %1556 = vadd.xlane.f32.xlu2 %v1555_v44  ;;  %1559 = vadd.xlane.f32.xlu1 %v1558_v40  ;;  %v8094_v44 = vld [vmem:[#allocation63_spill] sm:$0xff] }
 0x36e   :  { %v1357_v30 = vmul.f32 %v4707_v9, %v1338_v1  ;;  %v1358_v26 = vmul.f32 %v1346_v4, %v4837_v0  ;;  %v488_v61 = vsel %vm7773_vm3, %v8094_v44, %v8093_v41  ;;  %v8096_v37 = vld [vmem:[#allocation59_spill] sm:$0xff]  ;;  %v496_v1 = vsel %vm7773_vm3, %v8093_v41, %v8094_v44  ;;  %v8106_v44 = vld [vmem:[#allocation14_spill] sm:$0xff] }
 0x36f   :  { %v617_v40 = vsel %vm608_vm4, %v8096_v37, %v8095_v51  ;;  %v851_v4 = vmul.f32 %v8067_v5, %v843_v28  ;;  %v609_v63 = vsel %vm608_vm4, %v8095_v51, %v8096_v37  ;;  %v8104_v28 = vld [vmem:[#allocation73_spill] sm:$0xff] }
 0x370   :  { %v1405_v2 = vmul.f32 %v5418_v49, %v1357_v30  ;;  %v1406_v10 = vmul.f32 %v5418_v49, %v1358_v26  ;;  %v8099_v30 = vld [vmem:[#allocation145_spill] sm:$0xff]  ;;  %v619_v41 = vsel %vm608_vm4, %v8105_v25, %v8104_v28  ;;  %v674_v51 = vmul.f32 %v8106_v44, %v609_v63  ;;  %v8111_v63 = vld [vmem:[#allocation86_spill] sm:$0xff] }
 0x371   :  { %v852_v26 = vmul.f32 %v8099_v30, %v835_v7  ;;  %v899_v56 = vmul.f32 %v8103_v35, %v851_v4  ;;  %v787_v7 = vmul.f32 %v8102_v36, %v739_v45  ;;  %v724_v12 = vsel %vm721_vm6, %v8111_v63, %v8110_v24 }
 0x372   :  { %v5424_v20 = vadd.f32 %v1517_v19, %v1405_v2  ;;  %v5426_v50 = vadd.f32 %v1518_v46, %v1406_v10  ;;  %v8100_v2 = vld [vmem:[#allocation143_spill] sm:$0xff]  ;;  %v8101_v19 = vld [vmem:[#allocation146_spill] sm:$0xff]  ;;  %v743_v38 = vmul.f32 %v4726_v31, %v724_v12  ;;  %v8120_v12 = vld [vmem:[#allocation37_spill] sm:$0xff] }
 0x373   :  { %v5428_v59 = vpop.permute.xlu1 %1207  ;;  %v625_v10 = vmul.f32 %v8100_v2, %v617_v40  ;;  %v504_v46 = vmul.f32 %v496_v1, %v8101_v19  ;;  %v900_v32 = vmul.f32 %v8103_v35, %v852_v26  ;;  %v8108_v1 = vld [vmem:[#allocation84_spill] sm:$0xff]  ;;  %v8109_v26 = vld [vmem:[#allocation3_spill] sm:$0xff]  ;;  %v629_v49 = vmul.f32 %v8100_v2, %v619_v41 }
 0x374   :  { %8087 = vst [vmem:[#allocation102_spill] sm:$0xff] %v5426_v50  ;;  %v5430_v57 = vpop.permute.xlu2 %1029  ;;  %v1552_v15 = vadd.f32 %v5426_v50, %v5424_v20  ;;  %v1431_v55 = vadd.f32 %v899_v56, %v786_v11  ;;  %v8115_v11 = vld [vmem:[#allocation9_spill] sm:$0xff] }
 0x375   :  { %8088 = vst [vmem:[#allocation107_spill] sm:$0xff] %v5430_v57  ;;  %v673_v40 = vmul.f32 %v8106_v44, %v625_v10  ;;  %v732_v10 = vsel %vm721_vm6, %v8110_v24, %v8111_v63  ;;  %v560_v34 = vmul.f32 %v8109_v26, %v504_v46  ;;  %v1432_v3 = vadd.f32 %v900_v32, %v787_v7  ;;  %v8116_v32 = vld [vmem:[#allocation52_spill] sm:$0xff] }
 0x376   :  { %1553 = vadd.xlane.f32.xlu2 %v1552_v15  ;;  %v505_v15 = vmul.f32 %v8099_v30, %v488_v61  ;;  %v8107_v61 = vld [vmem:[#allocation83_spill] sm:$0xff]  ;;  %v742_v14 = vmul.f32 %v732_v10, %v8097_v54  ;;  %v845_v24 = vsel %vm834_vm5, %v8114_v43, %v8113_v29  ;;  %v611_v46 = vsel %vm608_vm4, %v8104_v28, %v8105_v25  ;;  %v8117_v7 = vld [vmem:[#allocation36_spill] sm:$0xff]  ;;  %v8122_v28 = vld [vmem:[#allocation2_spill] sm:$0xff] }
 0x377   :  { %v490_v21 = vsel %vm7773_vm3, %v8108_v1, %v8107_v61  ;;  %v498_v4 = vsel %vm7773_vm3, %v8107_v61, %v8108_v1  ;;  %v1415_v1 = vadd.f32 %v673_v40, %v560_v34  ;;  %v677_v56 = vmul.f32 %v8115_v11, %v629_v49  ;;  %v8118_v34 = vld [vmem:[#allocation53_spill] sm:$0xff] }
 0x378   :  { %v561_v45 = vmul.f32 %v8109_v26, %v505_v15  ;;  %v508_v15 = vmul.f32 %v498_v4, %v8101_v19  ;;  %v509_v41 = vmul.f32 %v8099_v30, %v490_v21  ;;  %v948_v40 = vmul.f32 %v8117_v7, %v8118_v34  ;;  %v8119_v21 = vld [vmem:[#allocation56_spill] sm:$0xff] }
 0x379   :  { %v5529_v4 = vmul.f32 %v8120_v12, %v8119_v21  ;;  %v5535_v10 = vadd.f32 %v1431_v55, %v1415_v1  ;;  %v855_v34 = vmul.f32 %v8067_v5, %v845_v24  ;;  %v8124_v55 = vld [vmem:[#allocation20_spill] sm:$0xff]  ;;  %v8126_v1 = vld [vmem:[#allocation79_spill] sm:$0xff]  ;;  %v8129_v24 = vld [vmem:[#allocation74_spill] sm:$0xff] }
 0x37a   :  { %v1416_v61 = vadd.f32 %v674_v51, %v561_v45  ;;  %v947_v51 = vmul.f32 %v8117_v7, %v8116_v32  ;;  %v8121_v45 = vld [vmem:[#allocation57_spill] sm:$0xff]  ;;  %v564_v49 = vmul.f32 %v8122_v28, %v508_v15  ;;  %v5541_v25 = vmul.f32 %v8122_v28, %v509_v41  ;;  %v8125_v15 = vld [vmem:[#allocation139_spill] sm:$0xff]  ;;  %v8132_v7 = vld [vmem:[#allocation28_spill] sm:$0xff] }
 0x37b   :  { %v5450_v13 = vpop.permute.xlu1 %1306  ;;  %v5533_v63 = vmul.f32 %v8120_v12, %v8121_v45  ;;  %v837_v32 = vsel %vm834_vm5, %v8113_v29, %v8114_v43  ;;  %v5551_v45 = vmul.f32 %v8115_v11, %v611_v46  ;;  %v998_v41 = vsel %vm7774_vm8, %v8126_v1, %v8125_v15  ;;  %v8127_v12 = vld [vmem:[#allocation140_spill] sm:$0xff]  ;;  %v8128_v29 = vld [vmem:[#allocation141_spill] sm:$0xff] }
 0x37c   :  { %v5537_v18 = vadd.f32 %v1432_v3, %v1416_v61  ;;  %v790_v3 = vmul.f32 %v8124_v55, %v742_v14  ;;  %v791_v61 = vmul.f32 %v8124_v55, %v743_v38  ;;  %v5559_v58 = vadd.f32 %v677_v56, %v564_v49  ;;  %v8130_v49 = vld [vmem:[#allocation159_spill] sm:$0xff]  ;;  %v8131_v55 = vld [vmem:[#allocation105_spill] sm:$0xff] }
 0x37d   :  { %v5461_v42 = vpop.permute.xlu2 %1146  ;;  %v1111_v43 = vsel %vm1108_vm9, %v8128_v29, %v8127_v12  ;;  %v996_v46 = vsel %vm7774_vm8, %v8129_v24, %v5301_v22  ;;  %v1004_v38 = vsel %vm7774_vm8, %v5301_v22, %v8129_v24  ;;  %v856_v14 = vmul.f32 %v8099_v30, %v837_v32  ;;  %v8134_v24 = vld [vmem:[#allocation151_spill] sm:$0xff] }
 0x37e   :  { %8098 = vst [vmem:[#allocation119_spill] sm:$0xff] %v5461_v42  ;;  %v1119_v56 = vsel %vm1108_vm9, %v8127_v12, %v8128_v29  ;;  %v1109_v11 = vsel %vm1108_vm9, %v8131_v55, %v8130_v49  ;;  %v1117_v28 = vsel %vm1108_vm9, %v8130_v49, %v8131_v55  ;;  %v903_v22 = vmul.f32 %v8132_v7, %v855_v34  ;;  %v8133_v29 = vld [vmem:[#allocation158_spill] sm:$0xff]  ;;  %v8135_v49 = vld [vmem:[#allocation113_spill] sm:$0xff] }
 0x37f   :  { %v1006_v32 = vsel %vm7774_vm8, %v8125_v15, %v8126_v1  ;;  %v1016_v12 = vmul.f32 %v4707_v9, %v998_v41  ;;  %v1232_v44 = vsel %vm7772_vm7, %v8134_v24, %v8133_v29  ;;  %v1129_v35 = vmul.f32 %v8067_v5, %v1111_v43 }
 0x380   :  { %v1012_v36 = vmul.f32 %v4707_v9, %v996_v46  ;;  %v1013_v55 = vmul.f32 %v4726_v31, %v1004_v38  ;;  %v1230_v34 = vsel %vm7772_vm7, %v5308_v48, %v5405_v27  ;;  %v1130_v15 = vmul.f32 %v1119_v56, %v4731_v62 }
 0x381   :  { %v1224_v1 = vsel %vm7772_vm7, %v8133_v29, %v8134_v24  ;;  %v1125_v41 = vmul.f32 %v8067_v5, %v1109_v11  ;;  %v1126_v43 = vmul.f32 %v1117_v28, %v4731_v62  ;;  %v1243_v46 = vmul.f32 %v4709_v17, %v1232_v44  ;;  %v8137_v24 = vld [vmem:[#allocation85_spill] sm:$0xff] }
 0x382   :  { %v1290_v38 = vmul.f32 %v8135_v49, %v1224_v1  ;;  %v1060_v23 = vmul.f32 %v5430_v57, %v1012_v36  ;;  %v1061_v33 = vmul.f32 %v5430_v57, %v1013_v55  ;;  %v904_v6 = vmul.f32 %v8132_v7, %v856_v14  ;;  %v8139_v14 = vld [vmem:[#allocation92_spill] sm:$0xff] }
 0x383   :  { %v5486_v37 = vpop.permute.xlu1 %1322  ;;  %v1017_v56 = vmul.f32 %v4726_v31, %v1006_v32  ;;  %v1177_v50 = vmul.f32 %v8136_v8, %v1129_v35  ;;  %v1239_v29 = vmul.f32 %v4709_v17, %v1230_v34  ;;  %v1178_v11 = vmul.f32 %v8136_v8, %v1130_v15 }
 0x384   :  { %v1064_v28 = vmul.f32 %v8137_v24, %v1016_v12  ;;  %v1291_v44 = vmul.f32 %v8135_v49, %v1243_v46  ;;  %v1222_v36 = vsel %vm7772_vm7, %v5405_v27, %v5308_v48  ;;  %v1173_v1 = vmul.f32 %v8139_v14, %v1125_v41 }
 0x385   :  { %v1174_v32 = vmul.f32 %v8139_v14, %v1126_v43  ;;  %v1065_v15 = vmul.f32 %v8137_v24, %v1017_v56  ;;  %v1467_v12 = vadd.f32 %v1290_v38, %v1177_v50  ;;  %v1447_v8 = vadd.f32 %v1060_v23, %v947_v51  ;;  %v5639_v23 = vpop.permute.xlu0 %1368 }
 0x386   :  { %v5508_v52 = vpop.permute.xlu2 %1259  ;;  %v1448_v46 = vadd.f32 %v1061_v33, %v948_v40  ;;  %v1435_v41 = vadd.f32 %v903_v22, %v790_v3  ;;  %v1468_v43 = vadd.f32 %v1291_v44, %v1178_v11  ;;  %v1451_v50 = vadd.f32 %v1064_v28, %v5529_v4  ;;  %8140 = vst [vmem:[#allocation121_spill] sm:$0xff] %v5639_v23  ;;  %v8143_v28 = vld [vmem:[#allocation55_spill] sm:$0xff] }
 0x387   :  { %8112 = vst [vmem:[#allocation111_spill] sm:$0xff] %v5508_v52  ;;  %v1452_v40 = vadd.f32 %v1065_v15, %v5533_v63  ;;  %v8147_v15 = vld [vmem:[#allocation70_spill] sm:$0xff] }
 0x388   :  { %v1483_v56 = vadd.f32 %v1435_v41, %v5559_v58  ;;  %v8149_v41 = vld [vmem:[#allocation75_spill] sm:$0xff] }
 0x389   :  { %v1500_v63 = vadd.f32 %v1468_v43, %v1452_v40  ;;  %v8150_v43 = vld [vmem:[#allocation77_spill] sm:$0xff] }
 0x38b   :  { %v5548_v21 = vpop.permute.xlu1 %1033 }
 0x38c   :  { %8123 = vst [vmem:[#allocation117_spill] sm:$0xff] %v5548_v21 }
 0x38e   :  { %v1303_v26 = vpop.permute.xlu2 %1302 }
 0x394   :  { %v5625_v55 = vpop.permute.xlu1 %1255 }
 0x395   :  { %8138 = vst [vmem:[#allocation122_spill] sm:$0xff] %v5625_v55  ;;  %v1286_v35 = vmul.f32 %v5625_v55, %v1222_v36  ;;  %v1287_v34 = vmul.f32 %v5625_v55, %v1239_v29  ;;  %v1436_v55 = vadd.f32 %v904_v6, %v791_v61  ;;  %v1345_v6 = vsel %vm7771_vm10, %v5486_v37, %v5450_v13 }
 0x396   :  { %v1319_v49 = vpop.permute.xlu2 %1318  ;;  %v1356_v11 = vmul.f32 %v1345_v6, %v4837_v0 }
 0x397   :  { %v1463_v7 = vadd.f32 %v1286_v35, %v1173_v1  ;;  %v1464_v57 = vadd.f32 %v1287_v34, %v1174_v32  ;;  %v1335_v48 = vsel %vm7771_vm10, %v1303_v26, %v1319_v49  ;;  %v1343_v27 = vsel %vm7771_vm10, %v1319_v49, %v1303_v26  ;;  %v8146_v1 = vld [vmem:[#allocation62_spill] sm:$0xff] }
 0x398   :  { %v1351_v36 = vmul.f32 %v4707_v9, %v1335_v48  ;;  %v1352_v29 = vmul.f32 %v1343_v27, %v4837_v0  ;;  %v1337_v26 = vsel %vm7771_vm10, %v5450_v13, %v5486_v37  ;;  %v8141_v13 = vld [vmem:[#allocation54_spill] sm:$0xff]  ;;  %v8142_v37 = vld [vmem:[#allocation32_spill] sm:$0xff] }
 0x399   :  { %v1495_v33 = vadd.f32 %v1463_v7, %v1447_v8  ;;  %v1496_v51 = vadd.f32 %v1464_v57, %v1448_v46  ;;  %v1499_v57 = vadd.f32 %v1467_v12, %v1451_v50  ;;  %v1420_v7 = vadd.f32 %v5551_v45, %v5541_v25  ;;  %v8145_v45 = vld [vmem:[#allocation61_spill] sm:$0xff]  ;;  %v8148_v12 = vld [vmem:[#allocation80_spill] sm:$0xff] }
 0x39a   :  { %v1399_v3 = vmul.f32 %v5639_v23, %v1351_v36  ;;  %v1400_v22 = vmul.f32 %v5639_v23, %v1352_v29  ;;  %v1355_v61 = vmul.f32 %v4707_v9, %v1337_v26  ;;  %v497_v32 = vsel %vm7773_vm3, %v8146_v1, %v8145_v45  ;;  %v8151_v29 = vld [vmem:[#allocation155_spill] sm:$0xff]  ;;  %v8152_v50 = vld [vmem:[#allocation81_spill] sm:$0xff] }
 0x39b   :  { %v1511_v4 = vadd.f32 %v1495_v33, %v5535_v10  ;;  %v1512_v8 = vadd.f32 %v1496_v51, %v5537_v18  ;;  %v949_v10 = vmul.f32 %v8142_v37, %v8141_v13  ;;  %v950_v18 = vmul.f32 %v8142_v37, %v8143_v28 }
 0x39c   :  { %v1484_v25 = vadd.f32 %v1436_v55, %v1420_v7  ;;  %v1515_v34 = vadd.f32 %v1499_v57, %v1483_v56  ;;  %v836_v46 = vsel %vm834_vm5, %v8148_v12, %v8147_v15  ;;  %v844_v55 = vsel %vm834_vm5, %v8147_v15, %v8148_v12 }
 0x39d   :  { %v5657_v49 = vadd.f32 %v1511_v4, %v1399_v3  ;;  %v5659_v38 = vadd.f32 %v1512_v8, %v1400_v22  ;;  %v5667_v44 = vpop.permute.xlu1 %1376  ;;  %v618_v36 = vsel %vm608_vm4, %v8150_v43, %v8149_v41  ;;  %v997_v33 = vsel %vm7774_vm8, %v8152_v50, %v8151_v29  ;;  %v8153_v3 = vld [vmem:[#allocation78_spill] sm:$0xff]  ;;  %v8154_v22 = vld [vmem:[#allocation65_spill] sm:$0xff] }
 0x39e   :  { %8144 = vst [vmem:[#allocation118_spill] sm:$0xff] %v5667_v44  ;;  %v1403_v58 = vmul.f32 %v5667_v44, %v1355_v61  ;;  %v1404_v48 = vmul.f32 %v5667_v44, %v1356_v11  ;;  %v1516_v27 = vadd.f32 %v1500_v63, %v1484_v25  ;;  %v1005_v51 = vsel %vm7774_vm8, %v8151_v29, %v8152_v50  ;;  %v8155_v61 = vld [vmem:[#allocation95_spill] sm:$0xff]  ;;  %v8157_v50 = vld [vmem:[#allocation18_spill] sm:$0xff] }
 0x39f   :  { %v1543_v35 = vadd.f32 %v5659_v38, %v5657_v49  ;;  %v489_v26 = vsel %vm7773_vm3, %v8145_v45, %v8146_v1  ;;  %v723_v6 = vsel %vm721_vm6, %v8154_v22, %v8153_v3  ;;  %v731_v4 = vsel %vm721_vm6, %v8153_v3, %v8154_v22 }
 0x3a0   :  { %v5697_v40 = vadd.f32 %v1515_v34, %v1403_v58  ;;  %v5711_v8 = vadd.f32 %v1516_v27, %v1404_v48  ;;  %v506_v57 = vmul.f32 %v497_v32, %v8101_v19  ;;  %v853_v7 = vmul.f32 %v8067_v5, %v844_v55  ;;  %v8156_v48 = vld [vmem:[#allocation26_spill] sm:$0xff] }
 0x3a1   :  { %1544 = vadd.xlane.f32.xlu1 %v1543_v35  ;;  %v854_v63 = vmul.f32 %v8099_v30, %v836_v46  ;;  %v1231_v56 = vsel %vm7772_vm7, %v5428_v59, %v8155_v61  ;;  %v627_v11 = vmul.f32 %v8100_v2, %v618_v36  ;;  %v1014_v13 = vmul.f32 %v4707_v9, %v997_v33 }
 0x3a2   :  { %v1015_v28 = vmul.f32 %v4726_v31, %v1005_v51  ;;  %v1549_v25 = vadd.f32 %v5711_v8, %v5697_v40  ;;  %v740_v45 = vmul.f32 %v731_v4, %v8097_v54  ;;  %v741_v1 = vmul.f32 %v4726_v31, %v723_v6 }
 0x3a3   :  { %v1110_v32 = vsel %vm1108_vm9, %v5365_v53, %v5273_v16  ;;  %v1118_v35 = vsel %vm1108_vm9, %v5273_v16, %v5365_v53  ;;  %v610_v58 = vsel %vm608_vm4, %v8149_v41, %v8150_v43  ;;  %v1241_v34 = vmul.f32 %v4709_v17, %v1231_v56 }
 0x3a4   :  { %v1062_v15 = vmul.f32 %v5548_v21, %v1014_v13  ;;  %v1063_v12 = vmul.f32 %v5548_v21, %v1015_v28  ;;  %1550 = vadd.xlane.f32.xlu0 %v1549_v25  ;;  %v507_v55 = vmul.f32 %v8099_v30, %v489_v26  ;;  %v901_v27 = vmul.f32 %v8156_v48, %v853_v7  ;;  %v8158_v26 = vld [vmem:[#allocation10_spill] sm:$0xff] }
 0x3a5   :  { %v1305_v46 = vpop.permute.xlu1 %1304  ;;  %v902_v36 = vmul.f32 %v8156_v48, %v854_v63  ;;  %v1223_v16 = vsel %vm7772_vm7, %v8155_v61, %v5428_v59  ;;  %v1127_v53 = vmul.f32 %v8067_v5, %v1110_v32  ;;  %v1128_v41 = vmul.f32 %v1118_v35, %v4731_v62  ;;  %v8159_v63 = vld [vmem:[#allocation8_spill] sm:$0xff] }
 0x3a6   :  { %v1288_v43 = vmul.f32 %v5508_v52, %v1223_v16  ;;  %v1289_v29 = vmul.f32 %v5508_v52, %v1241_v34  ;;  %v788_v33 = vmul.f32 %v8157_v50, %v740_v45  ;;  %v789_v51 = vmul.f32 %v8157_v50, %v741_v1 }
 0x3a7   :  { %v675_v3 = vmul.f32 %v8158_v26, %v627_v11  ;;  %v676_v22 = vmul.f32 %v8158_v26, %v610_v58  ;;  %v1175_v6 = vmul.f32 %v5461_v42, %v1127_v53  ;;  %v1176_v59 = vmul.f32 %v5461_v42, %v1128_v41 }
 0x3a8   :  { %v1449_v4 = vadd.f32 %v1062_v15, %v949_v10  ;;  %v1450_v7 = vadd.f32 %v1063_v12, %v950_v18  ;;  %v562_v61 = vmul.f32 %v8159_v63, %v506_v57  ;;  %v563_v56 = vmul.f32 %v8159_v63, %v507_v55  ;;  %v5765_v18 = vpop.permute.xlu2 %1372 }
 0x3a9   :  { %v1433_v13 = vadd.f32 %v901_v27, %v788_v33  ;;  %v1434_v28 = vadd.f32 %v902_v36, %v789_v51  ;;  %v1465_v25 = vadd.f32 %v1288_v43, %v1175_v6  ;;  %v1466_v45 = vadd.f32 %v1289_v29, %v1176_v59  ;;  %8160 = vst [vmem:[#allocation125_spill] sm:$0xff] %v5765_v18 }
 0x3aa   :  { %v1417_v32 = vadd.f32 %v675_v3, %v562_v61  ;;  %v1418_v1 = vadd.f32 %v676_v22, %v563_v56 }
 0x3ab   :  { %v1497_v11 = vadd.f32 %v1465_v25, %v1449_v4  ;;  %v1498_v34 = vadd.f32 %v1466_v45, %v1450_v7 }
 0x3ac   :  { %v1481_v12 = vadd.f32 %v1433_v13, %v1417_v32  ;;  %v1482_v55 = vadd.f32 %v1434_v28, %v1418_v1  ;;  %v8162_v13 = vld [vmem:[#allocation102_spill] sm:$0xff]  ;;  %v1566_v1 = vpop.xlane.xlu0 %1565 }
 0x3ad   :  { %v1321_v35 = vpop.permute.xlu1 %1320 }
 0x3ae   :  { %v1336_v58 = vsel %vm7771_vm10, %v1305_v46, %v1321_v35  ;;  %v1344_v10 = vsel %vm7771_vm10, %v1321_v35, %v1305_v46  ;;  %v1513_v16 = vadd.f32 %v1497_v11, %v1481_v12  ;;  %v1514_v53 = vadd.f32 %v1498_v34, %v1482_v55  ;;  %v8161_v46 = vld [vmem:[#allocation39_spill] sm:$0xff]  ;;  %v8163_v55 = vld [vmem:[#allocation110_spill] sm:$0xff] }
 0x3af   :  { %v1353_v57 = vmul.f32 %v4707_v9, %v1336_v58  ;;  %v1354_v15 = vmul.f32 %v1344_v10, %v4837_v0 }
 0x3b1   :  { %v1401_v27 = vmul.f32 %v5765_v18, %v1353_v57  ;;  %v1402_v36 = vmul.f32 %v5765_v18, %v1354_v15 }
 0x3b3   :  { %v1529_v41 = vadd.f32 %v1513_v16, %v1401_v27  ;;  %v1530_v43 = vadd.f32 %v1514_v53, %v1402_v36  ;;  %v8164_v36 = vld [vmem:[#allocation108_spill] sm:$0xff]  ;;  %v1574_v53 = vmul.f32 %v1566_v1, %v8161_v46 }
 0x3b5   :  { %v1546_v29 = vadd.f32 %v1530_v43, %v1529_v41 }
 0x3b7   :  { %1547 = vadd.xlane.f32.xlu0 %v1546_v29 }
 0x3d8   :  { %v1563_v45 = vpop.xlane.xlu1 %1562 }
 0x3e0   :  { %v1557_v33 = vpop.xlane.xlu2 %1556  ;;  %v1560_v32 = vpop.xlane.xlu1 %1559 }
 0x3e1   :  { %v1571_v51 = vmul.f32 %v1557_v33, %v8161_v46 }
 0x3e3   :  { %v5773_v3 = vsub.f32 %v5387_v39, %v1571_v51  ;;  %v5776_v22 = vsub.f32 %v5389_v60, %v1571_v51 }
 0x3e5   :  { %v1599_v6 = vmul.f32 %v5773_v3, %v5773_v3  ;;  %v1600_v59 = vmul.f32 %v5776_v22, %v5776_v22 }
 0x3e7   :  { %v1619_v4 = vadd.f32 %v1600_v59, %v1599_v6  ;;  %v1573_v6 = vmul.f32 %v1563_v45, %v8161_v46 }
 0x3e9   :  { %v1554_v7 = vpop.xlane.xlu2 %1553  ;;  %1620 = vadd.xlane.f32.xlu0 %v1619_v4 }
 0x3ea   :  { %v1570_v61 = vmul.f32 %v1554_v7, %v8161_v46 }
 0x3ec   :  { %v5784_v56 = vsub.f32 %v5424_v20, %v1570_v61  ;;  %v5787_v39 = vsub.f32 %v8162_v13, %v1570_v61  ;;  %v1572_v20 = vmul.f32 %v1560_v32, %v8161_v46 }
 0x3ee   :  { %v1597_v60 = vmul.f32 %v5784_v56, %v5784_v56  ;;  %v1598_v28 = vmul.f32 %v5787_v39, %v5787_v39  ;;  %v5807_v27 = vsub.f32 %v8163_v55, %v1572_v20  ;;  %v5810_v16 = vsub.f32 %v8164_v36, %v1572_v20 }
 0x3f0   :  { %v1616_v25 = vadd.f32 %v1598_v28, %v1597_v60  ;;  %v1601_v59 = vmul.f32 %v5807_v27, %v5807_v27  ;;  %v1602_v4 = vmul.f32 %v5810_v16, %v5810_v16  ;;  %v8167_v60 = vld [vmem:[#allocation116_spill] sm:$0xff] }
 0x3f1   :  { %v5835_v28 = vsub.f32 %v8167_v60, %v1573_v6 }
 0x3f2   :  { %1617 = vadd.xlane.f32.xlu0 %v1616_v25  ;;  %v8168_v25 = vld [vmem:[#allocation115_spill] sm:$0xff]  ;;  %v1622_v45 = vadd.f32 %v1602_v4, %v1601_v59 }
 0x3f3   :  { %v5838_v32 = vsub.f32 %v8168_v25, %v1573_v6 }
 0x3f5   :  { %v1604_v20 = vmul.f32 %v5838_v32, %v5838_v32 }
 0x414   :  { %v1545_v35 = vpop.xlane.xlu1 %1544 }
 0x415   :  { %v1567_v11 = vmul.f32 %v1545_v35, %v8161_v46 }
 0x417   :  { %v5796_v34 = vsub.f32 %v5657_v49, %v1567_v11  ;;  %v5799_v58 = vsub.f32 %v5659_v38, %v1567_v11  ;;  %v1551_v15 = vpop.xlane.xlu0 %1550  ;;  %v1603_v11 = vmul.f32 %v5835_v28, %v5835_v28 }
 0x418   :  { %v1569_v12 = vmul.f32 %v1551_v15, %v8161_v46 }
 0x419   :  { %v1591_v10 = vmul.f32 %v5796_v34, %v5796_v34  ;;  %v1592_v57 = vmul.f32 %v5799_v58, %v5799_v58  ;;  %v1625_v15 = vadd.f32 %v1604_v20, %v1603_v11 }
 0x41a   :  { %v5814_v38 = vsub.f32 %v5697_v40, %v1569_v12  ;;  %v5817_v29 = vsub.f32 %v5711_v8, %v1569_v12  ;;  %v8165_v40 = vld [vmem:[#allocation156_spill] sm:$0xff]  ;;  %v8166_v8 = vld [vmem:[#allocation157_spill] sm:$0xff] }
 0x41b   :  { %v1607_v49 = vadd.f32 %v1592_v57, %v1591_v10  ;;  %v5829_v7 = vsub.f32 %v8165_v40, %v1574_v53  ;;  %v5832_v61 = vsub.f32 %v8166_v8, %v1574_v53 }
 0x41c   :  { %v1595_v33 = vmul.f32 %v5814_v38, %v5814_v38  ;;  %v1596_v51 = vmul.f32 %v5817_v29, %v5817_v29 }
 0x41d   :  { %1608 = vadd.xlane.f32.xlu2 %v1607_v49  ;;  %v1605_v1 = vmul.f32 %v5829_v7, %v5829_v7  ;;  %v1606_v35 = vmul.f32 %v5832_v61, %v5832_v61 }
 0x41e   :  { %v1613_v13 = vadd.f32 %v1596_v51, %v1595_v33 }
 0x41f   :  { %v1628_v10 = vadd.f32 %v1606_v35, %v1605_v1 }
 0x420   :  { %1614 = vadd.xlane.f32.xlu1 %v1613_v13 }
 0x425   :  { %1623 = vadd.xlane.f32.xlu2 %v1622_v45 }
 0x428   :  { %1629 = vadd.xlane.f32.xlu1 %v1628_v10 }
 0x42a   :  { %v1548_v57 = vpop.xlane.xlu0 %1547 }
 0x42b   :  { %v1568_v12 = vmul.f32 %v1548_v57, %v8161_v46 }
 0x42d   :  { %1626 = vadd.xlane.f32.xlu2 %v1625_v15  ;;  %v5849_v55 = vsub.f32 %v1529_v41, %v1568_v12  ;;  %v5851_v36 = vsub.f32 %v1530_v43, %v1568_v12 }
 0x42f   :  { %v1593_v49 = vmul.f32 %v5849_v55, %v5849_v55  ;;  %v1594_v53 = vmul.f32 %v5851_v36, %v5851_v36 }
 0x431   :  { %v1610_v33 = vadd.f32 %v1594_v53, %v1593_v49 }
 0x433   :  { %1611 = vadd.xlane.f32.xlu1 %v1610_v33 }
 0x45c   :  { %v1621_v51 = vpop.xlane.xlu0 %1620 }
 0x45d   :  { %v1635_v6 = vmul.f32 %v1621_v51, %v8161_v46 }
 0x45f   :  { %v1643_v59 = vadd.f32 1e-05, %v1635_v6 }
 0x461   :  { %3642 = vrsqrt.f32 %v1643_v59  ;;  %vm1693_vm12 = vweird.f32 %v1643_v59 }
 0x465   :  { %v1618_v4 = vpop.xlane.xlu0 %1617 }
 0x466   :  { %v1634_v40 = vmul.f32 %v1618_v4, %v8161_v46 }
 0x467   :  { %v3643_v43 = vpop.eup %3642 }
 0x468   :  { %v5859_v41 = vadd.f32 1e-05, %v1634_v40  ;;  %v1688_v13 = vmul.f32 %v3643_v43, %v1643_v59  ;;  %vm1694_vm11 = vweird.f32 %v3643_v43 }
 0x469   :  { %vm1695_vm13 = vmor %vm1693_vm12, %vm1694_vm11 }
 0x46a   :  { %3644 = vrsqrt.f32 %v5859_v41  ;;  %v1689_v45 = vmul.f32 %v3643_v43, %v1688_v13  ;;  %vm1683_vm14 = vweird.f32 %v5859_v41 }
 0x46c   :  { %v1690_v57 = vmul.f32 0.5, %v1689_v45 }
 0x46e   :  { %v1691_v53 = vsub.f32 1.5, %v1690_v57 }
 0x470   :  { %v5866_v11 = vpop.eup %3644 }
 0x471   :  { %v1678_v12 = vmul.f32 %v5866_v11, %v5859_v41  ;;  %vm1684_vm15 = vweird.f32 %v5866_v11 }
 0x472   :  { %vm1685_vm2 = vmor %vm1683_vm14, %vm1684_vm15 }
 0x473   :  { %v1679_v6 = vmul.f32 %v5866_v11, %v1678_v12 }
 0x490   :  { %v1609_v8 = vpop.xlane.xlu2 %1608 }
 0x491   :  { %v1631_v60 = vmul.f32 %v1609_v8, %v8161_v46 }
 0x493   :  { %v5863_v25 = vadd.f32 1e-05, %v1631_v60  ;;  %v1615_v1 = vpop.xlane.xlu1 %1614  ;;  %v1692_v60 = vmul.f32 %v3643_v43, %v1691_v53 }
 0x494   :  { %v1633_v35 = vmul.f32 %v1615_v1, %v8161_v46 }
 0x495   :  { %3646 = vrsqrt.f32 %v5863_v25 }
 0x496   :  { %v5869_v20 = vadd.f32 1e-05, %v1633_v35 }
 0x498   :  { %v1624_v10 = vpop.xlane.xlu2 %1623  ;;  %3648 = vrsqrt.f32 %v5869_v20  ;;  %vm1673_vm3 = vweird.f32 %v5869_v20 }
 0x499   :  { %v1636_v15 = vmul.f32 %v1624_v10, %v8161_v46  ;;  %v1680_v10 = vmul.f32 0.5, %v1679_v6 }
 0x49b   :  { %v1644_v49 = vadd.f32 1e-05, %v1636_v15  ;;  %v1630_v33 = vpop.xlane.xlu1 %1629  ;;  %v5875_v51 = vpop.eup %3646  ;;  %v1681_v18 = vsub.f32 1.5, %v1680_v10 }
 0x49c   :  { %v1638_v4 = vmul.f32 %v1630_v33, %v8161_v46  ;;  %v1648_v45 = vmul.f32 %v5875_v51, %v5863_v25  ;;  %vm1654_vm14 = vweird.f32 %v5875_v51 }
 0x49d   :  { %3650 = vrsqrt.f32 %v1644_v49  ;;  %vm1703_vm11 = vweird.f32 %v1644_v49 }
 0x49e   :  { %v5879_v40 = vpop.eup %3648  ;;  %v5881_v8 = vadd.f32 1e-05, %v1638_v4  ;;  %v1649_v53 = vmul.f32 %v5875_v51, %v1648_v45  ;;  %v1696_v4 = vsel %vm1695_vm13, %v3643_v43, %v1692_v60  ;;  %v1682_v45 = vmul.f32 %v5866_v11, %v1681_v18 }
 0x49f   :  { %v1668_v1 = vmul.f32 %v5879_v40, %v5869_v20  ;;  %v1735_v59 = vmul.f32 %v1696_v4, %v5773_v3  ;;  %vm1674_vm13 = vweird.f32 %v5879_v40 }
 0x4a0   :  { %v1627_v13 = vpop.xlane.xlu2 %1626  ;;  %3652 = vrsqrt.f32 %v5881_v8  ;;  %vm1675_vm15 = vmor %vm1673_vm3, %vm1674_vm13 }
 0x4a1   :  { %v1637_v35 = vmul.f32 %v1627_v13, %v8161_v46  ;;  %v1669_v15 = vmul.f32 %v5879_v40, %v1668_v1  ;;  %v1650_v1 = vmul.f32 0.5, %v1649_v53  ;;  %v1767_v53 = vmul.f32 0.2, %v1735_v59 }
 0x4a2   :  { %vm1751_vm12 = vcmp.ge.f32.partialorder %v1735_v59, 0.0 }
 0x4a3   :  { %v3651_v57 = vpop.eup %3650  ;;  %v5890_v12 = vadd.f32 1e-05, %v1637_v35  ;;  %v1670_v23 = vmul.f32 0.5, %v1669_v15  ;;  %v1651_v18 = vsub.f32 1.5, %v1650_v1  ;;  %v5913_v41 = vsel %vm1751_vm12, %v1735_v59, %v1767_v53 }
 0x4a4   :  { %v1698_v33 = vmul.f32 %v3651_v57, %v1644_v49  ;;  %vm1704_vm1 = vweird.f32 %v3651_v57 }
 0x4a5   :  { %3654 = vrsqrt.f32 %v5890_v12  ;;  %v1671_v15 = vsub.f32 1.5, %v1670_v23  ;;  %vm1705_vm10 = vmor %vm1703_vm11, %vm1704_vm1  ;;  %v1686_v23 = vsel %vm1685_vm2, %v5866_v11, %v1682_v45  ;;  %v1652_v1 = vmul.f32 %v5875_v51, %v1651_v18 }
 0x4a6   :  { %v1699_v44 = vmul.f32 %v3651_v57, %v1698_v33  ;;  %v1612_v13 = vpop.xlane.xlu1 %1611  ;;  %v3653_v6 = vpop.eup %3652  ;;  %v5903_v33 = vmul.f32 %v1696_v4, %v5776_v22  ;;  %vm1723_vm1 = vweird.f32 %v5881_v8  ;;  %vm1653_vm11 = vweird.f32 %v5863_v25 }
 0x4a7   :  { %v1632_v42 = vmul.f32 %v1612_v13, %v8161_v46  ;;  %v1718_v35 = vmul.f32 %v3653_v6, %v5881_v8  ;;  %v1672_v22 = vmul.f32 %v5879_v40, %v1671_v15  ;;  %vm1724_vm7 = vweird.f32 %v3653_v6  ;;  %vm1655_vm3 = vmor %vm1653_vm11, %vm1654_vm14 }
 0x4a8   :  { %v1700_v52 = vmul.f32 0.5, %v1699_v44  ;;  %v5916_v49 = vmul.f32 0.2, %v5903_v33  ;;  %vm1725_vm2 = vmor %vm1723_vm1, %vm1724_vm7  ;;  %vm1713_vm12 = vweird.f32 %v5890_v12  ;;  %vm1752_vm7 = vcmp.ge.f32.partialorder %v5903_v33, 0.0 }
 0x4a9   :  { %v5900_v60 = vadd.f32 1e-05, %v1632_v42  ;;  %v1719_v44 = vmul.f32 %v3653_v6, %v1718_v35  ;;  %v1656_v25 = vsel %vm1655_vm3, %v5875_v51, %v1652_v1 }
 0x4aa   :  { %v1701_v43 = vsub.f32 1.5, %v1700_v52 }
 0x4ab   :  { %v3655_v10 = vpop.eup %3654  ;;  %3656 = vrsqrt.f32 %v5900_v60  ;;  %v1720_v52 = vmul.f32 0.5, %v1719_v44  ;;  %vm1663_vm1 = vweird.f32 %v5900_v60 }
 0x4ac   :  { %v1702_v3 = vmul.f32 %v3651_v57, %v1701_v43  ;;  %v1708_v13 = vmul.f32 %v3655_v10, %v5890_v12 }
 0x4ad   :  { %v1721_v4 = vsub.f32 1.5, %v1720_v52 }
 0x4ae   :  { %v1709_v42 = vmul.f32 %v3655_v10, %v1708_v13  ;;  %v1706_v35 = vsel %vm1705_vm10, %v3651_v57, %v1702_v3  ;;  %vm1714_vm10 = vweird.f32 %v3655_v10  ;;  %v5923_v57 = vmul.f32 %v1686_v23, %v5784_v56 }
 0x4af   :  { %v1722_v11 = vmul.f32 %v3653_v6, %v1721_v4  ;;  %v1737_v20 = vmul.f32 %v1706_v35, %v5807_v27  ;;  %v1676_v3 = vsel %vm1675_vm15, %v5879_v40, %v1672_v22  ;;  %vm1715_vm13 = vmor %vm1713_vm12, %vm1714_vm10  ;;  %v5934_v27 = vmul.f32 %v1686_v23, %v5787_v39 }
 0x4b0   :  { %v1710_v43 = vmul.f32 0.5, %v1709_v42  ;;  %v1738_v12 = vmul.f32 %v1706_v35, %v5810_v16  ;;  %v1731_v18 = vmul.f32 %v1676_v3, %v5814_v38  ;;  %v1732_v16 = vmul.f32 %v1676_v3, %v5817_v29 }
 0x4b1   :  { %v3657_v45 = vpop.eup %3656  ;;  %v1726_v44 = vsel %vm1725_vm2, %v3653_v6, %v1722_v11  ;;  %v1769_v6 = vmul.f32 0.2, %v1737_v20  ;;  %vm1753_vm3 = vcmp.ge.f32.partialorder %v1737_v20, 0.0 }
 0x4b2   :  { %v1711_v15 = vsub.f32 1.5, %v1710_v43  ;;  %v1658_v59 = vmul.f32 %v3657_v45, %v5900_v60  ;;  %v1741_v13 = vmul.f32 %v1726_v44, %v5829_v7  ;;  %v1742_v53 = vmul.f32 %v1726_v44, %v5832_v61 }
 0x4b3   :  { %vm1664_vm14 = vweird.f32 %v3657_v45  ;;  %vm1754_vm12 = vcmp.ge.f32.partialorder %v1738_v12, 0.0  ;;  %vm1747_vm8 = vcmp.ge.f32.partialorder %v1731_v18, 0.0  ;;  %v1785_v11 = vsel %vm1753_vm3, %v1737_v20, %v1769_v6 }
 0x4b4   :  { %v1712_v8 = vmul.f32 %v3655_v10, %v1711_v15  ;;  %v1659_v56 = vmul.f32 %v3657_v45, %v1658_v59  ;;  %v1773_v52 = vmul.f32 0.2, %v1741_v13  ;;  %vm1757_vm15 = vcmp.ge.f32.partialorder %v1741_v13, 0.0 }
 0x4b5   :  { %vm1758_vm2 = vcmp.ge.f32.partialorder %v1742_v53, 0.0  ;;  %v1774_v22 = vmul.f32 0.2, %v1742_v53  ;;  %v1763_v15 = vmul.f32 0.2, %v1731_v18  ;;  %v1784_v60 = vsel %vm1752_vm7, %v5903_v33, %v5916_v49 }
 0x4b6   :  { %v1716_v40 = vsel %vm1715_vm13, %v3655_v10, %v1712_v8  ;;  %v1660_v7 = vmul.f32 0.5, %v1659_v56  ;;  %v1770_v10 = vmul.f32 0.2, %v1738_v12  ;;  %v1789_v35 = vsel %vm1757_vm15, %v1741_v13, %v1773_v52  ;;  %vm1665_vm13 = vmor %vm1663_vm1, %vm1664_vm14 }
 0x4b7   :  { %v1739_v61 = vmul.f32 %v1716_v40, %v5835_v28  ;;  %v1740_v42 = vmul.f32 %v1716_v40, %v5838_v32  ;;  %v1790_v43 = vsel %vm1758_vm2, %v1742_v53, %v1774_v22  ;;  %v1764_v29 = vmul.f32 0.2, %v1732_v16 }
 0x4b8   :  { %v1661_v39 = vsub.f32 1.5, %v1660_v7  ;;  %v1786_v44 = vsel %vm1754_vm12, %v1738_v12, %v1770_v10  ;;  %v1765_v13 = vmul.f32 0.2, %v5923_v57  ;;  %vm1748_vm1 = vcmp.ge.f32.partialorder %v1732_v16, 0.0  ;;  %v3530_v10 = vld [vmem:[%s7504_s0 + $0x40] sm:$0xff] }
 0x4b9   :  { %vm1755_vm10 = vcmp.ge.f32.partialorder %v1739_v61, 0.0  ;;  %v1771_v23 = vmul.f32 0.2, %v1739_v61  ;;  %vm1756_vm11 = vcmp.ge.f32.partialorder %v1740_v42, 0.0  ;;  %v1772_v51 = vmul.f32 0.2, %v1740_v42 }
 0x4ba   :  { %v1662_v38 = vmul.f32 %v3657_v45, %v1661_v39  ;;  %v1727_v20 = vmul.f32 %v1656_v25, %v5796_v34  ;;  %vm1749_vm14 = vcmp.ge.f32.partialorder %v5923_v57, 0.0  ;;  %v1766_v53 = vmul.f32 0.2, %v5934_v27 }
 0x4bb   :  { %v1787_v4 = vsel %vm1755_vm10, %v1739_v61, %v1771_v23  ;;  %v1788_v32 = vsel %vm1756_vm11, %v1740_v42, %v1772_v51  ;;  %v1779_v56 = vsel %vm1747_vm8, %v1731_v18, %v1763_v15  ;;  %vm1750_vm15 = vcmp.ge.f32.partialorder %v5934_v27, 0.0  ;;  %v3536_v18 = vld [vmem:[%s7504_s0 + $0x70] sm:$0xff]  ;;  %v3715_v15 = vld [vmem:[%s7505_s1 + $0x8] sm:$0xff] }
 0x4bc   :  { %v1797_v28 = vpack.c.bf16 %v1789_v35, %v1787_v4  ;;  %v1798_v1 = vpack.c.bf16 %v1790_v43, %v1788_v32  ;;  %v1666_v59 = vsel %vm1665_vm13, %v3657_v45, %v1662_v38  ;;  %v1795_v45 = vpack.c.bf16 %v1785_v11, %v5913_v41  ;;  %v3562_v4 = vld [vmem:[%s7506_s3] sm:$0xff]  ;;  %v3531_v35 = vld [vmem:[%s7504_s0 + $0x48] sm:$0xff] }
 0x4bd   :  { %v1729_v3 = vmul.f32 %v1666_v59, %v5849_v55  ;;  %v1730_v8 = vmul.f32 %v1666_v59, %v5851_v36  ;;  %v1728_v55 = vmul.f32 %v1656_v25, %v5799_v58  ;;  %v1796_v36 = vpack.c.bf16 %v1786_v44, %v1784_v60  ;;  %v3534_v25 = vld [vmem:[%s7504_s0 + $0x60] sm:$0xff]  ;;  %v3716_v59 = vld [vmem:[%s7505_s1 + $0x10] sm:$0xff]  ;;  %v3717_v44 = vld [vmem:[%s7505_s1 + $0x18] sm:$0xff] }
 0x4be   :  { %1820 = vmatpush.bf16.msra.mxu2 %v1797_v28  ;;  %1839 = vmatpush.bf16.msra.mxu3 %v1798_v1  ;;  %v1780_v33 = vsel %vm1748_vm1, %v1732_v16, %v1764_v29  ;;  %v1781_v34 = vsel %vm1749_vm14, %v5923_v57, %v1765_v13  ;;  %v1759_v41 = vmul.f32 0.2, %v1727_v20  ;;  %v1782_v12 = vsel %vm1750_vm15, %v5934_v27, %v1766_v53  ;;  %v3535_v57 = vld [vmem:[%s7504_s0 + $0x68] sm:$0xff]  ;;  %v3537_v27 = vld [vmem:[%s7504_s0 + $0x78] sm:$0xff]  ;;  %v3532_v16 = vld [vmem:[%s7504_s0 + $0x50] sm:$0xff] }
 0x4bf   :  { %v1761_v40 = vmul.f32 0.2, %v1729_v3  ;;  %vm1745_vm7 = vcmp.ge.f32.partialorder %v1729_v3, 0.0  ;;  %v1762_v49 = vmul.f32 0.2, %v1730_v8  ;;  %vm1746_vm2 = vcmp.ge.f32.partialorder %v1730_v8, 0.0 }
 0x4c0   :  { %v1793_v6 = vpack.c.bf16 %v1781_v34, %v1779_v56  ;;  %vm1743_vm10 = vcmp.ge.f32.partialorder %v1727_v20, 0.0  ;;  %v1760_v58 = vmul.f32 0.2, %v1728_v55  ;;  %v1794_v7 = vpack.c.bf16 %v1782_v12, %v1780_v33  ;;  %v3533_v28 = vld [vmem:[%s7504_s0 + $0x58] sm:$0xff]  ;;  %v3563_v1 = vld [vmem:[%s7506_s3 + $0x8] sm:$0xff]  ;;  %v3714_v11 = vld [vmem:[%s7505_s1] sm:$0xff] }
 0x4c1   :  { %v1777_v61 = vsel %vm1745_vm7, %v1729_v3, %v1761_v40  ;;  %vm1744_vm8 = vcmp.ge.f32.partialorder %v1728_v55, 0.0  ;;  %v1778_v52 = vsel %vm1746_vm2, %v1730_v8, %v1762_v49  ;;  %v1775_v42 = vsel %vm1743_vm10, %v1727_v20, %v1759_v41 }
 0x4c2   :  { %1821 = vmatpush.bf16.msra.mxu2 %v1795_v45  ;;  %1840 = vmatpush.bf16.msra.mxu3 %v1796_v36  ;;  %v1981_v22 = vpack.c.bf16 %v3536_v18, %v3534_v25  ;;  %v1791_v39 = vpack.c.bf16 %v1777_v61, %v1775_v42  ;;  %v1776_v23 = vsel %vm1744_vm8, %v1728_v55, %v1760_v58  ;;  %vm1809_vm11 = vcmask 523264  }
 0x4c3   :  { %v1982_v51 = vpack.c.bf16 %v3537_v27, %v3535_v57  ;;  %v1792_v38 = vpack.c.bf16 %v1778_v52, %v1776_v23  ;;  %v1979_v32 = vpack.c.bf16 %v3532_v16, %v3530_v10  ;;  %v1980_v43 = vpack.c.bf16 %v3533_v28, %v3531_v35 }
 0x4c6   :  { %1822 = vmatpush.bf16.msra.mxu2 %v1793_v6  ;;  %1841 = vmatpush.bf16.msra.mxu3 %v1794_v7 }
 0x4ca   :  { %1823 = vmatpush.bf16.msra.mxu2 %v1791_v39  ;;  %1842 = vmatpush.bf16.msra.mxu3 %v1792_v38 }
 0x4cd   :  { %3526 = vmatmul.msk.bf16.vlgmr.msra.gmra.mxu2 %vm1809_vm11, %v3562_v4  ;;  %3528 = vmatmul.msk.bf16.vlgmr.msra.gmra.mxu3 %vm1809_vm11, %v3562_v4 }
 0x4ce   :  { %1989 = vmatpush.bf16.msrb.mxu2 %v1981_v22  ;;  %2018 = vmatpush.bf16.msrb.mxu3 %v1982_v51 }
 0x4d2   :  { %1990 = vmatpush.bf16.msrb.mxu2 %v1979_v32  ;;  %2019 = vmatpush.bf16.msrb.mxu3 %v1980_v43 }
 0x4dd   :  { %3527 = vmatmul.msk.bf16.gmra.mxu2 %vm1809_vm11, %v3563_v1  ;;  %3529 = vmatmul.msk.bf16.gmra.mxu3 %vm1809_vm11, %v3563_v1 }
 0x4ed   :  { %3538 = vmatmul.msk.bf16.vlgmr.msrb.gmra.mxu2 %vm129_vm0, %v3714_v11  ;;  %3542 = vmatmul.msk.bf16.vlgmr.msrb.gmra.mxu3 %vm129_vm0, %v3714_v11 }
 0x4fd   :  { %3539 = vmatmul.msk.bf16.gmra.mxu2 %vm129_vm0, %v3715_v15  ;;  %3543 = vmatmul.msk.bf16.gmra.mxu3 %vm129_vm0, %v3715_v15 }
 0x50d   :  { %3540 = vmatmul.msk.bf16.gmra.mxu2 %vm129_vm0, %v3716_v59  ;;  %3544 = vmatmul.msk.bf16.gmra.mxu3 %vm129_vm0, %v3716_v59 }
 0x51d   :  { %3541 = vmatmul.msk.bf16.gmra.mxu2 %vm129_vm0, %v3717_v44  ;;  %3545 = vmatmul.msk.bf16.gmra.mxu3 %vm129_vm0, %v3717_v44 }
 0x550   :  { %v1825_v29 = vpop.f32.mrf.mxu2  ;;  %v1844_v3 = vpop.f32.mrf.mxu3 }
 0x551   :  { %v1854_v8 = vadd.f32 %v1844_v3, %v1825_v29 }
 0x553   :  { %1855 = vadd.xlane.f32.xlu2 %v1854_v8 }
 0x558   :  { %v1827_v60 = vpop.f32.mrf.mxu2  ;;  %v1846_v13 = vpop.f32.mrf.mxu3 }
 0x559   :  { %v1857_v20 = vadd.f32 %v1846_v13, %v1827_v60 }
 0x55b   :  { %1858 = vadd.xlane.f32.xlu1 %v1857_v20 }
 0x560   :  { %v1830_v45 = vpop.f32.mrf.mxu2  ;;  %v1849_v53 = vpop.f32.mrf.mxu3 }
 0x561   :  { %v1860_v55 = vadd.f32 %v1849_v53, %v1830_v45 }
 0x563   :  { %1861 = vadd.xlane.f32.xlu0 %v1860_v55 }
 0x568   :  { %v1832_v36 = vpop.f32.mrf.mxu2  ;;  %v1851_v56 = vpop.f32.mrf.mxu3 }
 0x569   :  { %v1863_v40 = vadd.f32 %v1851_v56, %v1832_v36 }
 0x56b   :  { %1864 = vadd.xlane.f32.xlu2 %v1863_v40 }
 0x570   :  { %v6016_v33 = vpop.f32.mrf.mxu2  ;;  %v6018_v49 = vpop.f32.mrf.mxu3 }
 0x571   :  { %v2041_v34 = vadd.f32 %v6018_v49, %v6016_v33 }
 0x573   :  { %2042 = vadd.xlane.f32.xlu0 %v2041_v34 }
 0x578   :  { %v6022_v41 = vpop.f32.mrf.mxu2  ;;  %v6024_v6 = vpop.f32.mrf.mxu3 }
 0x579   :  { %v2044_v12 = vadd.f32 %v6024_v6, %v6022_v41 }
 0x57b   :  { %2045 = vadd.xlane.f32.xlu2 %v2044_v12 }
 0x580   :  { %v6028_v58 = vpop.f32.mrf.mxu2  ;;  %v6030_v25 = vpop.f32.mrf.mxu3 }
 0x581   :  { %v2047_v18 = vadd.f32 %v6030_v25, %v6028_v58 }
 0x583   :  { %2048 = vadd.xlane.f32.xlu2 %v2047_v18 }
 0x588   :  { %v6034_v7 = vpop.f32.mrf.mxu2  ;;  %v6036_v61 = vpop.f32.mrf.mxu3 }
 0x589   :  { %v2050_v57 = vadd.f32 %v6036_v61, %v6034_v7 }
 0x58b   :  { %2051 = vadd.xlane.f32.xlu1 %v2050_v57 }
 0x590   :  { %v6040_v27 = vpop.f32.mrf.mxu2  ;;  %v6042_v52 = vpop.f32.mrf.mxu3 }
 0x591   :  { %v2053_v42 = vadd.f32 %v6042_v52, %v6040_v27 }
 0x593   :  { %2054 = vadd.xlane.f32.xlu1 %v2053_v42 }
 0x598   :  { %v6046_v22 = vpop.f32.mrf.mxu2  ;;  %v6048_v39 = vpop.f32.mrf.mxu3 }
 0x599   :  { %v2056_v23 = vadd.f32 %v6048_v39, %v6046_v22 }
 0x59b   :  { %2057 = vadd.xlane.f32.xlu0 %v2056_v23 }
 0x5a0   :  { %v6052_v51 = vpop.f32.mrf.mxu2  ;;  %v6054_v10 = vpop.f32.mrf.mxu3 }
 0x5a1   :  { %v2059_v16 = vadd.f32 %v6054_v10, %v6052_v51 }
 0x5a3   :  { %2060 = vadd.xlane.f32.xlu0 %v2059_v16 }
 0x5a8   :  { %v6058_v38 = vpop.f32.mrf.mxu2  ;;  %v6060_v4 = vpop.f32.mrf.mxu3 }
 0x5a9   :  { %v2062_v35 = vadd.f32 %v6060_v4, %v6058_v38 }
 0x5ab   :  { %2063 = vadd.xlane.f32.xlu2 %v2062_v35 }
 0x5c6   :  { %v1856_v28 = vpop.xlane.xlu2 %1855 }
 0x5c7   :  { %v1866_v32 = vmul.f32 %v1856_v28, %v8161_v46 }
 0x5c9   :  { %v6065_v43 = vsub.f32 %v1825_v29, %v1866_v32  ;;  %v6067_v1 = vsub.f32 %v1844_v3, %v1866_v32 }
 0x5cb   :  { %v1878_v11 = vmul.f32 %v6065_v43, %v6065_v43  ;;  %v1879_v15 = vmul.f32 %v6067_v1, %v6067_v1 }
 0x5cd   :  { %v1886_v59 = vadd.f32 %v1879_v15, %v1878_v11 }
 0x5ce   :  { %v1859_v44 = vpop.xlane.xlu1 %1858 }
 0x5cf   :  { %v1867_v8 = vmul.f32 %v1859_v44, %v8161_v46  ;;  %1887 = vadd.xlane.f32.xlu1 %v1886_v59 }
 0x5d1   :  { %v6074_v20 = vsub.f32 %v1827_v60, %v1867_v8  ;;  %v6076_v55 = vsub.f32 %v1846_v13, %v1867_v8 }
 0x5d3   :  { %v1880_v29 = vmul.f32 %v6074_v20, %v6074_v20  ;;  %v1881_v3 = vmul.f32 %v6076_v55, %v6076_v55 }
 0x5d5   :  { %v1889_v40 = vadd.f32 %v1881_v3, %v1880_v29 }
 0x5d6   :  { %v1862_v34 = vpop.xlane.xlu0 %1861 }
 0x5d7   :  { %v1868_v12 = vmul.f32 %v1862_v34, %v8161_v46  ;;  %1890 = vadd.xlane.f32.xlu0 %v1889_v40 }
 0x5d9   :  { %v6083_v18 = vsub.f32 %v1830_v45, %v1868_v12  ;;  %v6085_v57 = vsub.f32 %v1849_v53, %v1868_v12 }
 0x5db   :  { %v1882_v60 = vmul.f32 %v6083_v18, %v6083_v18  ;;  %v1883_v13 = vmul.f32 %v6085_v57, %v6085_v57 }
 0x5dd   :  { %v1892_v42 = vadd.f32 %v1883_v13, %v1882_v60 }
 0x5de   :  { %v1865_v23 = vpop.xlane.xlu2 %1864 }
 0x5df   :  { %v1869_v16 = vmul.f32 %v1865_v23, %v8161_v46  ;;  %1893 = vadd.xlane.f32.xlu2 %v1892_v42 }
 0x5e1   :  { %v6092_v35 = vsub.f32 %v1832_v36, %v1869_v16  ;;  %v6094_v28 = vsub.f32 %v1851_v56, %v1869_v16 }
 0x5e3   :  { %v1884_v45 = vmul.f32 %v6092_v35, %v6092_v35  ;;  %v1885_v53 = vmul.f32 %v6094_v28, %v6094_v28 }
 0x5e5   :  { %v1895_v32 = vadd.f32 %v1885_v53, %v1884_v45 }
 0x5e6   :  { %v2043_v11 = vpop.xlane.xlu0 %2042 }
 0x5e7   :  { %v2065_v15 = vmul.f32 %v2043_v11, %v8161_v46  ;;  %1896 = vadd.xlane.f32.xlu1 %v1895_v32 }
 0x5e9   :  { %v6102_v59 = vsub.f32 %v6016_v33, %v2065_v15  ;;  %v6105_v44 = vsub.f32 %v6018_v49, %v2065_v15 }
 0x5eb   :  { %v2089_v36 = vmul.f32 %v6102_v59, %v6102_v59  ;;  %v2090_v56 = vmul.f32 %v6105_v44, %v6105_v44 }
 0x5ed   :  { %v2105_v8 = vadd.f32 %v2090_v56, %v2089_v36 }
 0x5ee   :  { %v2046_v29 = vpop.xlane.xlu2 %2045 }
 0x5ef   :  { %v2066_v3 = vmul.f32 %v2046_v29, %v8161_v46  ;;  %2106 = vadd.xlane.f32.xlu1 %v2105_v8 }
 0x5f1   :  { %v6113_v40 = vsub.f32 %v6022_v41, %v2066_v3  ;;  %v6116_v33 = vsub.f32 %v6024_v6, %v2066_v3 }
 0x5f3   :  { %v2091_v49 = vmul.f32 %v6113_v40, %v6113_v40  ;;  %v2092_v34 = vmul.f32 %v6116_v33, %v6116_v33 }
 0x5f5   :  { %v2108_v12 = vadd.f32 %v2092_v34, %v2091_v49 }
 0x5f6   :  { %v2049_v60 = vpop.xlane.xlu2 %2048 }
 0x5f7   :  { %v2067_v13 = vmul.f32 %v2049_v60, %v8161_v46  ;;  %2109 = vadd.xlane.f32.xlu0 %v2108_v12 }
 0x5f9   :  { %v6124_v42 = vsub.f32 %v6028_v58, %v2067_v13  ;;  %v6127_v41 = vsub.f32 %v6030_v25, %v2067_v13 }
 0x5fb   :  { %v2093_v6 = vmul.f32 %v6124_v42, %v6124_v42  ;;  %v2094_v23 = vmul.f32 %v6127_v41, %v6127_v41 }
 0x5fd   :  { %v2111_v16 = vadd.f32 %v2094_v23, %v2093_v6 }
 0x5fe   :  { %v2052_v45 = vpop.xlane.xlu1 %2051 }
 0x5ff   :  { %v2068_v53 = vmul.f32 %v2052_v45, %v8161_v46  ;;  %2112 = vadd.xlane.f32.xlu0 %v2111_v16 }
 0x601   :  { %v6135_v32 = vsub.f32 %v6034_v7, %v2068_v53  ;;  %v6138_v58 = vsub.f32 %v6036_v61, %v2068_v53 }
 0x603   :  { %v2095_v25 = vmul.f32 %v6135_v32, %v6135_v32  ;;  %v2096_v11 = vmul.f32 %v6138_v58, %v6138_v58 }
 0x605   :  { %v2114_v15 = vadd.f32 %v2096_v11, %v2095_v25 }
 0x606   :  { %v2055_v36 = vpop.xlane.xlu1 %2054 }
 0x607   :  { %v2069_v56 = vmul.f32 %v2055_v36, %v8161_v46  ;;  %2115 = vadd.xlane.f32.xlu2 %v2114_v15 }
 0x609   :  { %v6146_v8 = vsub.f32 %v6040_v27, %v2069_v56  ;;  %v6149_v7 = vsub.f32 %v6042_v52, %v2069_v56 }
 0x60b   :  { %v2097_v61 = vmul.f32 %v6146_v8, %v6146_v8  ;;  %v2098_v29 = vmul.f32 %v6149_v7, %v6149_v7 }
 0x60d   :  { %v2117_v3 = vadd.f32 %v2098_v29, %v2097_v61 }
 0x60e   :  { %v2058_v49 = vpop.xlane.xlu0 %2057 }
 0x60f   :  { %v2070_v34 = vmul.f32 %v2058_v49, %v8161_v46  ;;  %2118 = vadd.xlane.f32.xlu2 %v2117_v3 }
 0x611   :  { %v6157_v12 = vsub.f32 %v6046_v22, %v2070_v34  ;;  %v6160_v27 = vsub.f32 %v6048_v39, %v2070_v34 }
 0x613   :  { %v2099_v52 = vmul.f32 %v6157_v12, %v6157_v12  ;;  %v2100_v60 = vmul.f32 %v6160_v27, %v6160_v27 }
 0x615   :  { %v2120_v13 = vadd.f32 %v2100_v60, %v2099_v52 }
 0x616   :  { %v2061_v6 = vpop.xlane.xlu0 %2060 }
 0x617   :  { %v2071_v23 = vmul.f32 %v2061_v6, %v8161_v46  ;;  %2121 = vadd.xlane.f32.xlu1 %v2120_v13 }
 0x619   :  { %v6168_v16 = vsub.f32 %v6052_v51, %v2071_v23  ;;  %v6171_v22 = vsub.f32 %v6054_v10, %v2071_v23 }
 0x61b   :  { %v2101_v39 = vmul.f32 %v6168_v16, %v6168_v16  ;;  %v2102_v45 = vmul.f32 %v6171_v22, %v6171_v22 }
 0x61d   :  { %v2123_v53 = vadd.f32 %v2102_v45, %v2101_v39 }
 0x61e   :  { %v2064_v25 = vpop.xlane.xlu2 %2063 }
 0x61f   :  { %v2072_v11 = vmul.f32 %v2064_v25, %v8161_v46  ;;  %2124 = vadd.xlane.f32.xlu1 %v2123_v53 }
 0x621   :  { %v6179_v15 = vsub.f32 %v6058_v38, %v2072_v11  ;;  %v6182_v51 = vsub.f32 %v6060_v4, %v2072_v11 }
 0x623   :  { %8169 = vst [vmem:[#allocation130_spill] sm:$0xff] %v6179_v15  ;;  %v2103_v10 = vmul.f32 %v6179_v15, %v6179_v15  ;;  %v2104_v36 = vmul.f32 %v6182_v51, %v6182_v51 }
 0x624   :  { %8170 = vst [vmem:[#allocation133_spill] sm:$0xff] %v6182_v51 }
 0x625   :  { %v2126_v56 = vadd.f32 %v2104_v36, %v2103_v10 }
 0x627   :  { %2127 = vadd.xlane.f32.xlu0 %v2126_v56 }
 0x642   :  { %v1888_v61 = vpop.xlane.xlu1 %1887 }
 0x643   :  { %v1898_v29 = vmul.f32 %v1888_v61, %v8161_v46 }
 0x645   :  { %v1902_v3 = vadd.f32 1e-05, %v1898_v29 }
 0x647   :  { %3658 = vrsqrt.f32 %v1902_v3  ;;  %vm1912_vm3 = vweird.f32 %v1902_v3 }
 0x64a   :  { %v1891_v49 = vpop.xlane.xlu0 %1890 }
 0x64b   :  { %v1899_v38 = vmul.f32 %v1891_v49, %v8161_v46 }
 0x64d   :  { %v3659_v34 = vpop.eup %3658  ;;  %v1903_v52 = vadd.f32 1e-05, %v1899_v38  ;;  %v3718_v38 = vld [vmem:[%s7504_s0] sm:$0xff] }
 0x64e   :  { %v1907_v4 = vmul.f32 %v3659_v34, %v1902_v3  ;;  %vm1913_vm0 = vweird.f32 %v3659_v34  ;;  %v3719_v3 = vld [vmem:[%s7504_s0 + $0x8] sm:$0xff] }
 0x64f   :  { %3660 = vrsqrt.f32 %v1903_v52  ;;  %vm1914_vm12 = vmor %vm1912_vm3, %vm1913_vm0  ;;  %vm1922_vm1 = vweird.f32 %v1903_v52 }
 0x650   :  { %v1908_v60 = vmul.f32 %v3659_v34, %v1907_v4 }
 0x652   :  { %v1909_v13 = vmul.f32 0.5, %v1908_v60  ;;  %v1894_v6 = vpop.xlane.xlu2 %1893 }
 0x653   :  { %v1900_v23 = vmul.f32 %v1894_v6, %v8161_v46 }
 0x654   :  { %v1910_v39 = vsub.f32 1.5, %v1909_v13 }
 0x655   :  { %v3661_v45 = vpop.eup %3660  ;;  %v1904_v53 = vadd.f32 1e-05, %v1900_v23 }
 0x656   :  { %v1911_v25 = vmul.f32 %v3659_v34, %v1910_v39  ;;  %v1917_v11 = vmul.f32 %v3661_v45, %v1903_v52  ;;  %vm1923_vm13 = vweird.f32 %v3661_v45  ;;  %v3721_v52 = vld [vmem:[%s7504_s0 + $0x18] sm:$0xff] }
 0x657   :  { %3662 = vrsqrt.f32 %v1904_v53  ;;  %vm1924_vm14 = vmor %vm1922_vm1, %vm1923_vm13  ;;  %vm1932_vm7 = vweird.f32 %v1904_v53 }
 0x658   :  { %v1915_v10 = vsel %vm1914_vm12, %v3659_v34, %v1911_v25  ;;  %v1918_v36 = vmul.f32 %v3661_v45, %v1917_v11 }
 0x659   :  { %v1946_v56 = vmul.f32 %v1915_v10, %v6065_v43  ;;  %v1947_v61 = vmul.f32 %v1915_v10, %v6067_v1 }
 0x65a   :  { %v1919_v29 = vmul.f32 0.5, %v1918_v36  ;;  %v1897_v49 = vpop.xlane.xlu1 %1896 }
 0x65b   :  { %v1954_v4 = vadd.f32 %v3718_v38, %v1946_v56  ;;  %v1955_v60 = vadd.f32 %v3719_v3, %v1947_v61  ;;  %v1901_v13 = vmul.f32 %v1897_v49, %v8161_v46  ;;  %v3720_v61 = vld [vmem:[%s7504_s0 + $0x10] sm:$0xff] }
 0x65c   :  { %v1920_v34 = vsub.f32 1.5, %v1919_v29 }
 0x65d   :  { %v3663_v6 = vpop.eup %3662  ;;  %1962 = vst [vmem:[%s7507_s4] sm:$0xff] %v1954_v4  ;;  %v1905_v43 = vadd.f32 1e-05, %v1901_v13 }
 0x65e   :  { %1963 = vst [vmem:[%s7507_s4 + $0x8] sm:$0xff] %v1955_v60  ;;  %v1921_v1 = vmul.f32 %v3661_v45, %v1920_v34  ;;  %v1927_v23 = vmul.f32 %v3663_v6, %v1904_v53  ;;  %vm1933_vm15 = vweird.f32 %v3663_v6  ;;  %v3723_v53 = vld [vmem:[%s7504_s0 + $0x28] sm:$0xff] }
 0x65f   :  { %3664 = vrsqrt.f32 %v1905_v43  ;;  %vm1934_vm2 = vmor %vm1932_vm7, %vm1933_vm15  ;;  %vm1942_vm8 = vweird.f32 %v1905_v43 }
 0x660   :  { %v1925_v39 = vsel %vm1924_vm14, %v3661_v45, %v1921_v1  ;;  %v1928_v25 = vmul.f32 %v3663_v6, %v1927_v23 }
 0x661   :  { %v1948_v11 = vmul.f32 %v1925_v39, %v6074_v20  ;;  %v1949_v10 = vmul.f32 %v1925_v39, %v6076_v55 }
 0x662   :  { %v1929_v36 = vmul.f32 0.5, %v1928_v25  ;;  %v2107_v56 = vpop.xlane.xlu1 %2106  ;;  %v3722_v25 = vld [vmem:[%s7504_s0 + $0x20] sm:$0xff] }
 0x663   :  { %v1956_v29 = vadd.f32 %v3720_v61, %v1948_v11  ;;  %v1957_v49 = vadd.f32 %v3721_v52, %v1949_v10  ;;  %v2129_v38 = vmul.f32 %v2107_v56, %v8161_v46 }
 0x664   :  { %v1930_v45 = vsub.f32 1.5, %v1929_v36 }
 0x665   :  { %v3665_v4 = vpop.eup %3664  ;;  %1964 = vst [vmem:[%s7507_s4 + $0x10] sm:$0xff] %v1956_v29  ;;  %v2137_v20 = vadd.f32 1e-05, %v2129_v38 }
 0x666   :  { %1965 = vst [vmem:[%s7507_s4 + $0x18] sm:$0xff] %v1957_v49  ;;  %v1931_v55 = vmul.f32 %v3663_v6, %v1930_v45  ;;  %v1937_v3 = vmul.f32 %v3665_v4, %v1905_v43  ;;  %vm1943_vm10 = vweird.f32 %v3665_v4 }
 0x667   :  { %3666 = vrsqrt.f32 %v2137_v20  ;;  %vm1944_vm0 = vmor %vm1942_vm8, %vm1943_vm10  ;;  %vm2151_vm12 = vweird.f32 %v2137_v20 }
 0x668   :  { %v1935_v60 = vsel %vm1934_vm2, %v3663_v6, %v1931_v55  ;;  %v1938_v13 = vmul.f32 %v3665_v4, %v1937_v3  ;;  %v3724_v55 = vld [vmem:[%s7504_s0 + $0x30] sm:$0xff] }
 0x669   :  { %v1950_v34 = vmul.f32 %v1935_v60, %v6083_v18  ;;  %v1951_v1 = vmul.f32 %v1935_v60, %v6085_v57  ;;  %v3725_v60 = vld [vmem:[%s7504_s0 + $0x38] sm:$0xff] }
 0x66a   :  { %v1939_v23 = vmul.f32 0.5, %v1938_v13  ;;  %v2110_v39 = vpop.xlane.xlu0 %2109 }
 0x66b   :  { %v1958_v11 = vadd.f32 %v3722_v25, %v1950_v34  ;;  %v1959_v10 = vadd.f32 %v3723_v53, %v1951_v1  ;;  %v2130_v18 = vmul.f32 %v2110_v39, %v8161_v46 }
 0x66c   :  { %v1940_v36 = vsub.f32 1.5, %v1939_v23 }
 0x66d   :  { %v3667_v6 = vpop.eup %3666  ;;  %1966 = vst [vmem:[%s7507_s4 + $0x20] sm:$0xff] %v1958_v11  ;;  %v2138_v38 = vadd.f32 1e-05, %v2130_v18 }
 0x66e   :  { %1967 = vst [vmem:[%s7507_s4 + $0x28] sm:$0xff] %v1959_v10  ;;  %v1941_v57 = vmul.f32 %v3665_v4, %v1940_v36  ;;  %v2146_v56 = vmul.f32 %v3667_v6, %v2137_v20  ;;  %vm2152_vm3 = vweird.f32 %v3667_v6 }
 0x66f   :  { %3668 = vrsqrt.f32 %v2138_v38  ;;  %vm2153_vm13 = vmor %vm2151_vm12, %vm2152_vm3  ;;  %vm2161_vm7 = vweird.f32 %v2138_v38 }
 0x670   :  { %v1945_v61 = vsel %vm1944_vm0, %v3665_v4, %v1941_v57  ;;  %v2147_v29 = vmul.f32 %v3667_v6, %v2146_v56 }
 0x671   :  { %v1952_v52 = vmul.f32 %v1945_v61, %v6092_v35  ;;  %v1953_v49 = vmul.f32 %v1945_v61, %v6094_v28 }
 0x672   :  { %v2148_v45 = vmul.f32 0.5, %v2147_v29  ;;  %v2113_v10 = vpop.xlane.xlu0 %2112 }
 0x673   :  { %v1960_v3 = vadd.f32 %v3724_v55, %v1952_v52  ;;  %v1961_v43 = vadd.f32 %v3725_v60, %v1953_v49  ;;  %v2131_v36 = vmul.f32 %v2113_v10, %v8161_v46 }
 0x674   :  { %v2149_v13 = vsub.f32 1.5, %v2148_v45 }
 0x675   :  { %1968 = vst [vmem:[%s7507_s4 + $0x30] sm:$0xff] %v1960_v3  ;;  %v3669_v1 = vpop.eup %3668  ;;  %v2139_v18 = vadd.f32 1e-05, %v2131_v36 }
 0x676   :  { %1969 = vst [vmem:[%s7507_s4 + $0x38] sm:$0xff] %v1961_v43  ;;  %v2150_v35 = vmul.f32 %v3667_v6, %v2149_v13  ;;  %v2156_v53 = vmul.f32 %v3669_v1, %v2138_v38  ;;  %vm2162_vm15 = vweird.f32 %v3669_v1 }
 0x677   :  { %vm2163_vm2 = vmor %vm2161_vm7, %vm2162_vm15  ;;  %3670 = vrsqrt.f32 %v2139_v18  ;;  %vm2171_vm3 = vweird.f32 %v2139_v18 }
 0x678   :  { %v2154_v28 = vsel %vm2153_vm13, %v3667_v6, %v2150_v35 }
 0x679   :  { %v2225_v4 = vmul.f32 %v2154_v28, %v6102_v59  ;;  %v2226_v34 = vmul.f32 %v2154_v28, %v6105_v44  ;;  %v2157_v59 = vmul.f32 %v3669_v1, %v2156_v53 }
 0x67a   :  { %v2116_v13 = vpop.xlane.xlu2 %2115 }
 0x67b   :  { %vm2241_vm1 = vcmp.ge.f32.partialorder %v2225_v4, 0.0  ;;  %vm2242_vm14 = vcmp.ge.f32.partialorder %v2226_v34, 0.0  ;;  %v2257_v23 = vmul.f32 0.2, %v2225_v4  ;;  %v2258_v39 = vmul.f32 0.2, %v2226_v34 }
 0x67c   :  { %v2158_v44 = vmul.f32 0.5, %v2157_v59  ;;  %v2132_v28 = vmul.f32 %v2116_v13, %v8161_v46 }
 0x67d   :  { %v6252_v25 = vsel %vm2241_vm1, %v2225_v4, %v2257_v23  ;;  %v6254_v11 = vsel %vm2242_vm14, %v2226_v34, %v2258_v39  ;;  %v3671_v29 = vpop.eup %3670 }
 0x67e   :  { %8171 = vst [vmem:[#allocation131_spill] sm:$0xff] %v6252_v25  ;;  %2305 = vrot.lane.b32.xlu2 %v6254_v11, %s3746_s30  ;;  %2369 = vrot.lane.b32.xlu1 %v6252_v25, %s3745_s29  ;;  %v2159_v20 = vsub.f32 1.5, %v2158_v44  ;;  %v2166_v38 = vmul.f32 %v3671_v29, %v2139_v18  ;;  %vm2172_vm0 = vweird.f32 %v3671_v29  ;;  %v2140_v34 = vadd.f32 1e-05, %v2132_v28 }
 0x67f   :  { %2289 = vrot.lane.b32.xlu0 %v6252_v25, %s3746_s30  ;;  %vm2173_vm12 = vmor %vm2171_vm3, %vm2172_vm0 }
 0x680   :  { %v2160_v6 = vmul.f32 %v3669_v1, %v2159_v20  ;;  %v2167_v45 = vmul.f32 %v3671_v29, %v2166_v38  ;;  %3672 = vrsqrt.f32 %v2140_v34  ;;  %vm2181_vm15 = vweird.f32 %v2140_v34 }
 0x682   :  { %v2164_v57 = vsel %vm2163_vm2, %v3669_v1, %v2160_v6  ;;  %v2168_v3 = vmul.f32 0.5, %v2167_v45  ;;  %v2119_v20 = vpop.xlane.xlu2 %2118 }
 0x683   :  { %v2228_v56 = vmul.f32 %v2164_v57, %v6116_v33  ;;  %v2227_v52 = vmul.f32 %v2164_v57, %v6113_v40  ;;  %v2133_v36 = vmul.f32 %v2119_v20, %v8161_v46 }
 0x684   :  { %v2169_v40 = vsub.f32 1.5, %v2168_v3 }
 0x685   :  { %v2260_v61 = vmul.f32 0.2, %v2228_v56  ;;  %vm2244_vm10 = vcmp.ge.f32.partialorder %v2228_v56, 0.0  ;;  %v2259_v33 = vmul.f32 0.2, %v2227_v52  ;;  %vm2243_vm8 = vcmp.ge.f32.partialorder %v2227_v52, 0.0 }
 0x686   :  { %2449 = vrot.lane.b32.xlu2 %v6252_v25, %s3748_s6  ;;  %2465 = vrot.lane.b32.xlu1 %v6254_v11, %s3748_s6  ;;  %v2170_v60 = vmul.f32 %v3671_v29, %v2169_v40  ;;  %v3673_v39 = vpop.eup %3672  ;;  %v2141_v18 = vadd.f32 1e-05, %v2133_v36 }
 0x687   :  { %2385 = vrot.lane.b32.xlu0 %v6254_v11, %s3745_s29  ;;  %v6283_v49 = vsel %vm2244_vm10, %v2228_v56, %v2260_v61  ;;  %v6291_v55 = vsel %vm2243_vm8, %v2227_v52, %v2259_v33  ;;  %v2176_v59 = vmul.f32 %v3673_v39, %v2140_v34  ;;  %vm2182_vm14 = vweird.f32 %v3673_v39 }
 0x688   :  { %8172 = vst [vmem:[#allocation135_spill] sm:$0xff] %v6283_v49  ;;  %v2174_v43 = vsel %vm2173_vm12, %v3671_v29, %v2170_v60  ;;  %vm2183_vm7 = vmor %vm2181_vm15, %vm2182_vm14  ;;  %3674 = vrsqrt.f32 %v2141_v18  ;;  %vm2191_vm0 = vweird.f32 %v2141_v18  ;;  %vm8180_vm15 = vcmp.lt.s32.totalorder %v4681_v47, 17 }
 0x689   :  { %8173 = vst [vmem:[#allocation129_spill] sm:$0xff] %v6291_v55  ;;  %v2229_v35 = vmul.f32 %v2174_v43, %v6124_v42  ;;  %v2230_v23 = vmul.f32 %v2174_v43, %v6127_v41  ;;  %v2177_v41 = vmul.f32 %v3673_v39, %v2176_v59 }
 0x68a   :  { %v2122_v52 = vpop.xlane.xlu1 %2121 }
 0x68b   :  { %v2261_v4 = vmul.f32 0.2, %v2229_v35  ;;  %vm2245_vm13 = vcmp.ge.f32.partialorder %v2229_v35, 0.0  ;;  %v2262_v42 = vmul.f32 0.2, %v2230_v23  ;;  %vm2246_vm1 = vcmp.ge.f32.partialorder %v2230_v23, 0.0 }
 0x68c   :  { %v2178_v44 = vmul.f32 0.5, %v2177_v41 }
 0x68d   :  { %v6313_v1 = vsel %vm2245_vm13, %v2229_v35, %v2261_v4  ;;  %v6322_v53 = vsel %vm2246_vm1, %v2230_v23, %v2262_v42  ;;  %vm8178_vm1 = vcmp.lt.s32.totalorder %v4681_v47, 127 }
 0x68e   :  { %2545 = vrot.lane.b32.xlu2 %v6254_v11, %s3747_s5  ;;  %2625 = vrot.lane.b32.xlu1 %v6252_v25, %s3749_s7  ;;  %v2179_v10 = vsub.f32 1.5, %v2178_v44  ;;  %v3675_v45 = vpop.eup %3674  ;;  %vm8179_vm14 = vmmov %vm8178_vm1 }
 0x68f   :  { %2529 = vrot.lane.b32.xlu0 %v6252_v25, %s3747_s5  ;;  %vm2192_vm8 = vweird.f32 %v3675_v45 }
 0x690   :  { %v2180_v6 = vmul.f32 %v3673_v39, %v2179_v10  ;;  %vm2193_vm3 = vmor %vm2191_vm0, %vm2192_vm8  ;;  %v2134_v10 = vmul.f32 %v2122_v52, %v8161_v46 }
 0x692   :  { %v2184_v56 = vsel %vm2183_vm7, %v3673_v39, %v2180_v6  ;;  %v6363_v60 = vpop.xlane.xlu1 %2124  ;;  %vm8181_vm7 = vmmov %vm8180_vm15 }
 0x693   :  { %v2232_v61 = vmul.f32 %v2184_v56, %v6138_v58  ;;  %v2231_v29 = vmul.f32 %v2184_v56, %v6135_v32  ;;  %v2186_v58 = vmul.f32 %v3675_v45, %v2141_v18  ;;  %v6393_v18 = vadd.f32 1e-05, %v2134_v10  ;;  %vm8190_vm8 = vmmov %vm8181_vm7 }
 0x694   :  { %vm8191_vm0 = vmmov %vm8181_vm7 }
 0x695   :  { %v2264_v33 = vmul.f32 0.2, %v2232_v61  ;;  %vm2248_vm2 = vcmp.ge.f32.partialorder %v2232_v61, 0.0  ;;  %v2263_v3 = vmul.f32 0.2, %v2231_v29  ;;  %vm2247_vm10 = vcmp.ge.f32.partialorder %v2231_v29, 0.0 }
 0x696   :  { %2705 = vrot.lane.b32.xlu2 %v6252_v25, %s3750_s8  ;;  %2721 = vrot.lane.b32.xlu1 %v6254_v11, %s3750_s8  ;;  %v2187_v13 = vmul.f32 %v3675_v45, %v2186_v58  ;;  %3676 = vrsqrt.f32 %v6393_v18 }
 0x697   :  { %2641 = vrot.lane.b32.xlu0 %v6254_v11, %s3749_s7  ;;  %v6353_v40 = vsel %vm2248_vm2, %v2232_v61, %v2264_v33  ;;  %v6355_v32 = vsel %vm2247_vm10, %v2231_v29, %v2263_v3  ;;  %vm8186_vm2 = vcmp.lt.s32.totalorder %v4681_v47, 112 }
 0x698   :  { %8174 = vst [vmem:[#allocation128_spill] sm:$0xff] %v6353_v40  ;;  %v2188_v28 = vmul.f32 0.5, %v2187_v13  ;;  %vm8187_vm10 = vmmov %vm8186_vm2 }
 0x699   :  { %8175 = vst [vmem:[#allocation123_spill] sm:$0xff] %v6355_v32 }
 0x69a   :  { %v6365_v35 = vpop.xlane.xlu0 %2127  ;;  %v2189_v23 = vsub.f32 1.5, %v2188_v28 }
 0x69c   :  { %v2190_v39 = vmul.f32 %v3675_v45, %v2189_v23 }
 0x69e   :  { %2801 = vrot.lane.b32.xlu2 %v6254_v11, %s3751_s9  ;;  %2387 = vrot.lane.b32.xlu1 %v6283_v49, %s3745_s29  ;;  %v2194_v44 = vsel %vm2193_vm3, %v3675_v45, %v2190_v39  ;;  %v8176_v39 = vld [vmem:[#allocation19_spill] sm:$0xff] }
 0x69f   :  { %2785 = vrot.lane.b32.xlu0 %v6252_v25, %s3751_s9  ;;  %v2233_v36 = vmul.f32 %v2194_v44, %v6146_v8  ;;  %v2234_v28 = vmul.f32 %v2194_v44, %v6149_v7 }
 0x6a1   :  { %v2265_v61 = vmul.f32 0.2, %v2233_v36  ;;  %vm2249_vm12 = vcmp.ge.f32.partialorder %v2233_v36, 0.0  ;;  %vm2250_vm13 = vcmp.ge.f32.partialorder %v2234_v28, 0.0 }
 0x6a3   :  { %v6409_v23 = vsel %vm2249_vm12, %v2233_v36, %v2265_v61  ;;  %v6423_v36 = vpop.eup %3676  ;;  %v2266_v61 = vmul.f32 0.2, %v2234_v28  ;;  %vm2201_vm12 = vweird.f32 %v6393_v18 }
 0x6a4   :  { %vm2202_vm3 = vweird.f32 %v6423_v36 }
 0x6a6   :  { %2531 = vrot.lane.b32.xlu1 %v6291_v55, %s3747_s5  ;;  %2291 = vrot.lane.b32.xlu2 %v6291_v55, %s3746_s30 }
 0x6a7   :  { %2307 = vrot.lane.b32.xlu0 %v6283_v49, %s3746_s30 }
 0x6ae   :  { %2643 = vrot.lane.b32.xlu1 %v6283_v49, %s3749_s7  ;;  %2371 = vrot.lane.b32.xlu2 %v6291_v55, %s3745_s29 }
 0x6af   :  { %2451 = vrot.lane.b32.xlu0 %v6291_v55, %s3748_s6 }
 0x6b6   :  { %2787 = vrot.lane.b32.xlu1 %v6291_v55, %s3751_s9  ;;  %2467 = vrot.lane.b32.xlu2 %v6283_v49, %s3748_s6 }
 0x6b7   :  { %2547 = vrot.lane.b32.xlu0 %v6283_v49, %s3747_s5 }
 0x6be   :  { %2627 = vrot.lane.b32.xlu2 %v6291_v55, %s3749_s7  ;;  %2293 = vrot.lane.b32.xlu1 %v6313_v1, %s3746_s30 }
 0x6bf   :  { %2707 = vrot.lane.b32.xlu0 %v6291_v55, %s3750_s8 }
 0x6c6   :  { %2723 = vrot.lane.b32.xlu2 %v6283_v49, %s3750_s8  ;;  %2373 = vrot.lane.b32.xlu1 %v6313_v1, %s3745_s29 }
 0x6c7   :  { %2389 = vrot.lane.b32.xlu0 %v6322_v53, %s3745_s29 }
 0x6ce   :  { %2309 = vrot.lane.b32.xlu2 %v6322_v53, %s3746_s30  ;;  %2469 = vrot.lane.b32.xlu1 %v6322_v53, %s3748_s6 }
 0x6cf   :  { %2533 = vrot.lane.b32.xlu0 %v6313_v1, %s3747_s5 }
 0x6d6   :  { %2453 = vrot.lane.b32.xlu2 %v6313_v1, %s3748_s6  ;;  %2629 = vrot.lane.b32.xlu1 %v6313_v1, %s3749_s7 }
 0x6d7   :  { %2645 = vrot.lane.b32.xlu0 %v6322_v53, %s3749_s7 }
 0x6d8   :  { %v6343_v57 = vpop.permute.xlu2 %2305 }
 0x6de   :  { %2549 = vrot.lane.b32.xlu2 %v6322_v53, %s3747_s5  ;;  %2725 = vrot.lane.b32.xlu1 %v6322_v53, %s3750_s8 }
 0x6df   :  { %2789 = vrot.lane.b32.xlu0 %v6313_v1, %s3751_s9 }
 0x6e0   :  { %v2450_v38 = vpop.permute.xlu2 %2449 }
 0x6e6   :  { %2709 = vrot.lane.b32.xlu2 %v6313_v1, %s3750_s8  ;;  %2391 = vrot.lane.b32.xlu1 %v6353_v40, %s3745_s29 }
 0x6e7   :  { %2295 = vrot.lane.b32.xlu0 %v6355_v32, %s3746_s30 }
 0x6e8   :  { %v2546_v43 = vpop.permute.xlu2 %2545 }
 0x6ee   :  { %2805 = vrot.lane.b32.xlu2 %v6322_v53, %s3751_s9  ;;  %2535 = vrot.lane.b32.xlu1 %v6355_v32, %s3747_s5 }
 0x6ef   :  { %2311 = vrot.lane.b32.xlu0 %v6353_v40, %s3746_s30 }
 0x6f0   :  { %v6373_v4 = vpop.permute.xlu1 %2369  ;;  %v2706_v34 = vpop.permute.xlu2 %2705 }
 0x6f1   :  { %v2290_v42 = vpop.permute.xlu0 %2289 }
 0x6f6   :  { %2647 = vrot.lane.b32.xlu1 %v6353_v40, %s3749_s7  ;;  %2375 = vrot.lane.b32.xlu2 %v6355_v32, %s3745_s29 }
 0x6f7   :  { %2455 = vrot.lane.b32.xlu0 %v6355_v32, %s3748_s6 }
 0x6f8   :  { %v2466_v59 = vpop.permute.xlu1 %2465  ;;  %v6381_v41 = vpop.permute.xlu2 %2801 }
 0x6f9   :  { %v2386_v20 = vpop.permute.xlu0 %2385  ;;  %v2481_v6 = vsel %vm721_vm6, %v2450_v38, %v2466_v59  ;;  %v2489_v56 = vsel %vm721_vm6, %v2466_v59, %v2450_v38 }
 0x6fa   :  { %v2497_v52 = vmul.f32 %v2489_v56, %v8097_v54  ;;  %v2498_v38 = vmul.f32 %v4726_v31, %v2481_v6  ;;  %v8177_v6 = vld [vmem:[#allocation27_spill] sm:$0xff] }
 0x6fc   :  { %v2513_v59 = vmul.f32 %v2497_v52, %v8176_v39  ;;  %v2514_v10 = vmul.f32 %v2498_v38, %v8176_v39  ;;  %v2409_v52 = vsel %vm608_vm4, %v2386_v20, %v6373_v4  ;;  %v2196_v39 = vmul.f32 %v6423_v36, %v6393_v18 }
 0x6fe   :  { %2791 = vrot.lane.b32.xlu1 %v6355_v32, %s3751_s9  ;;  %2471 = vrot.lane.b32.xlu2 %v6353_v40, %s3748_s6 }
 0x6ff   :  { %2551 = vrot.lane.b32.xlu0 %v6353_v40, %s3747_s5 }
 0x700   :  { %v2626_v29 = vpop.permute.xlu1 %2625  ;;  %v6397_v8 = vpop.permute.xlu2 %2291 }
 0x701   :  { %v2530_v33 = vpop.permute.xlu0 %2529 }
 0x702   :  { %v2561_v45 = vsel %vm834_vm5, %v2530_v33, %v2546_v43  ;;  %v2569_v3 = vsel %vm834_vm5, %v2546_v43, %v2530_v33 }
 0x703   :  { %v2577_v58 = vmul.f32 %v8067_v5, %v2569_v3  ;;  %v2578_v13 = vmul.f32 %v8099_v30, %v2561_v45 }
 0x705   :  { %v2593_v56 = vmul.f32 %v2577_v58, %v8177_v6  ;;  %v2594_v21 = vmul.f32 %v2578_v13, %v8177_v6  ;;  %v2329_v13 = vsel %vm8180_vm15, %v6343_v57, %v2290_v42 }
 0x706   :  { %2631 = vrot.lane.b32.xlu2 %v6355_v32, %s3749_s7  ;;  %2377 = vrot.lane.b32.xlu1 %v6409_v23, %s3745_s29 }
 0x707   :  { %v2961_v43 = vadd.f32 %v2593_v56, %v2513_v59  ;;  %v6419_v33 = vadd.f32 %v2594_v21, %v2514_v10  ;;  %2711 = vrot.lane.b32.xlu0 %v6355_v32, %s3750_s8  ;;  %v2417_v59 = vmul.f32 %v8100_v2, %v2409_v52  ;;  %v6442_v10 = vsel %vm2250_vm13, %v2234_v28, %v2266_v61  ;;  %v8182_v61 = vld [vmem:[#allocation14_spill] sm:$0xff]  ;;  %vm2203_vm13 = vmor %vm2201_vm12, %vm2202_vm3 }
 0x708   :  { %v2722_v7 = vpop.permute.xlu1 %2721  ;;  %v2372_v44 = vpop.permute.xlu2 %2371  ;;  %v2337_v56 = vmul.f32 %v2329_v13, %v8101_v19 }
 0x709   :  { %v2737_v38 = vsel %vm1108_vm9, %v2706_v34, %v2722_v7  ;;  %v2745_v45 = vsel %vm1108_vm9, %v2722_v7, %v2706_v34  ;;  %v2642_v21 = vpop.permute.xlu0 %2641  ;;  %v2321_v34 = vsel %vm8181_vm7, %v2290_v42, %v6343_v57  ;;  %v2197_v57 = vmul.f32 %v6423_v36, %v2196_v39  ;;  %vm8195_vm7 = vmmov %vm8191_vm0 }
 0x70a   :  { %v2657_v3 = vsel %vm8178_vm1, %v2626_v29, %v2642_v21  ;;  %v2665_v58 = vsel %vm8179_vm14, %v2642_v21, %v2626_v29  ;;  %v2401_v29 = vsel %vm608_vm4, %v6373_v4, %v2386_v20  ;;  %v2753_v28 = vmul.f32 %v8067_v5, %v2737_v38  ;;  %v8183_v21 = vld [vmem:[#allocation36_spill] sm:$0xff]  ;;  %v8184_v20 = vld [vmem:[#allocation107_spill] sm:$0xff]  ;;  %vm8193_vm14 = vmmov %vm8178_vm1 }
 0x70b   :  { %v2673_v6 = vmul.f32 %v4707_v9, %v2657_v3  ;;  %v2674_v7 = vmul.f32 %v4726_v31, %v2665_v58  ;;  %v2338_v42 = vmul.f32 %v8099_v30, %v2321_v34  ;;  %v2433_v52 = vmul.f32 %v2417_v59, %v8182_v61  ;;  %v8185_v34 = vld [vmem:[#allocation3_spill] sm:$0xff] }
 0x70c   :  { %v2609_v3 = vmul.f32 %v6252_v25, %v8183_v21  ;;  %v2754_v4 = vmul.f32 %v2745_v45, %v4731_v62  ;;  %v2353_v49 = vmul.f32 %v2337_v56, %v8185_v34  ;;  %v2434_v59 = vmul.f32 %v2401_v29, %v8182_v61 }
 0x70d   :  { %v2689_v38 = vmul.f32 %v2673_v6, %v8184_v20  ;;  %v2769_v6 = vmul.f32 %v2753_v28, %v8139_v14  ;;  %v2690_v0 = vmul.f32 %v2674_v7, %v8184_v20  ;;  %v2198_v51 = vmul.f32 0.5, %v2197_v57 }
 0x70e   :  { %2727 = vrot.lane.b32.xlu2 %v6353_v40, %s3750_s8  ;;  %2473 = vrot.lane.b32.xlu1 %v6442_v10, %s3748_s6  ;;  %v2354_v56 = vmul.f32 %v2338_v42, %v8185_v34  ;;  %v2945_v29 = vadd.f32 %v2433_v52, %v2353_v49  ;;  %v2610_v61 = vmul.f32 %v6254_v11, %v8183_v21 }
 0x70f   :  { %2807 = vrot.lane.b32.xlu0 %v6353_v40, %s3751_s9  ;;  %v2770_v32 = vmul.f32 %v2754_v4, %v8139_v14  ;;  %v2977_v15 = vadd.f32 %v2689_v38, %v2609_v3  ;;  %v2199_v42 = vsub.f32 1.5, %v2198_v51 }
 0x710   :  { %v2388_v13 = vpop.permute.xlu1 %2387  ;;  %v6465_v37 = vpop.permute.xlu2 %2467  ;;  %v2946_v28 = vadd.f32 %v2434_v59, %v2354_v56  ;;  %v2978_v7 = vadd.f32 %v2690_v0, %v2610_v61 }
 0x711   :  { %v2402_v58 = vsel %vm608_vm4, %v2372_v44, %v2388_v13  ;;  %v2410_v39 = vsel %vm608_vm4, %v2388_v13, %v2372_v44  ;;  %v2786_v55 = vpop.permute.xlu0 %2785  ;;  %v8188_v44 = vld [vmem:[#allocation122_spill] sm:$0xff] }
 0x712   :  { %v2817_v25 = vsel %vm8186_vm2, %v2786_v55, %v6381_v41  ;;  %v2825_v45 = vsel %vm8187_vm10, %v6381_v41, %v2786_v55  ;;  %v2419_v21 = vmul.f32 %v8100_v2, %v2410_v39  ;;  %v2436_v39 = vmul.f32 %v2402_v58, %v8158_v26  ;;  %vm8196_vm2 = vmmov %vm8191_vm0 }
 0x713   :  { %v2834_v40 = vmul.f32 %v4709_v17, %v2825_v45  ;;  %v2849_v13 = vmul.f32 %v2817_v25, %v8188_v44  ;;  %v3009_v25 = vadd.f32 %v2961_v43, %v2945_v29 }
 0x714   :  { %v2435_v38 = vmul.f32 %v2419_v21, %v8158_v26 }
 0x715   :  { %v2850_v55 = vmul.f32 %v2834_v40, %v8188_v44  ;;  %v2993_v41 = vadd.f32 %v2849_v13, %v2769_v6  ;;  %v3010_v40 = vadd.f32 %v6419_v33, %v2946_v28  ;;  %v2200_v33 = vmul.f32 %v6423_v36, %v2199_v42 }
 0x716   :  { %2633 = vrot.lane.b32.xlu1 %v6409_v23, %s3749_s7  ;;  %2297 = vrot.lane.b32.xlu2 %v6409_v23, %s3746_s30 }
 0x717   :  { %v2994_v57 = vadd.f32 %v2850_v55, %v2770_v32  ;;  %v3025_v49 = vadd.f32 %v2993_v41, %v2977_v15  ;;  %2393 = vrot.lane.b32.xlu0 %v6442_v10, %s3745_s29  ;;  %v2204_v58 = vsel %vm2203_vm13, %v6423_v36, %v2200_v33 }
 0x718   :  { %v2532_v14 = vpop.permute.xlu1 %2531  ;;  %v2628_v52 = vpop.permute.xlu2 %2627  ;;  %v2235_v29 = vmul.f32 %v2204_v58, %v6157_v12 }
 0x719   :  { %v3026_v3 = vadd.f32 %v2994_v57, %v2978_v7  ;;  %v2308_v4 = vpop.permute.xlu0 %2307  ;;  %v6498_v20 = vadd.f32 %v3025_v49, %v3009_v25  ;;  %v2236_v49 = vmul.f32 %v2204_v58, %v6160_v27 }
 0x71a   :  { %v2322_v0 = vsel %vm8190_vm8, %v6397_v8, %v2308_v4  ;;  %v2330_v15 = vsel %vm8191_vm0, %v2308_v4, %v6397_v8  ;;  %v2267_v36 = vmul.f32 0.2, %v2235_v29  ;;  %vm2251_vm15 = vcmp.ge.f32.partialorder %v2235_v29, 0.0  ;;  %vm8201_vm8 = vmmov %vm8178_vm1 }
 0x71b   :  { %8189 = vst [vmem:[#allocation134_spill] sm:$0xff] %v6498_v20  ;;  %v2339_v51 = vmul.f32 %v2330_v15, %v8101_v19  ;;  %v2340_v32 = vmul.f32 %v8099_v30, %v2322_v0  ;;  %v6508_v43 = vadd.f32 %v3026_v3, %v3010_v40  ;;  %vm2252_vm10 = vcmp.ge.f32.partialorder %v2236_v49, 0.0  ;;  %vm8202_vm0 = vmmov %vm8178_vm1 }
 0x71c   :  { %v6556_v42 = vsel %vm2251_vm15, %v2235_v29, %v2267_v36  ;;  %v8197_v29 = vld [vmem:[#allocation2_spill] sm:$0xff] }
 0x71d   :  { %8192 = vst [vmem:[#allocation126_spill] sm:$0xff] %v6508_v43  ;;  %v2355_v34 = vmul.f32 %v2339_v51, %v8159_v63  ;;  %v2356_v59 = vmul.f32 %v2340_v32, %v8159_v63 }
 0x71e   :  { %2729 = vrot.lane.b32.xlu1 %v6442_v10, %s3750_s8  ;;  %2313 = vrot.lane.b32.xlu2 %v6442_v10, %s3746_s30 }
 0x71f   :  { %v2947_v8 = vadd.f32 %v2435_v38, %v2355_v34  ;;  %v2948_v45 = vadd.f32 %v2436_v39, %v2356_v59  ;;  %2537 = vrot.lane.b32.xlu0 %v6409_v23, %s3747_s5 }
 0x720   :  { %v2644_v6 = vpop.permute.xlu1 %2643  ;;  %v2724_v26 = vpop.permute.xlu2 %2723 }
 0x721   :  { %v6526_v63 = vsel %vm8178_vm1, %v2628_v52, %v2644_v6  ;;  %v6530_v44 = vsel %vm8193_vm14, %v2644_v6, %v2628_v52  ;;  %v2452_v13 = vpop.permute.xlu0 %2451  ;;  %v2135_v52 = vmul.f32 %v6363_v60, %v8161_v46  ;;  %v2268_v60 = vmul.f32 0.2, %v2236_v49 }
 0x722   :  { %v2482_v18 = vsel %vm721_vm6, %v2452_v13, %v6465_v37  ;;  %v2490_v56 = vsel %vm721_vm6, %v6465_v37, %v2452_v13  ;;  %vm8203_vm1 = vcmp.lt.s32.totalorder %v4681_v47, 112 }
 0x723   :  { %v2499_v41 = vmul.f32 %v2490_v56, %v8097_v54  ;;  %v2500_v37 = vmul.f32 %v4726_v31, %v2482_v18  ;;  %v6570_v0 = vadd.f32 1e-05, %v2135_v52  ;;  %v6589_v59 = vsel %vm2252_vm10, %v2236_v49, %v2268_v60  ;;  %vm8204_vm14 = vmmov %vm8203_vm1 }
 0x724   :  { %vm8210_vm10 = vmmov %vm8196_vm2 }
 0x725   :  { %v2515_v40 = vmul.f32 %v2499_v41, %v8157_v50  ;;  %v2516_v21 = vmul.f32 %v2500_v37, %v8157_v50  ;;  %3678 = vrsqrt.f32 %v6570_v0  ;;  %v8198_v41 = vld [vmem:[#allocation9_spill] sm:$0xff]  ;;  %vm2211_vm12 = vweird.f32 %v6570_v0 }
 0x726   :  { %2873 = vrot.lane.b32.xlu1 %v6409_v23, %s3752_s10  ;;  %2457 = vrot.lane.b32.xlu2 %v6409_v23, %s3748_s6 }
 0x727   :  { %2649 = vrot.lane.b32.xlu0 %v6442_v10, %s3749_s7 }
 0x728   :  { %v6545_v61 = vpop.permute.xlu1 %2787  ;;  %v2310_v55 = vpop.permute.xlu2 %2309 }
 0x729   :  { %v2548_v28 = vpop.permute.xlu0 %2547 }
 0x72a   :  { %v2562_v12 = vsel %vm834_vm5, %v2532_v14, %v2548_v28  ;;  %v2570_v25 = vsel %vm834_vm5, %v2548_v28, %v2532_v14 }
 0x72b   :  { %v2579_v7 = vmul.f32 %v8067_v5, %v2570_v25  ;;  %v2580_v57 = vmul.f32 %v8099_v30, %v2562_v12  ;;  %v3679_v13 = vpop.eup %3678 }
 0x72c   :  { %v2206_v28 = vmul.f32 %v3679_v13, %v6570_v0  ;;  %vm2212_vm3 = vweird.f32 %v3679_v13 }
 0x72d   :  { %v2595_v3 = vmul.f32 %v2579_v7, %v8156_v48  ;;  %v2596_v4 = vmul.f32 %v2580_v57, %v8156_v48  ;;  %vm2213_vm13 = vmor %vm2211_vm12, %vm2212_vm3 }
 0x72e   :  { %2299 = vrot.lane.b32.xlu1 %v6556_v42, %s3746_s30  ;;  %2553 = vrot.lane.b32.xlu2 %v6442_v10, %s3747_s5 }
 0x72f   :  { %v2963_v27 = vadd.f32 %v2595_v3, %v2515_v40  ;;  %v2964_v14 = vadd.f32 %v2596_v4, %v2516_v21  ;;  %2793 = vrot.lane.b32.xlu0 %v6409_v23, %s3751_s9  ;;  %v2207_v40 = vmul.f32 %v3679_v13, %v2206_v28 }
 0x730   :  { %v2294_v15 = vpop.permute.xlu1 %2293  ;;  %v2454_v50 = vpop.permute.xlu2 %2453 }
 0x731   :  { %v6572_v51 = vadd.f32 %v2963_v27, %v2947_v8  ;;  %v6574_v32 = vadd.f32 %v2964_v14, %v2948_v45  ;;  %v2323_v48 = vsel %vm8195_vm7, %v2294_v15, %v2310_v55  ;;  %v2331_v33 = vsel %vm8196_vm2, %v2310_v55, %v2294_v15  ;;  %v2708_v38 = vpop.permute.xlu0 %2707 }
 0x732   :  { %v6582_v39 = vsel %vm1108_vm9, %v2708_v38, %v2724_v26  ;;  %v6586_v34 = vsel %vm1108_vm9, %v2724_v26, %v2708_v38  ;;  %v2342_v8 = vmul.f32 %v8099_v30, %v2323_v48  ;;  %v2341_v26 = vmul.f32 %v2331_v33, %v8101_v19  ;;  %v8199_v38 = vld [vmem:[#allocation20_spill] sm:$0xff] }
 0x733   :  { %8194 = vst [vmem:[#allocation127_spill] sm:$0xff] %v6574_v32 }
 0x734   :  { %v2358_v36 = vmul.f32 %v2342_v8, %v8197_v29  ;;  %v2357_v12 = vmul.f32 %v2341_v26, %v8197_v29  ;;  %v8200_v26 = vld [vmem:[#allocation28_spill] sm:$0xff] }
 0x736   :  { %2395 = vrot.lane.b32.xlu1 %v6589_v59, %s3745_s29  ;;  %2713 = vrot.lane.b32.xlu2 %v6409_v23, %s3750_s8 }
 0x737   :  { %2889 = vrot.lane.b32.xlu0 %v6442_v10, %s3752_s10 }
 0x738   :  { %v2374_v45 = vpop.permute.xlu1 %2373  ;;  %v2550_v6 = vpop.permute.xlu2 %2549 }
 0x739   :  { %v2390_v58 = vpop.permute.xlu0 %2389 }
 0x73a   :  { %v2403_v18 = vsel %vm608_vm4, %v2374_v45, %v2390_v58  ;;  %v2411_v56 = vsel %vm608_vm4, %v2390_v58, %v2374_v45 }
 0x73b   :  { %v2421_v55 = vmul.f32 %v8100_v2, %v2411_v56  ;;  %v2438_v37 = vmul.f32 %v2403_v18, %v8198_v41 }
 0x73d   :  { %v2437_v25 = vmul.f32 %v2421_v55, %v8198_v41  ;;  %v2950_v7 = vadd.f32 %v2438_v37, %v2358_v36 }
 0x73e   :  { %2539 = vrot.lane.b32.xlu1 %v6556_v42, %s3747_s5  ;;  %2809 = vrot.lane.b32.xlu2 %v6442_v10, %s3751_s9 }
 0x73f   :  { %v2949_v57 = vadd.f32 %v2437_v25, %v2357_v12  ;;  %2315 = vrot.lane.b32.xlu0 %v6589_v59, %s3746_s30 }
 0x740   :  { %v2470_v49 = vpop.permute.xlu1 %2469  ;;  %v2710_v52 = vpop.permute.xlu2 %2709 }
 0x741   :  { %v2483_v21 = vsel %vm721_vm6, %v2454_v50, %v2470_v49  ;;  %v2491_v3 = vsel %vm721_vm6, %v2470_v49, %v2454_v50  ;;  %v2534_v4 = vpop.permute.xlu0 %2533  ;;  %v2208_v50 = vmul.f32 0.5, %v2207_v40 }
 0x742   :  { %v2501_v27 = vmul.f32 %v2491_v3, %v8097_v54  ;;  %v2502_v14 = vmul.f32 %v4726_v31, %v2483_v21  ;;  %v2563_v60 = vsel %vm834_vm5, %v2534_v4, %v2550_v6  ;;  %v2571_v15 = vsel %vm834_vm5, %v2550_v6, %v2534_v4 }
 0x743   :  { %v2581_v48 = vmul.f32 %v8067_v5, %v2571_v15  ;;  %v2582_v33 = vmul.f32 %v8099_v30, %v2563_v60  ;;  %v2209_v55 = vsub.f32 1.5, %v2208_v50  ;;  %v8206_v50 = vld [vmem:[#allocation152_spill] sm:$0xff] }
 0x744   :  { %v2517_v8 = vmul.f32 %v2501_v27, %v8199_v38  ;;  %v2518_v45 = vmul.f32 %v2502_v14, %v8199_v38 }
 0x745   :  { %v2597_v58 = vmul.f32 %v2581_v48, %v8200_v26  ;;  %v2598_v18 = vmul.f32 %v2582_v33, %v8200_v26  ;;  %v2210_v49 = vmul.f32 %v3679_v13, %v2209_v55 }
 0x746   :  { %2651 = vrot.lane.b32.xlu1 %v6589_v59, %s3749_s7  ;;  %2379 = vrot.lane.b32.xlu2 %v6556_v42, %s3745_s29 }
 0x747   :  { %v2965_v6 = vadd.f32 %v2597_v58, %v2517_v8  ;;  %v2966_v56 = vadd.f32 %v2598_v18, %v2518_v45  ;;  %2459 = vrot.lane.b32.xlu0 %v6556_v42, %s3748_s6  ;;  %v2214_v3 = vsel %vm2213_vm13, %v3679_v13, %v2210_v49  ;;  %v2136_v13 = vmul.f32 %v6365_v35, %v8161_v46  ;;  %v8205_v45 = vld [vmem:[#allocation37_spill] sm:$0xff] }
 0x748   :  { %v2630_v29 = vpop.permute.xlu1 %2629  ;;  %v2806_v36 = vpop.permute.xlu2 %2805  ;;  %v8207_v18 = vld [vmem:[#allocation113_spill] sm:$0xff] }
 0x749   :  { %v3013_v41 = vadd.f32 %v2965_v6, %v2949_v57  ;;  %v3014_v37 = vadd.f32 %v2966_v56, %v2950_v7  ;;  %v2646_v28 = vpop.permute.xlu0 %2645  ;;  %v2237_v56 = vmul.f32 %v2214_v3, %v6168_v16  ;;  %v6678_v55 = vadd.f32 1e-05, %v2136_v13 }
 0x74a   :  { %v2659_v12 = vsel %vm8201_vm8, %v2630_v29, %v2646_v28  ;;  %v2667_v25 = vsel %vm8202_vm0, %v2646_v28, %v2630_v29  ;;  %v2614_v29 = vmul.f32 %v6322_v53, %v8205_v45  ;;  %vm8213_vm8 = vmmov %vm8202_vm0 }
 0x74b   :  { %v2677_v40 = vmul.f32 %v4707_v9, %v2659_v12  ;;  %v2678_v7 = vmul.f32 %v4726_v31, %v2667_v25  ;;  %vm2253_vm15 = vcmp.ge.f32.partialorder %v2237_v56, 0.0  ;;  %3680 = vrsqrt.f32 %v6678_v55 }
 0x74c   :  { %vm2221_vm12 = vweird.f32 %v6678_v55 }
 0x74d   :  { %v2693_v4 = vmul.f32 %v2677_v40, %v8137_v24  ;;  %v2694_v38 = vmul.f32 %v2678_v7, %v8137_v24  ;;  %v2269_v40 = vmul.f32 0.2, %v2237_v56 }
 0x74e   :  { %2795 = vrot.lane.b32.xlu1 %v6556_v42, %s3751_s9  ;;  %2475 = vrot.lane.b32.xlu2 %v6589_v59, %s3748_s6 }
 0x74f   :  { %2555 = vrot.lane.b32.xlu0 %v6589_v59, %s3747_s5  ;;  %v2982_v28 = vadd.f32 %v2694_v38, %v2614_v29 }
 0x750   :  { %v2726_v57 = vpop.permute.xlu1 %2725  ;;  %v2376_v21 = vpop.permute.xlu2 %2375 }
 0x751   :  { %v2739_v27 = vsel %vm1108_vm9, %v2710_v52, %v2726_v57  ;;  %v2747_v14 = vsel %vm1108_vm9, %v2726_v57, %v2710_v52  ;;  %v2790_v60 = vpop.permute.xlu0 %2789  ;;  %v2613_v52 = vmul.f32 %v6313_v1, %v8205_v45 }
 0x752   :  { %v2757_v0 = vmul.f32 %v8067_v5, %v2739_v27  ;;  %v2758_v15 = vmul.f32 %v2747_v14, %v4731_v62  ;;  %v2819_v48 = vsel %vm8203_vm1, %v2790_v60, %v2806_v36  ;;  %v2827_v33 = vsel %vm8204_vm14, %v2806_v36, %v2790_v60  ;;  %vm8216_vm1 = vmmov %vm8196_vm2 }
 0x753   :  { %v2838_v8 = vmul.f32 %v4709_v17, %v2827_v33  ;;  %v2853_v6 = vmul.f32 %v2819_v48, %v8207_v18  ;;  %v2981_v36 = vadd.f32 %v2693_v4, %v2613_v52  ;;  %v3681_v33 = vpop.eup %3680  ;;  %vm8217_vm14 = vmmov %vm8216_vm1 }
 0x754   :  { %v2773_v26 = vmul.f32 %v2757_v0, %v8206_v50  ;;  %v2774_v58 = vmul.f32 %v2758_v15, %v8206_v50  ;;  %v2238_v0 = vmul.f32 %v2214_v3, %v6171_v22  ;;  %v6692_v15 = vsel %vm2253_vm15, %v2237_v56, %v2269_v40  ;;  %v8211_v50 = vld [vmem:[#allocation13_spill] sm:$0xff] }
 0x755   :  { %v2854_v35 = vmul.f32 %v2838_v8, %v8207_v18  ;;  %v2216_v52 = vmul.f32 %v3681_v33, %v6678_v55  ;;  %v8212_v18 = vld [vmem:[#allocation5_spill] sm:$0xff]  ;;  %vm2222_vm3 = vweird.f32 %v3681_v33 }
 0x756   :  { %v2997_v24 = vadd.f32 %v2853_v6, %v2773_v26  ;;  %2891 = vrot.lane.b32.xlu1 %v6589_v59, %s3752_s10  ;;  %2635 = vrot.lane.b32.xlu2 %v6556_v42, %s3749_s7  ;;  %vm2254_vm7 = vcmp.ge.f32.partialorder %v2238_v0, 0.0  ;;  %vm2223_vm13 = vmor %vm2221_vm12, %vm2222_vm3 }
 0x757   :  { %v2998_v12 = vadd.f32 %v2854_v35, %v2774_v58  ;;  %2715 = vrot.lane.b32.xlu0 %v6556_v42, %s3750_s8 }
 0x758   :  { %v3029_v16 = vadd.f32 %v2997_v24, %v2981_v36  ;;  %v2392_v25 = vpop.permute.xlu1 %2391  ;;  %v2472_v49 = vpop.permute.xlu2 %2471  ;;  %v2217_v36 = vmul.f32 %v3681_v33, %v2216_v52 }
 0x759   :  { %v3030_v7 = vadd.f32 %v2998_v12, %v2982_v28  ;;  %v2404_v57 = vsel %vm608_vm4, %v2376_v21, %v2392_v25  ;;  %v2412_v4 = vsel %vm608_vm4, %v2392_v25, %v2376_v21  ;;  %v2296_v27 = vpop.permute.xlu0 %2295  ;;  %v2270_v21 = vmul.f32 0.2, %v2238_v0 }
 0x75a   :  { %v6686_v14 = vadd.f32 %v3029_v16, %v3013_v41  ;;  %v2440_v58 = vmul.f32 %v2404_v57, %v8211_v50  ;;  %v2218_v57 = vmul.f32 0.5, %v2217_v36 }
 0x75b   :  { %v6689_v60 = vadd.f32 %v3030_v7, %v3014_v37  ;;  %v2423_v37 = vmul.f32 %v8100_v2, %v2412_v4  ;;  %v6707_v45 = vsel %vm2254_vm7, %v2238_v0, %v2270_v21  ;;  %vm8222_vm7 = vcmp.lt.s32.totalorder %v4681_v47, 112 }
 0x75c   :  { %8208 = vst [vmem:[#allocation120_spill] sm:$0xff] %v6686_v14  ;;  %v2219_v4 = vsub.f32 1.5, %v2218_v57 }
 0x75d   :  { %8209 = vst [vmem:[#allocation124_spill] sm:$0xff] %v6689_v60  ;;  %v2439_v26 = vmul.f32 %v2423_v37, %v8211_v50 }
 0x75e   :  { %2381 = vrot.lane.b32.xlu1 %v6692_v15, %s3745_s29  ;;  %2731 = vrot.lane.b32.xlu2 %v6589_v59, %s3750_s8 }
 0x75f   :  { %2811 = vrot.lane.b32.xlu0 %v6589_v59, %s3751_s9 }
 0x760   :  { %v2536_v41 = vpop.permute.xlu1 %2535  ;;  %v2632_v48 = vpop.permute.xlu2 %2631 }
 0x761   :  { %v2312_v13 = vpop.permute.xlu0 %2311 }
 0x762   :  { %v2324_v22 = vsel %vm8196_vm2, %v2296_v27, %v2312_v13  ;;  %v2332_v3 = vsel %vm8210_vm10, %v2312_v13, %v2296_v27  ;;  %vm8223_vm2 = vmmov %vm8222_vm7 }
 0x763   :  { %v2343_v38 = vmul.f32 %v2332_v3, %v8101_v19  ;;  %v2344_v8 = vmul.f32 %v8099_v30, %v2324_v22  ;;  %vm8235_vm3 = vmmov %vm8223_vm2 }
 0x764   :  { %vm8236_vm12 = vmmov %vm8223_vm2 }
 0x765   :  { %v2359_v6 = vmul.f32 %v2343_v38, %v8212_v18  ;;  %v2360_v56 = vmul.f32 %v2344_v8, %v8212_v18  ;;  %v2220_v38 = vmul.f32 %v3681_v33, %v2219_v4  ;;  %v8214_v8 = vld [vmem:[#allocation22_spill] sm:$0xff] }
 0x766   :  { %2477 = vrot.lane.b32.xlu1 %v6707_v45, %s3748_s6  ;;  %2875 = vrot.lane.b32.xlu2 %v6556_v42, %s3752_s10 }
 0x767   :  { %v2951_v29 = vadd.f32 %v2439_v26, %v2359_v6  ;;  %v2952_v35 = vadd.f32 %v2440_v58, %v2360_v56  ;;  %2301 = vrot.lane.b32.xlu0 %v6692_v15, %s3746_s30  ;;  %v8215_v26 = vld [vmem:[#allocation30_spill] sm:$0xff]  ;;  %v2224_v56 = vsel %vm2223_vm13, %v3681_v33, %v2220_v38  ;;  %vm8239_vm13 = vcmp.lt.s32.totalorder %v4681_v47, 111 }
 0x768   :  { %v2648_v24 = vpop.permute.xlu1 %2647  ;;  %v2728_v28 = vpop.permute.xlu2 %2727 }
 0x769   :  { %v2660_v12 = vsel %vm8213_vm8, %v2632_v48, %v2648_v24  ;;  %v2668_v16 = vsel %vm8202_vm0, %v2648_v24, %v2632_v48  ;;  %v2456_v25 = vpop.permute.xlu0 %2455  ;;  %vm8232_vm8 = vmmov %vm8202_vm0 }
 0x76a   :  { %v2484_v40 = vsel %vm721_vm6, %v2456_v25, %v2472_v49  ;;  %v2492_v7 = vsel %vm721_vm6, %v2472_v49, %v2456_v25  ;;  %v2679_v33 = vmul.f32 %v4707_v9, %v2660_v12 }
 0x76b   :  { %v2503_v21 = vmul.f32 %v2492_v7, %v8097_v54  ;;  %v2504_v48 = vmul.f32 %v4726_v31, %v2484_v40 }
 0x76d   :  { %v2519_v52 = vmul.f32 %v2503_v21, %v8214_v8  ;;  %v2520_v50 = vmul.f32 %v2504_v48, %v8214_v8  ;;  %v8218_v48 = vld [vmem:[#allocation130_spill] sm:$0xff]  ;;  %v8220_v8 = vld [vmem:[#allocation40_spill] sm:$0xff] }
 0x76e   :  { %2637 = vrot.lane.b32.xlu1 %v6692_v15, %s3749_s7  ;;  %2317 = vrot.lane.b32.xlu2 %v6707_v45, %s3746_s30 }
 0x76f   :  { %2397 = vrot.lane.b32.xlu0 %v6707_v45, %s3745_s29 }
 0x770   :  { %v2792_v27 = vpop.permute.xlu1 %2791  ;;  %v2298_v0 = vpop.permute.xlu2 %2297 }
 0x771   :  { %v2552_v37 = vpop.permute.xlu0 %2551 }
 0x772   :  { %v2564_v49 = vsel %vm834_vm5, %v2536_v41, %v2552_v37  ;;  %v2572_v13 = vsel %vm834_vm5, %v2552_v37, %v2536_v41  ;;  %v2239_v37 = vmul.f32 %v2224_v56, %v8218_v48 }
 0x773   :  { %v2583_v22 = vmul.f32 %v8067_v5, %v2572_v13  ;;  %v2584_v3 = vmul.f32 %v8099_v30, %v2564_v49  ;;  %v8219_v13 = vld [vmem:[#allocation101_spill] sm:$0xff] }
 0x774   :  { %vm2255_vm15 = vcmp.ge.f32.partialorder %v2239_v37, 0.0 }
 0x775   :  { %v2599_v58 = vmul.f32 %v2583_v22, %v8215_v26  ;;  %v2600_v18 = vmul.f32 %v2584_v3, %v8215_v26  ;;  %v2695_v22 = vmul.f32 %v2679_v33, %v8219_v13 }
 0x776   :  { %2733 = vrot.lane.b32.xlu1 %v6707_v45, %s3750_s8  ;;  %2461 = vrot.lane.b32.xlu2 %v6692_v15, %s3748_s6 }
 0x777   :  { %v2967_v41 = vadd.f32 %v2599_v58, %v2519_v52  ;;  %v2968_v6 = vadd.f32 %v2600_v18, %v2520_v50  ;;  %2541 = vrot.lane.b32.xlu0 %v6692_v15, %s3747_s5  ;;  %v8221_v52 = vld [vmem:[#allocation123_spill] sm:$0xff] }
 0x778   :  { %v2378_v36 = vpop.permute.xlu1 %2377  ;;  %v2314_v24 = vpop.permute.xlu2 %2313  ;;  %v2615_v50 = vmul.f32 %v8221_v52, %v8220_v8 }
 0x779   :  { %v3015_v25 = vadd.f32 %v2967_v41, %v2951_v29  ;;  %v3016_v40 = vadd.f32 %v2968_v6, %v2952_v35  ;;  %v2712_v7 = vpop.permute.xlu0 %2711  ;;  %v2325_v55 = vsel %vm8216_vm1, %v2298_v0, %v2314_v24  ;;  %v2333_v57 = vsel %vm8217_vm14, %v2314_v24, %v2298_v0  ;;  %v8224_v41 = vld [vmem:[#allocation103_spill] sm:$0xff]  ;;  %vm8240_vm1 = vmmov %vm8239_vm13 }
 0x77a   :  { %v2740_v4 = vsel %vm1108_vm9, %v2712_v7, %v2728_v28  ;;  %v2748_v21 = vsel %vm1108_vm9, %v2728_v28, %v2712_v7  ;;  %v2680_v29 = vmul.f32 %v4726_v31, %v2668_v16  ;;  %v2271_v0 = vmul.f32 0.2, %v2239_v37  ;;  %v8225_v7 = vld [vmem:[#allocation96_spill] sm:$0xff] }
 0x77b   :  { %v2759_v35 = vmul.f32 %v8067_v5, %v2740_v4  ;;  %v2760_v12 = vmul.f32 %v2748_v21, %v4731_v62  ;;  %v8226_v21 = vld [vmem:[#allocation133_spill] sm:$0xff]  ;;  %v2983_v46 = vadd.f32 %v2695_v22, %v2615_v50 }
 0x77c   :  { %v2696_v18 = vmul.f32 %v2680_v29, %v8219_v13  ;;  %v2240_v48 = vmul.f32 %v2224_v56, %v8226_v21  ;;  %v6789_v33 = vsel %vm2255_vm15, %v2239_v37, %v2271_v0  ;;  %v2346_v56 = vmul.f32 %v8099_v30, %v2325_v55  ;;  %vm8245_vm15 = vmmov %vm8217_vm14 }
 0x77d   :  { %v2775_v6 = vmul.f32 %v2759_v35, %v8224_v41  ;;  %v2776_v60 = vmul.f32 %v2760_v12, %v8224_v41  ;;  %v8229_v41 = vld [vmem:[#allocation12_spill] sm:$0xff] }
 0x77e   :  { %2877 = vrot.lane.b32.xlu1 %v6692_v15, %s3752_s10  ;;  %2557 = vrot.lane.b32.xlu2 %v6707_v45, %s3747_s5  ;;  %v2272_v12 = vmul.f32 0.2, %v2240_v48  ;;  %vm2256_vm10 = vcmp.ge.f32.partialorder %v2240_v48, 0.0 }
 0x77f   :  { %2653 = vrot.lane.b32.xlu0 %v6707_v45, %s3749_s7 }
 0x780   :  { %v2474_v28 = vpop.permute.xlu1 %2473  ;;  %v2458_v49 = vpop.permute.xlu2 %2457 }
 0x781   :  { %v2808_v3 = vpop.permute.xlu0 %2807  ;;  %v2485_v38 = vsel %vm721_vm6, %v2458_v49, %v2474_v28  ;;  %v2493_v16 = vsel %vm721_vm6, %v2474_v28, %v2458_v49  ;;  %v8227_v28 = vld [vmem:[#allocation128_spill] sm:$0xff] }
 0x782   :  { %v2820_v26 = vsel %vm8222_vm7, %v2792_v27, %v2808_v3  ;;  %v2828_v58 = vsel %vm8223_vm2, %v2808_v3, %v2792_v27  ;;  %v2616_v49 = vmul.f32 %v8227_v28, %v8220_v8  ;;  %v2345_v3 = vmul.f32 %v2333_v57, %v8101_v19  ;;  %vm8248_vm7 = vmmov %vm8202_vm0 }
 0x783   :  { %v2840_v24 = vmul.f32 %v4709_v17, %v2828_v58  ;;  %v2855_v4 = vmul.f32 %v2820_v26, %v8225_v7  ;;  %v6814_v57 = vsel %vm2256_vm10, %v2240_v48, %v2272_v12  ;;  %v2505_v48 = vmul.f32 %v2493_v16, %v8097_v54  ;;  %v8230_v16 = vld [vmem:[#allocation21_spill] sm:$0xff]  ;;  %vm8249_vm2 = vmmov %vm8202_vm0 }
 0x784   :  { %v2984_v35 = vadd.f32 %v2696_v18, %v2616_v49  ;;  %v2506_v49 = vmul.f32 %v4726_v31, %v2485_v38  ;;  %vm8257_vm10 = vmmov %vm8240_vm1 }
 0x785   :  { %v2856_v27 = vmul.f32 %v2840_v24, %v8225_v7  ;;  %v2999_v29 = vadd.f32 %v2855_v4, %v2775_v6 }
 0x786   :  { %2303 = vrot.lane.b32.xlu1 %v6789_v33, %s3746_s30  ;;  %2717 = vrot.lane.b32.xlu2 %v6692_v15, %s3750_s8  ;;  %v2522_v38 = vmul.f32 %v2506_v49, %v8230_v16 }
 0x787   :  { %v3000_v37 = vadd.f32 %v2856_v27, %v2776_v60  ;;  %v3031_v0 = vadd.f32 %v2999_v29, %v2983_v46  ;;  %2797 = vrot.lane.b32.xlu0 %v6692_v15, %s3751_s9  ;;  %v8228_v46 = vld [vmem:[#allocation4_spill] sm:$0xff] }
 0x788   :  { %v2634_v13 = vpop.permute.xlu1 %2633  ;;  %v2554_v22 = vpop.permute.xlu2 %2553  ;;  %v2362_v55 = vmul.f32 %v2346_v56, %v8228_v46 }
 0x789   :  { %v3032_v8 = vadd.f32 %v3000_v37, %v2984_v35  ;;  %v2394_v50 = vpop.permute.xlu0 %2393  ;;  %v6803_v26 = vadd.f32 %v3031_v0, %v3015_v25  ;;  %v2361_v25 = vmul.f32 %v2345_v3, %v8228_v46  ;;  %v2521_v3 = vmul.f32 %v2505_v48, %v8230_v16  ;;  %v8237_v16 = vld [vmem:[#allocation49_spill] sm:$0xff] }
 0x78a   :  { %v2405_v58 = vsel %vm608_vm4, %v2378_v36, %v2394_v50  ;;  %v2413_v60 = vsel %vm608_vm4, %v2394_v50, %v2378_v36 }
 0x78b   :  { %v2425_v18 = vmul.f32 %v8100_v2, %v2413_v60  ;;  %v2442_v6 = vmul.f32 %v2405_v58, %v8229_v41  ;;  %v6812_v24 = vadd.f32 %v3032_v8, %v3016_v40  ;;  %v8231_v8 = vld [vmem:[#allocation31_spill] sm:$0xff] }
 0x78d   :  { %v2441_v7 = vmul.f32 %v2425_v18, %v8229_v41  ;;  %v2954_v4 = vadd.f32 %v2442_v6, %v2362_v55 }
 0x78e   :  { %2399 = vrot.lane.b32.xlu1 %v6814_v57, %s3745_s29  ;;  %2813 = vrot.lane.b32.xlu2 %v6707_v45, %s3751_s9 }
 0x78f   :  { %v2953_v36 = vadd.f32 %v2441_v7, %v2361_v25  ;;  %2893 = vrot.lane.b32.xlu0 %v6707_v45, %s3752_s10 }
 0x790   :  { %v2730_v21 = vpop.permute.xlu1 %2729  ;;  %v2714_v40 = vpop.permute.xlu2 %2713 }
 0x791   :  { %v2538_v27 = vpop.permute.xlu0 %2537  ;;  %v2741_v29 = vsel %vm1108_vm9, %v2714_v40, %v2730_v21  ;;  %v2749_v35 = vsel %vm1108_vm9, %v2730_v21, %v2714_v40 }
 0x792   :  { %v2565_v56 = vsel %vm834_vm5, %v2538_v27, %v2554_v22  ;;  %v2573_v37 = vsel %vm834_vm5, %v2554_v22, %v2538_v27  ;;  %v2761_v40 = vmul.f32 %v8067_v5, %v2741_v29  ;;  %v2762_v49 = vmul.f32 %v2749_v35, %v4731_v62 }
 0x793   :  { %v2585_v0 = vmul.f32 %v8067_v5, %v2573_v37  ;;  %v2586_v12 = vmul.f32 %v8099_v30, %v2565_v56  ;;  %v8234_v37 = vld [vmem:[#allocation41_spill] sm:$0xff] }
 0x795   :  { %v2601_v50 = vmul.f32 %v2585_v0, %v8231_v8  ;;  %v2602_v58 = vmul.f32 %v2586_v12, %v8231_v8  ;;  %v2617_v0 = vmul.f32 %v6409_v23, %v8234_v37 }
 0x796   :  { %2543 = vrot.lane.b32.xlu1 %v6789_v33, %s3747_s5  ;;  %2383 = vrot.lane.b32.xlu2 %v6789_v33, %s3745_s29 }
 0x797   :  { %v2969_v60 = vadd.f32 %v2601_v50, %v2521_v3  ;;  %v2970_v22 = vadd.f32 %v2602_v58, %v2522_v38  ;;  %2319 = vrot.lane.b32.xlu0 %v6814_v57, %s3746_s30  ;;  %v2777_v3 = vmul.f32 %v2761_v40, %v8237_v16  ;;  %v8238_v50 = vld [vmem:[#allocation149_spill] sm:$0xff]  ;;  %v2618_v58 = vmul.f32 %v6442_v10, %v8234_v37 }
 0x798   :  { %v2874_v46 = vpop.permute.xlu1 %2873  ;;  %v2810_v55 = vpop.permute.xlu2 %2809 }
 0x799   :  { %v3017_v18 = vadd.f32 %v2969_v60, %v2953_v36  ;;  %v3018_v41 = vadd.f32 %v2970_v22, %v2954_v4  ;;  %v2650_v6 = vpop.permute.xlu0 %2649  ;;  %v2778_v60 = vmul.f32 %v2762_v49, %v8237_v16 }
 0x79a   :  { %v2661_v25 = vsel %vm8232_vm8, %v2634_v13, %v2650_v6  ;;  %v2669_v7 = vsel %vm8202_vm0, %v2650_v6, %v2634_v13  ;;  %v8233_v13 = vld [vmem:[#allocation50_spill] sm:$0xff]  ;;  %vm8258_vm8 = vmmov %vm8235_vm3 }
 0x79b   :  { %v2681_v21 = vmul.f32 %v4707_v9, %v2661_v25  ;;  %v2682_v36 = vmul.f32 %v4726_v31, %v2669_v7  ;;  %vm8259_vm0 = vmmov %vm8235_vm3 }
 0x79d   :  { %v2697_v27 = vmul.f32 %v2681_v21, %v8233_v13  ;;  %v2698_v38 = vmul.f32 %v2682_v36, %v8233_v13 }
 0x79e   :  { %2655 = vrot.lane.b32.xlu1 %v6814_v57, %s3749_s7  ;;  %2479 = vrot.lane.b32.xlu2 %v6814_v57, %s3748_s6 }
 0x79f   :  { %2463 = vrot.lane.b32.xlu0 %v6789_v33, %s3748_s6  ;;  %v2985_v23 = vadd.f32 %v2697_v27, %v2617_v0 }
 0x7a0   :  { %v2300_v4 = vpop.permute.xlu1 %2299  ;;  %v2380_v48 = vpop.permute.xlu2 %2379 }
 0x7a1   :  { %v2794_v56 = vpop.permute.xlu0 %2793 }
 0x7a2   :  { %v2821_v12 = vsel %vm8235_vm3, %v2794_v56, %v2810_v55  ;;  %v2829_v29 = vsel %vm8236_vm12, %v2810_v55, %v2794_v56  ;;  %v2986_v55 = vadd.f32 %v2698_v38, %v2618_v58  ;;  %vm8262_vm3 = vmmov %vm8240_vm1 }
 0x7a3   :  { %v2842_v8 = vmul.f32 %v4709_v17, %v2829_v29  ;;  %v2857_v35 = vmul.f32 %v2821_v12, %v8238_v50  ;;  %v8241_v12 = vld [vmem:[#allocation153_spill] sm:$0xff]  ;;  %vm8264_vm12 = vmmov %vm8249_vm2 }
 0x7a5   :  { %v2858_v22 = vmul.f32 %v2842_v8, %v8238_v50  ;;  %v3001_v6 = vadd.f32 %v2857_v35, %v2777_v3  ;;  %v8242_v3 = vld [vmem:[#allocation104_spill] sm:$0xff] }
 0x7a6   :  { %2799 = vrot.lane.b32.xlu1 %v6789_v33, %s3751_s9  ;;  %2639 = vrot.lane.b32.xlu2 %v6789_v33, %s3749_s7 }
 0x7a7   :  { %v3002_v25 = vadd.f32 %v2858_v22, %v2778_v60  ;;  %v3033_v7 = vadd.f32 %v3001_v6, %v2985_v23  ;;  %2559 = vrot.lane.b32.xlu0 %v6814_v57, %s3747_s5  ;;  %v8246_v22 = vld [vmem:[#allocation17_spill] sm:$0xff] }
 0x7a8   :  { %v2396_v21 = vpop.permute.xlu1 %2395  ;;  %v2476_v10 = vpop.permute.xlu2 %2475 }
 0x7a9   :  { %v3034_v40 = vadd.f32 %v3002_v25, %v2986_v55  ;;  %v2890_v36 = vpop.permute.xlu0 %2889  ;;  %v2406_v49 = vsel %vm608_vm4, %v2380_v48, %v2396_v21  ;;  %v2414_v13 = vsel %vm608_vm4, %v2396_v21, %v2380_v48  ;;  %v3049_v27 = vadd.f32 %v3033_v7, %v3017_v18  ;;  %v8247_v25 = vld [vmem:[#allocation7_spill] sm:$0xff] }
 0x7aa   :  { %v2901_v56 = vsel %vm8239_vm13, %v2874_v46, %v2890_v36  ;;  %v2909_v37 = vsel %vm8240_vm1, %v2890_v36, %v2874_v46  ;;  %v2444_v55 = vmul.f32 %v2406_v49, %v8246_v22  ;;  %vm8265_vm13 = vmmov %vm8249_vm2 }
 0x7ab   :  { %v2921_v0 = vmul.f32 %v4707_v9, %v2901_v56  ;;  %v2922_v29 = vmul.f32 %v2909_v37, %v8241_v12  ;;  %v3050_v16 = vadd.f32 %v3034_v40, %v3018_v41  ;;  %v2427_v41 = vmul.f32 %v8100_v2, %v2414_v13  ;;  %vm8266_vm1 = vmmov %vm8217_vm14 }
 0x7ad   :  { %v2937_v38 = vmul.f32 %v2921_v0, %v8242_v3  ;;  %v2938_v8 = vmul.f32 %v2922_v29, %v8242_v3  ;;  %v2443_v6 = vmul.f32 %v2427_v41, %v8246_v22  ;;  %v8250_v0 = vld [vmem:[#allocation135_spill] sm:$0xff] }
 0x7ae   :  { %2869 = vrot.lane.b32.xlu1 %v6313_v1, %s3752_s10  ;;  %2735 = vrot.lane.b32.xlu2 %v6814_v57, %s3750_s8 }
 0x7af   :  { %2719 = vrot.lane.b32.xlu0 %v6789_v33, %s3750_s8  ;;  %v6899_v18 = vadd.f32 %v3049_v27, %v2937_v38  ;;  %v6901_v46 = vadd.f32 %v3050_v16, %v2938_v8 }
 0x7b0   :  { %v2540_v48 = vpop.permute.xlu1 %2539  ;;  %v2636_v50 = vpop.permute.xlu2 %2635 }
 0x7b1   :  { %8243 = vst [vmem:[#allocation114_spill] sm:$0xff] %v6899_v18  ;;  %v2316_v35 = vpop.permute.xlu0 %2315 }
 0x7b2   :  { %8244 = vst [vmem:[#allocation132_spill] sm:$0xff] %v6901_v46  ;;  %v2326_v58 = vsel %vm8217_vm14, %v2300_v4, %v2316_v35  ;;  %v2334_v1 = vsel %vm8245_vm15, %v2316_v35, %v2300_v4  ;;  %v8251_v35 = vld [vmem:[#allocation25_spill] sm:$0xff]  ;;  %vm8267_vm14 = vmmov %vm8266_vm1 }
 0x7b3   :  { %v2347_v60 = vmul.f32 %v2334_v1, %v8101_v19  ;;  %v2348_v23 = vmul.f32 %v8099_v30, %v2326_v58  ;;  %vm8271_vm15 = vmmov %vm8259_vm0 }
 0x7b5   :  { %v2363_v7 = vmul.f32 %v2347_v60, %v8247_v25  ;;  %v2364_v21 = vmul.f32 %v2348_v23, %v8247_v25  ;;  %v8252_v60 = vld [vmem:[#allocation33_spill] sm:$0xff] }
 0x7b6   :  { %2895 = vrot.lane.b32.xlu1 %v6814_v57, %s3752_s10  ;;  %2871 = vrot.lane.b32.xlu2 %v8221_v52, %s3752_s10 }
 0x7b7   :  { %v2955_v40 = vadd.f32 %v2443_v6, %v2363_v7  ;;  %v2956_v4 = vadd.f32 %v2444_v55, %v2364_v21  ;;  %2815 = vrot.lane.b32.xlu0 %v6814_v57, %s3751_s9  ;;  %v8253_v6 = vld [vmem:[#allocation131_spill] sm:$0xff] }
 0x7b8   :  { %v2652_v36 = vpop.permute.xlu1 %2651  ;;  %v2732_v13 = vpop.permute.xlu2 %2731 }
 0x7b9   :  { %v2460_v27 = vpop.permute.xlu0 %2459  ;;  %v2662_v49 = vsel %vm8248_vm7, %v2636_v50, %v2652_v36  ;;  %v2670_v56 = vsel %vm8249_vm2, %v2652_v36, %v2636_v50  ;;  %vm8272_vm7 = vmmov %vm8259_vm0 }
 0x7ba   :  { %v2486_v37 = vsel %vm721_vm6, %v2460_v27, %v2476_v10  ;;  %v2494_v52 = vsel %vm721_vm6, %v2476_v10, %v2460_v27  ;;  %vm8278_vm2 = vmmov %vm8262_vm3 }
 0x7bb   :  { %v2507_v3 = vmul.f32 %v2494_v52, %v8097_v54  ;;  %v2508_v38 = vmul.f32 %v4726_v31, %v2486_v37  ;;  %v2683_v37 = vmul.f32 %v4707_v9, %v2662_v49 }
 0x7bd   :  { %v2523_v58 = vmul.f32 %v2507_v3, %v8251_v35  ;;  %v2524_v1 = vmul.f32 %v2508_v38, %v8251_v35  ;;  %v2684_v3 = vmul.f32 %v4726_v31, %v2670_v56  ;;  %v8254_v38 = vld [vmem:[#allocation129_spill] sm:$0xff] }
 0x7be   :  { %2887 = vrot.lane.b32.xlu1 %v8227_v28, %s3752_s10  ;;  %2879 = vrot.lane.b32.xlu2 %v6789_v33, %s3752_s10 }
 0x7bf   :  { %2803 = vrot.lane.b32.xlu0 %v8250_v0, %s3751_s9 }
 0x7c0   :  { %v2796_v29 = vpop.permute.xlu1 %2795  ;;  %v2876_v16 = vpop.permute.xlu2 %2875 }
 0x7c1   :  { %v2556_v8 = vpop.permute.xlu0 %2555 }
 0x7c2   :  { %v2566_v50 = vsel %vm834_vm5, %v2540_v48, %v2556_v8  ;;  %v2574_v10 = vsel %vm834_vm5, %v2556_v8, %v2540_v48 }
 0x7c3   :  { %v2587_v28 = vmul.f32 %v8067_v5, %v2574_v10  ;;  %v2588_v41 = vmul.f32 %v8099_v30, %v2566_v50 }
 0x7c5   :  { %v2603_v23 = vmul.f32 %v2587_v28, %v8252_v60  ;;  %v2604_v22 = vmul.f32 %v2588_v41, %v8252_v60  ;;  %v8256_v28 = vld [vmem:[#allocation42_spill] sm:$0xff] }
 0x7c6   :  { %2881 = vrot.lane.b32.xlu1 %v6254_v11, %s3752_s10  ;;  %2865 = vrot.lane.b32.xlu2 %v8253_v6, %s3752_s10 }
 0x7c7   :  { %v2971_v55 = vadd.f32 %v2603_v23, %v2523_v58  ;;  %v2972_v48 = vadd.f32 %v2604_v22, %v2524_v1  ;;  %2885 = vrot.lane.b32.xlu0 %v6322_v53, %s3752_s10  ;;  %v8260_v1 = vld [vmem:[#allocation137_spill] sm:$0xff]  ;;  %v8261_v22 = vld [vmem:[#allocation138_spill] sm:$0xff] }
 0x7c8   :  { %v2892_v25 = vpop.permute.xlu1 %2891  ;;  %v2318_v7 = vpop.permute.xlu2 %2317 }
 0x7c9   :  { %v3019_v21 = vadd.f32 %v2971_v55, %v2955_v40  ;;  %v3020_v36 = vadd.f32 %v2972_v48, %v2956_v4  ;;  %v2716_v27 = vpop.permute.xlu0 %2715  ;;  %v8255_v40 = vld [vmem:[#allocation48_spill] sm:$0xff]  ;;  %v2902_v41 = vsel %vm8257_vm10, %v2876_v16, %v2892_v25  ;;  %v2910_v48 = vsel %vm8262_vm3, %v2892_v25, %v2876_v16  ;;  %vm8279_vm10 = vmmov %vm8278_vm2 }
 0x7ca   :  { %v2742_v52 = vsel %vm1108_vm9, %v2716_v27, %v2732_v13  ;;  %v2750_v11 = vsel %vm1108_vm9, %v2732_v13, %v2716_v27  ;;  %v2699_v4 = vmul.f32 %v2683_v37, %v8255_v40  ;;  %v2619_v13 = vmul.f32 %v6556_v42, %v8256_v28  ;;  %vm8285_vm3 = vmmov %vm8264_vm12 }
 0x7cb   :  { %v2763_v53 = vmul.f32 %v8067_v5, %v2742_v52  ;;  %v2764_v50 = vmul.f32 %v2750_v11, %v4731_v62  ;;  %v2700_v58 = vmul.f32 %v2684_v3, %v8255_v40  ;;  %v2620_v42 = vmul.f32 %v6589_v59, %v8256_v28 }
 0x7cc   :  { %v2987_v55 = vadd.f32 %v2699_v4, %v2619_v13  ;;  %v2923_v37 = vmul.f32 %v4707_v9, %v2902_v41  ;;  %v2924_v3 = vmul.f32 %v2910_v48, %v8241_v12 }
 0x7cd   :  { %v2779_v60 = vmul.f32 %v2763_v53, %v8260_v1  ;;  %v2780_v27 = vmul.f32 %v2764_v50, %v8260_v1  ;;  %v2988_v11 = vadd.f32 %v2700_v58, %v2620_v42 }
 0x7ce   :  { %2883 = vrot.lane.b32.xlu2 %v8250_v0, %s3752_s10 }
 0x7cf   :  { %2867 = vrot.lane.b32.xlu0 %v8254_v38, %s3752_s10 }
 0x7d0   :  { %v6964_v8 = vpop.permute.xlu1 %2381  ;;  %v2462_v49 = vpop.permute.xlu2 %2461 }
 0x7d1   :  { %v2812_v10 = vpop.permute.xlu0 %2811 }
 0x7d2   :  { %v2822_v56 = vsel %vm8258_vm8, %v2796_v29, %v2812_v10  ;;  %v2830_v35 = vsel %vm8259_vm0, %v2812_v10, %v2796_v29  ;;  %vm8282_vm8 = vmmov %vm8266_vm1 }
 0x7d3   :  { %v2844_v23 = vmul.f32 %v4709_v17, %v2830_v35  ;;  %v2859_v6 = vmul.f32 %v2822_v56, %v8261_v22  ;;  %v8263_v35 = vld [vmem:[#allocation109_spill] sm:$0xff]  ;;  %vm8283_vm0 = vmmov %vm8266_vm1 }
 0x7d4   :  { %v2939_v59 = vmul.f32 %v2923_v37, %v8263_v35  ;;  %v2940_v16 = vmul.f32 %v2924_v3, %v8263_v35 }
 0x7d5   :  { %v2860_v29 = vmul.f32 %v2844_v23, %v8261_v22  ;;  %v3003_v52 = vadd.f32 %v2859_v6, %v2779_v60 }
 0x7d7   :  { %v3004_v53 = vadd.f32 %v2860_v29, %v2780_v27  ;;  %v3035_v40 = vadd.f32 %v3003_v52, %v2987_v55  ;;  %v3085_v52 = vadd.f32 %v6901_v46, %v6899_v18  ;;  %v8276_v18 = vld [vmem:[#allocation16_spill] sm:$0xff] }
 0x7d8   :  { %v2478_v10 = vpop.permute.xlu1 %2477  ;;  %v2558_v56 = vpop.permute.xlu2 %2557 }
 0x7d9   :  { %v3036_v4 = vadd.f32 %v3004_v53, %v2988_v11  ;;  %v2302_v28 = vpop.permute.xlu0 %2301  ;;  %v3051_v13 = vadd.f32 %v3035_v40, %v3019_v21  ;;  %v2487_v27 = vsel %vm721_vm6, %v2462_v49, %v2478_v10  ;;  %v2495_v53 = vsel %vm721_vm6, %v2478_v10, %v2462_v49 }
 0x7da   :  { %v2327_v11 = vsel %vm8266_vm1, %v2302_v28, %v2318_v7  ;;  %v2335_v3 = vsel %vm8267_vm14, %v2318_v7, %v2302_v28  ;;  %vm8302_vm1 = vmmov %vm8278_vm2 }
 0x7db   :  { %v3052_v25 = vadd.f32 %v3036_v4, %v3020_v36  ;;  %v6989_v50 = vadd.f32 %v3051_v13, %v2939_v59  ;;  %v2349_v28 = vmul.f32 %v2335_v3, %v8101_v19  ;;  %v8273_v3 = vld [vmem:[#allocation38_spill] sm:$0xff] }
 0x7dd   :  { %v6991_v41 = vadd.f32 %v3052_v25, %v2940_v16  ;;  %v8268_v16 = vld [vmem:[#allocation35_spill] sm:$0xff]  ;;  %v2350_v25 = vmul.f32 %v8099_v30, %v2327_v11 }
 0x7de   :  { %v2621_v7 = vmul.f32 %v6692_v15, %v8268_v16 }
 0x7e0   :  { %v2638_v1 = vpop.permute.xlu1 %2637  ;;  %v2718_v60 = vpop.permute.xlu2 %2717 }
 0x7e1   :  { %v2398_v58 = vpop.permute.xlu0 %2397 }
 0x7e8   :  { %v2734_v23 = vpop.permute.xlu1 %2733  ;;  %v2814_v6 = vpop.permute.xlu2 %2813 }
 0x7e9   :  { %v2542_v22 = vpop.permute.xlu0 %2541  ;;  %v2743_v48 = vsel %vm1108_vm9, %v2718_v60, %v2734_v23  ;;  %v2751_v4 = vsel %vm1108_vm9, %v2734_v23, %v2718_v60  ;;  %v2407_v60 = vsel %vm608_vm4, %v6964_v8, %v2398_v58 }
 0x7ea   :  { %v2567_v21 = vsel %vm834_vm5, %v2542_v22, %v2558_v56  ;;  %v2575_v36 = vsel %vm834_vm5, %v2558_v56, %v2542_v22  ;;  %v2765_v40 = vmul.f32 %v8067_v5, %v2743_v48  ;;  %v2415_v56 = vsel %vm608_vm4, %v2398_v58, %v6964_v8  ;;  %v8269_v48 = vld [vmem:[#allocation45_spill] sm:$0xff] }
 0x7eb   :  { %v2589_v35 = vmul.f32 %v8067_v5, %v2575_v36  ;;  %v2590_v59 = vmul.f32 %v8099_v30, %v2567_v21  ;;  %v2510_v22 = vmul.f32 %v4726_v31, %v2487_v27  ;;  %v2429_v15 = vmul.f32 %v8100_v2, %v2415_v56  ;;  %v8274_v56 = vld [vmem:[#allocation47_spill] sm:$0xff] }
 0x7ec   :  { %v2766_v23 = vmul.f32 %v2751_v4, %v4731_v62  ;;  %v2781_v21 = vmul.f32 %v2765_v40, %v8269_v48  ;;  %v8275_v40 = vld [vmem:[#allocation24_spill] sm:$0xff] }
 0x7ed   :  { %v2445_v14 = vmul.f32 %v2429_v15, %v8276_v18 }
 0x7f0   :  { %v6993_v42 = vpop.permute.xlu1 %2877  ;;  %v7023_v13 = vpop.permute.xlu2 %2383 }
 0x7f1   :  { %v2654_v55 = vpop.permute.xlu0 %2653 }
 0x7f2   :  { %v2663_v37 = vsel %vm8264_vm12, %v2638_v1, %v2654_v55  ;;  %v2671_v29 = vsel %vm8265_vm13, %v2654_v55, %v2638_v1  ;;  %v2509_v1 = vmul.f32 %v2495_v53, %v8097_v54  ;;  %vm8297_vm12 = vmmov %vm8278_vm2 }
 0x7f3   :  { %v2685_v49 = vmul.f32 %v4707_v9, %v2663_v37  ;;  %v2686_v10 = vmul.f32 %v4726_v31, %v2671_v29  ;;  %v8270_v37 = vld [vmem:[#allocation29_spill] sm:$0xff]  ;;  %vm8301_vm13 = vmmov %vm8278_vm2 }
 0x7f4   :  { %v2605_v29 = vmul.f32 %v2589_v35, %v8270_v37  ;;  %v2525_v46 = vmul.f32 %v2509_v1, %v8275_v40  ;;  %v2526_v35 = vmul.f32 %v2510_v22, %v8275_v40 }
 0x7f5   :  { %v2701_v53 = vmul.f32 %v2685_v49, %v8273_v3  ;;  %v2702_v8 = vmul.f32 %v2686_v10, %v8273_v3 }
 0x7f6   :  { %v2973_v3 = vadd.f32 %v2605_v29, %v2525_v46 }
 0x7f7   :  { %3086 = vadd.xlane.f32.xlu2 %v3085_v52  ;;  %v2606_v52 = vmul.f32 %v2590_v59, %v8270_v37  ;;  %v2446_v59 = vmul.f32 %v2407_v60, %v8276_v18  ;;  %v2622_v37 = vmul.f32 %v6707_v45, %v8268_v16  ;;  %v2989_v43 = vadd.f32 %v2701_v53, %v2621_v7 }
 0x7f8   :  { %v7033_v55 = vpop.permute.xlu1 %2303  ;;  %v2480_v60 = vpop.permute.xlu2 %2479 }
 0x7f9   :  { %v2798_v36 = vpop.permute.xlu0 %2797  ;;  %v2974_v1 = vadd.f32 %v2606_v52, %v2526_v35  ;;  %v2990_v22 = vadd.f32 %v2702_v8, %v2622_v37 }
 0x7fa   :  { %v2823_v27 = vsel %vm8271_vm15, %v2798_v36, %v2814_v6  ;;  %v2831_v11 = vsel %vm8272_vm7, %v2814_v6, %v2798_v36  ;;  %v2782_v6 = vmul.f32 %v2766_v23, %v8269_v48  ;;  %v8277_v36 = vld [vmem:[#allocation11_spill] sm:$0xff] }
 0x7fb   :  { %v2846_v58 = vmul.f32 %v4709_v17, %v2831_v11  ;;  %v2861_v4 = vmul.f32 %v2823_v27, %v8274_v56  ;;  %v2365_v11 = vmul.f32 %v2349_v28, %v8277_v36  ;;  %v2366_v27 = vmul.f32 %v2350_v25, %v8277_v36  ;;  %v8281_v36 = vld [vmem:[#allocation32_spill] sm:$0xff] }
 0x7fd   :  { %v2862_v49 = vmul.f32 %v2846_v58, %v8274_v56  ;;  %v3005_v10 = vadd.f32 %v2861_v4, %v2781_v21  ;;  %v2957_v32 = vadd.f32 %v2445_v14, %v2365_v11  ;;  %v2958_v45 = vadd.f32 %v2446_v59, %v2366_v27  ;;  %v8280_v21 = vld [vmem:[#allocation106_spill] sm:$0xff] }
 0x7fe   :  { %v3088_v59 = vadd.f32 %v6991_v41, %v6989_v50  ;;  %v7083_v11 = vmul.f32 %v8250_v0, %v8281_v36 }
 0x7ff   :  { %v3006_v40 = vadd.f32 %v2862_v49, %v2782_v6  ;;  %v3037_v16 = vadd.f32 %v3005_v10, %v2989_v43  ;;  %v3021_v46 = vadd.f32 %v2973_v3, %v2957_v32  ;;  %v3022_v25 = vadd.f32 %v2974_v1, %v2958_v45 }
 0x800   :  { %v2400_v20 = vpop.permute.xlu1 %2399 }
 0x801   :  { %v3038_v18 = vadd.f32 %v3006_v40, %v2990_v22  ;;  %v2894_v15 = vpop.permute.xlu0 %2893  ;;  %v3053_v29 = vadd.f32 %v3037_v16, %v3021_v46  ;;  %v2416_v27 = vsel %vm608_vm4, %v2400_v20, %v7023_v13  ;;  %v7094_v22 = vmul.f32 %v8254_v38, %v8281_v36  ;;  %v8291_v36 = vld [vmem:[#allocation44_spill] sm:$0xff] }
 0x802   :  { %v2903_v23 = vsel %vm8278_vm2, %v6993_v42, %v2894_v15  ;;  %v2911_v28 = vsel %vm8279_vm10, %v2894_v15, %v6993_v42  ;;  %v2640_v42 = vpop.permute.xlu2 %2639  ;;  %v8284_v15 = vld [vmem:[#allocation43_spill] sm:$0xff]  ;;  %v2431_v46 = vmul.f32 %v8100_v2, %v2416_v27  ;;  %v2675_v2 = vmul.f32 %v4707_v9, %v6526_v63  ;;  %vm8309_vm10 = vmmov %vm8302_vm1 }
 0x803   :  { %v2925_v7 = vmul.f32 %v4707_v9, %v2903_v23  ;;  %v2926_v48 = vmul.f32 %v2911_v28, %v8241_v12  ;;  %v3054_v52 = vadd.f32 %v3038_v18, %v3022_v25  ;;  %v2408_v18 = vsel %vm608_vm4, %v7023_v13, %v2400_v20  ;;  %vm8292_vm4 = vmmov %vm8278_vm2 }
 0x804   :  { %v2623_v23 = vmul.f32 %v6789_v33, %v8284_v15  ;;  %v2755_v63 = vmul.f32 %v8067_v5, %v6582_v39  ;;  %vm8308_vm2 = vmmov %vm8302_vm1 }
 0x805   :  { %v2941_v14 = vmul.f32 %v2925_v7, %v8280_v21  ;;  %v2942_v43 = vmul.f32 %v2926_v48, %v8280_v21 }
 0x807   :  { %v7071_v53 = vadd.f32 %v3053_v29, %v2941_v14  ;;  %v7073_v8 = vadd.f32 %v3054_v52, %v2942_v43  ;;  %v8287_v52 = vld [vmem:[#allocation15_spill] sm:$0xff] }
 0x808   :  { %v2544_v58 = vpop.permute.xlu1 %2543 }
 0x809   :  { %v2320_v56 = vpop.permute.xlu0 %2319  ;;  %v3091_v32 = vadd.f32 %v7073_v8, %v7071_v53 }
 0x80a   :  { %v2736_v37 = vpop.permute.xlu2 %2735  ;;  %v2328_v40 = vsel %vm8282_vm8, %v7033_v55, %v2320_v56  ;;  %v2336_v0 = vsel %vm8283_vm0, %v2320_v56, %v7033_v55  ;;  %vm8310_vm8 = vmmov %vm8302_vm1 }
 0x80b   :  { %3092 = vadd.xlane.f32.xlu0 %v3091_v32  ;;  %v2351_v20 = vmul.f32 %v2336_v0, %v8101_v19  ;;  %v2352_v13 = vmul.f32 %v8099_v30, %v2328_v40  ;;  %v2676_v19 = vmul.f32 %v4726_v31, %v6530_v44  ;;  %v2447_v32 = vmul.f32 %v2431_v46, %v8287_v52  ;;  %v8296_v46 = vld [vmem:[#allocation51_spill] sm:$0xff]  ;;  %vm8318_vm0 = vmmov %vm8302_vm1 }
 0x810   :  { %v2656_v4 = vpop.permute.xlu1 %2655 }
 0x811   :  { %v2464_v35 = vpop.permute.xlu0 %2463  ;;  %v2664_v28 = vsel %vm8285_vm3, %v2640_v42, %v2656_v4 }
 0x812   :  { %v7079_v10 = vpop.permute.xlu2 %2871  ;;  %v2496_v38 = vsel %vm721_vm6, %v2480_v60, %v2464_v35  ;;  %v2488_v55 = vsel %vm721_vm6, %v2464_v35, %v2480_v60  ;;  %v2624_v60 = vmul.f32 %v6814_v57, %v8284_v15  ;;  %v2687_v14 = vmul.f32 %v4707_v9, %v2664_v28  ;;  %vm8293_vm6 = vmmov %vm8272_vm7 }
 0x813   :  { %3089 = vadd.xlane.f32.xlu0 %v3088_v59  ;;  %v2511_v21 = vmul.f32 %v2496_v38, %v8097_v54  ;;  %v2512_v43 = vmul.f32 %v4726_v31, %v2488_v55  ;;  %v2448_v54 = vmul.f32 %v2408_v18, %v8287_v52  ;;  %v8295_v38 = vld [vmem:[#allocation46_spill] sm:$0xff]  ;;  %vm8303_vm14 = vmmov %vm8293_vm6 }
 0x814   :  { %v2703_v39 = vmul.f32 %v2687_v14, %v8291_v36  ;;  %v8298_v14 = vld [vmem:[#allocation117_spill] sm:$0xff]  ;;  %vm8304_vm15 = vmmov %vm8293_vm6 }
 0x815   :  { %vm8307_vm7 = vmmov %vm8302_vm1 }
 0x818   :  { %v2800_v6 = vpop.permute.xlu1 %2799 }
 0x819   :  { %v2560_v49 = vpop.permute.xlu0 %2559 }
 0x81a   :  { %v2576_v3 = vsel %vm834_vm5, %v2560_v49, %v2544_v58  ;;  %v2568_v45 = vsel %vm834_vm5, %v2544_v58, %v2560_v49  ;;  %vm8286_vm5 = vmmov %vm8285_vm3  ;;  %v8288_v58 = vld [vmem:[#allocation34_spill] sm:$0xff]  ;;  %v2880_v35 = vpop.permute.xlu2 %2879 }
 0x81b   :  { %v2672_v25 = vsel %vm8286_vm5, %v2656_v4, %v2640_v42  ;;  %v2591_v7 = vmul.f32 %v8067_v5, %v2576_v3  ;;  %v2592_v48 = vmul.f32 %v8099_v30, %v2568_v45  ;;  %v8289_v42 = vld [vmem:[#allocation6_spill] sm:$0xff]  ;;  %vm8319_vm3 = vmmov %vm8318_vm0 }
 0x81c   :  { %v2688_v30 = vmul.f32 %v4726_v31, %v2672_v25  ;;  %v2367_v44 = vmul.f32 %v2351_v20, %v8289_v42  ;;  %v2368_v4 = vmul.f32 %v2352_v13, %v8289_v42  ;;  %v2756_v42 = vmul.f32 %v6586_v34, %v4731_v62 }
 0x81d   :  { %v2607_v56 = vmul.f32 %v2591_v7, %v8288_v58  ;;  %v2608_v31 = vmul.f32 %v2592_v48, %v8288_v58  ;;  %v2991_v48 = vadd.f32 %v2703_v39, %v2623_v23  ;;  %v8299_v23 = vld [vmem:[#allocation119_spill] sm:$0xff] }
 0x81e   :  { %v2704_v0 = vmul.f32 %v2688_v30, %v8291_v36  ;;  %v2959_v25 = vadd.f32 %v2447_v32, %v2367_v44  ;;  %v2692_v30 = vmul.f32 %v2676_v19, %v8298_v14  ;;  %v2771_v44 = vmul.f32 %v2755_v63, %v8299_v23 }
 0x820   :  { %v7090_v1 = vpop.permute.xlu1 %2869  ;;  %v2992_v52 = vadd.f32 %v2704_v0, %v2624_v60  ;;  %v8306_v0 = vld [vmem:[#allocation112_spill] sm:$0xff] }
 0x821   :  { %v2720_v16 = vpop.permute.xlu0 %2719 }
 0x822   :  { %v2744_v33 = vsel %vm1108_vm9, %v2720_v16, %v2736_v37  ;;  %v2752_v29 = vsel %vm1108_vm9, %v2736_v37, %v2720_v16  ;;  %v8290_v37 = vld [vmem:[#allocation23_spill] sm:$0xff]  ;;  %vm8294_vm9 = vmmov %vm8293_vm6 }
 0x823   :  { %v2767_v57 = vmul.f32 %v8067_v5, %v2744_v33  ;;  %v2527_v49 = vmul.f32 %v2511_v21, %v8290_v37  ;;  %v2768_v27 = vmul.f32 %v2752_v29, %v4731_v62  ;;  %v2528_v40 = vmul.f32 %v2512_v43, %v8290_v37 }
 0x824   :  { %v2691_v43 = vmul.f32 %v2675_v2, %v8298_v14  ;;  %v2960_v29 = vadd.f32 %v2448_v54, %v2368_v4 }
 0x825   :  { %v2975_v18 = vadd.f32 %v2607_v56, %v2527_v49  ;;  %v2783_v15 = vmul.f32 %v2767_v57, %v8295_v38  ;;  %v2976_v7 = vadd.f32 %v2608_v31, %v2528_v40  ;;  %v2784_v33 = vmul.f32 %v2768_v27, %v8295_v38  ;;  %v8305_v27 = vld [vmem:[#allocation111_spill] sm:$0xff] }
 0x826   :  { %v2772_v40 = vmul.f32 %v2756_v42, %v8299_v23 }
 0x827   :  { %v3023_v58 = vadd.f32 %v2975_v18, %v2959_v25  ;;  %v3024_v31 = vadd.f32 %v2976_v7, %v2960_v29 }
 0x828   :  { %v2896_v59 = vpop.permute.xlu1 %2895 }
 0x829   :  { %v2816_v3 = vpop.permute.xlu0 %2815  ;;  %v2904_v5 = vsel %vm8292_vm4, %v2880_v35, %v2896_v59  ;;  %v2912_v20 = vsel %vm8297_vm12, %v2896_v59, %v2880_v35  ;;  %v8300_v35 = vld [vmem:[#allocation154_spill] sm:$0xff] }
 0x82a   :  { %v2824_v45 = vsel %vm8293_vm6, %v2800_v6, %v2816_v3  ;;  %v2832_v16 = vsel %vm8294_vm9, %v2816_v3, %v2800_v6  ;;  %v2927_v13 = vmul.f32 %v4707_v9, %v2904_v5  ;;  %v2928_v32 = vmul.f32 %v2912_v20, %v8241_v12 }
 0x82b   :  { %v2848_v28 = vmul.f32 %v4709_v17, %v2832_v16  ;;  %v2863_v55 = vmul.f32 %v2824_v45, %v8296_v46  ;;  %v2979_v5 = vadd.f32 %v2691_v43, %v7094_v22  ;;  %v2980_v22 = vadd.f32 %v2692_v30, %v7083_v11 }
 0x82c   :  { %v2943_v59 = vmul.f32 %v2927_v13, %v8300_v35  ;;  %v2944_v36 = vmul.f32 %v2928_v32, %v8300_v35  ;;  %v8313_v32 = vld [vmem:[#allocation118_spill] sm:$0xff] }
 0x82d   :  { %v2864_v21 = vmul.f32 %v2848_v28, %v8296_v46  ;;  %v3007_v6 = vadd.f32 %v2863_v55, %v2783_v15  ;;  %v2866_v46 = vpop.permute.xlu2 %2865 }
 0x82f   :  { %v3008_v56 = vadd.f32 %v2864_v21, %v2784_v33  ;;  %v3039_v57 = vadd.f32 %v3007_v6, %v2991_v48 }
 0x830   :  { %v2888_v37 = vpop.permute.xlu1 %2887 }
 0x831   :  { %v3040_v49 = vadd.f32 %v3008_v56, %v2992_v52  ;;  %v2804_v2 = vpop.permute.xlu0 %2803  ;;  %v2900_v60 = vsel %vm8301_vm13, %v7079_v10, %v2888_v37  ;;  %v2908_v19 = vsel %vm8302_vm1, %v2888_v37, %v7079_v10  ;;  %v3055_v54 = vadd.f32 %v3039_v57, %v3023_v58  ;;  %v8311_v52 = vld [vmem:[#allocation127_spill] sm:$0xff] }
 0x832   :  { %v2818_v62 = vsel %vm8303_vm14, %v6545_v61, %v2804_v2  ;;  %v2826_v34 = vsel %vm8304_vm15, %v2804_v2, %v6545_v61  ;;  %v2919_v63 = vmul.f32 %v4707_v9, %v2900_v60  ;;  %v2920_v4 = vmul.f32 %v2908_v19, %v8241_v12 }
 0x833   :  { %v2836_v39 = vmul.f32 %v4709_v17, %v2826_v34  ;;  %v2851_v3 = vmul.f32 %v2818_v62, %v8305_v27  ;;  %v3056_v10 = vadd.f32 %v3040_v49, %v3024_v31  ;;  %v7193_v38 = vadd.f32 %v3055_v54, %v2943_v59  ;;  %v8315_v31 = vld [vmem:[#allocation126_spill] sm:$0xff]  ;;  %v8316_v59 = vld [vmem:[#allocation120_spill] sm:$0xff] }
 0x834   :  { %v2935_v45 = vmul.f32 %v2919_v63, %v8306_v0  ;;  %v2936_v16 = vmul.f32 %v2920_v4, %v8306_v0  ;;  %v8317_v49 = vld [vmem:[#allocation124_spill] sm:$0xff] }
 0x835   :  { %v2852_v61 = vmul.f32 %v2836_v39, %v8305_v27  ;;  %v2995_v18 = vadd.f32 %v2851_v3, %v2771_v44  ;;  %v7195_v15 = vadd.f32 %v3056_v10, %v2944_v36  ;;  %v2884_v19 = vpop.permute.xlu2 %2883  ;;  %v8320_v39 = vld [vmem:[#allocation125_spill] sm:$0xff] }
 0x836   :  { %v7198_v17 = vadd.f32 %v6803_v26, %v2935_v45  ;;  %v7201_v28 = vadd.f32 %v6812_v24, %v2936_v16  ;;  %v8321_v45 = vld [vmem:[#allocation39_spill] sm:$0xff] }
 0x837   :  { %v2996_v55 = vadd.f32 %v2852_v61, %v2772_v40  ;;  %v3027_v25 = vadd.f32 %v2995_v18, %v2979_v5  ;;  %v3094_v7 = vadd.f32 %v7195_v15, %v7193_v38  ;;  %v8322_v61 = vld [vmem:[#allocation114_spill] sm:$0xff]  ;;  %v8323_v18 = vld [vmem:[#allocation132_spill] sm:$0xff] }
 0x838   :  { %v2882_v20 = vpop.permute.xlu1 %2881  ;;  %v3082_v13 = vadd.f32 %v7201_v28, %v7198_v17 }
 0x839   :  { %v3028_v48 = vadd.f32 %v2996_v55, %v2980_v22  ;;  %v2886_v33 = vpop.permute.xlu0 %2885  ;;  %v2897_v26 = vsel %vm8307_vm7, %v2866_v46, %v2882_v20  ;;  %v2905_v24 = vsel %vm8308_vm2, %v2882_v20, %v2866_v46  ;;  %3095 = vadd.xlane.f32.xlu1 %v3094_v7  ;;  %v3043_v11 = vadd.f32 %v3027_v25, %v6572_v51  ;;  %v8312_v51 = vld [vmem:[#allocation121_spill] sm:$0xff] }
 0x83a   :  { %v2899_v21 = vsel %vm8309_vm10, %v7090_v1, %v2886_v33  ;;  %v2907_v6 = vsel %vm8310_vm8, %v2886_v33, %v7090_v1  ;;  %v2913_v14 = vmul.f32 %v4707_v9, %v2897_v26  ;;  %v2914_v43 = vmul.f32 %v2905_v24, %v8241_v12  ;;  %3083 = vadd.xlane.f32.xlu2 %v3082_v13  ;;  %v8314_v1 = vld [vmem:[#allocation134_spill] sm:$0xff] }
 0x83b   :  { %v2917_v30 = vmul.f32 %v4707_v9, %v2899_v21  ;;  %v2918_v29 = vmul.f32 %v2907_v6, %v8241_v12  ;;  %v3044_v58 = vadd.f32 %v3028_v48, %v8311_v52 }
 0x83c   :  { %v2929_v56 = vmul.f32 %v2913_v14, %v8312_v51  ;;  %v2930_v57 = vmul.f32 %v2914_v43, %v8312_v51 }
 0x83d   :  { %v2933_v42 = vmul.f32 %v2917_v30, %v8313_v32  ;;  %v2934_v23 = vmul.f32 %v2918_v29, %v8313_v32 }
 0x83e   :  { %v7229_v44 = vadd.f32 %v8314_v1, %v2929_v56  ;;  %v7232_v35 = vadd.f32 %v8315_v31, %v2930_v57 }
 0x83f   :  { %v7235_v37 = vadd.f32 %v8316_v59, %v2933_v42  ;;  %v7238_v2 = vadd.f32 %v8317_v49, %v2934_v23 }
 0x840   :  { %v3073_v60 = vadd.f32 %v7232_v35, %v7229_v44 }
 0x841   :  { %v2868_v54 = vpop.permute.xlu0 %2867  ;;  %v3079_v62 = vadd.f32 %v7238_v2, %v7235_v37 }
 0x842   :  { %v2898_v34 = vsel %vm8318_vm0, %v2868_v54, %v2884_v19  ;;  %v2906_v63 = vsel %vm8319_vm3, %v2884_v19, %v2868_v54  ;;  %3074 = vadd.xlane.f32.xlu0 %v3073_v60 }
 0x843   :  { %v2915_v4 = vmul.f32 %v4707_v9, %v2898_v34  ;;  %v2916_v36 = vmul.f32 %v2906_v63, %v8241_v12  ;;  %3080 = vadd.xlane.f32.xlu1 %v3079_v62 }
 0x845   :  { %v2931_v27 = vmul.f32 %v2915_v4, %v8320_v39  ;;  %v2932_v3 = vmul.f32 %v2916_v36, %v8320_v39 }
 0x847   :  { %v3059_v10 = vadd.f32 %v3043_v11, %v2931_v27  ;;  %v3060_v5 = vadd.f32 %v3044_v58, %v2932_v3 }
 0x849   :  { %v3076_v40 = vadd.f32 %v3060_v5, %v3059_v10 }
 0x84b   :  { %3077 = vadd.xlane.f32.xlu1 %v3076_v40 }
 0x86a   :  { %v3087_v0 = vpop.xlane.xlu2 %3086 }
 0x86b   :  { %v3101_v16 = vmul.f32 %v3087_v0, %v8321_v45 }
 0x86d   :  { %v7254_v47 = vsub.f32 %v8322_v61, %v3101_v16  ;;  %v7257_v22 = vsub.f32 %v8323_v18, %v3101_v16 }
 0x86f   :  { %v3129_v9 = vmul.f32 %v7254_v47, %v7254_v47  ;;  %v3130_v12 = vmul.f32 %v7257_v22, %v7257_v22 }
 0x871   :  { %v3149_v46 = vadd.f32 %v3130_v12, %v3129_v9 }
 0x873   :  { %3150 = vadd.xlane.f32.xlu1 %v3149_v46 }
 0x87e   :  { %v3093_v55 = vpop.xlane.xlu0 %3092 }
 0x87f   :  { %v3103_v25 = vmul.f32 %v3093_v55, %v8321_v45 }
 0x881   :  { %v7265_v7 = vsub.f32 %v7071_v53, %v3103_v25  ;;  %v7268_v20 = vsub.f32 %v7073_v8, %v3103_v25 }
 0x883   :  { %v3133_v13 = vmul.f32 %v7265_v7, %v7265_v7  ;;  %v3134_v48 = vmul.f32 %v7268_v20, %v7268_v20 }
 0x885   :  { %v3155_v33 = vadd.f32 %v3134_v48, %v3133_v13 }
 0x886   :  { %v3090_v26 = vpop.xlane.xlu0 %3089 }
 0x887   :  { %v3102_v24 = vmul.f32 %v3090_v26, %v8321_v45  ;;  %3156 = vadd.xlane.f32.xlu2 %v3155_v33 }
 0x889   :  { %v7276_v11 = vsub.f32 %v6989_v50, %v3102_v24  ;;  %v7279_v53 = vsub.f32 %v6991_v41, %v3102_v24 }
 0x88b   :  { %v3131_v8 = vmul.f32 %v7276_v11, %v7276_v11  ;;  %v3132_v21 = vmul.f32 %v7279_v53, %v7279_v53 }
 0x88d   :  { %v3152_v6 = vadd.f32 %v3132_v21, %v3131_v8 }
 0x88f   :  { %3153 = vadd.xlane.f32.xlu2 %v3152_v6 }
 0x8ac   :  { %v3096_v14 = vpop.xlane.xlu1 %3095 }
 0x8ad   :  { %v3104_v43 = vmul.f32 %v3096_v14, %v8321_v45  ;;  %v3084_v30 = vpop.xlane.xlu2 %3083 }
 0x8ae   :  { %v3100_v29 = vmul.f32 %v3084_v30, %v8321_v45 }
 0x8af   :  { %v7288_v50 = vsub.f32 %v7193_v38, %v3104_v43  ;;  %v7291_v41 = vsub.f32 %v7195_v15, %v3104_v43 }
 0x8b0   :  { %v7294_v52 = vsub.f32 %v7198_v17, %v3100_v29  ;;  %v7297_v58 = vsub.f32 %v7201_v28, %v3100_v29 }
 0x8b1   :  { %v3135_v51 = vmul.f32 %v7288_v50, %v7288_v50  ;;  %v3136_v56 = vmul.f32 %v7291_v41, %v7291_v41 }
 0x8b2   :  { %v3127_v57 = vmul.f32 %v7294_v52, %v7294_v52  ;;  %v3128_v38 = vmul.f32 %v7297_v58, %v7297_v58 }
 0x8b3   :  { %v3158_v15 = vadd.f32 %v3136_v56, %v3135_v51 }
 0x8b4   :  { %v3146_v32 = vadd.f32 %v3128_v38, %v3127_v57 }
 0x8b5   :  { %3159 = vadd.xlane.f32.xlu0 %v3158_v15  ;;  %v3075_v17 = vpop.xlane.xlu0 %3074 }
 0x8b6   :  { %v3081_v42 = vpop.xlane.xlu1 %3080  ;;  %v3097_v28 = vmul.f32 %v3075_v17, %v8321_v45  ;;  %3147 = vadd.xlane.f32.xlu1 %v3146_v32 }
 0x8b7   :  { %v3099_v23 = vmul.f32 %v3081_v42, %v8321_v45 }
 0x8b8   :  { %v7310_v1 = vsub.f32 %v7229_v44, %v3097_v28  ;;  %v7313_v31 = vsub.f32 %v7232_v35, %v3097_v28 }
 0x8b9   :  { %v7316_v59 = vsub.f32 %v7235_v37, %v3099_v23  ;;  %v7319_v49 = vsub.f32 %v7238_v2, %v3099_v23 }
 0x8ba   :  { %v3121_v60 = vmul.f32 %v7310_v1, %v7310_v1  ;;  %v3122_v19 = vmul.f32 %v7313_v31, %v7313_v31 }
 0x8bb   :  { %v3125_v54 = vmul.f32 %v7316_v59, %v7316_v59  ;;  %v3126_v44 = vmul.f32 %v7319_v49, %v7319_v49 }
 0x8bc   :  { %v3137_v35 = vadd.f32 %v3122_v19, %v3121_v60 }
 0x8bd   :  { %v3143_v62 = vadd.f32 %v3126_v44, %v3125_v54 }
 0x8be   :  { %v3078_v34 = vpop.xlane.xlu1 %3077  ;;  %3138 = vadd.xlane.f32.xlu2 %v3137_v35 }
 0x8bf   :  { %v3098_v37 = vmul.f32 %v3078_v34, %v8321_v45  ;;  %3144 = vadd.xlane.f32.xlu0 %v3143_v62 }
 0x8c1   :  { %v7330_v2 = vsub.f32 %v3059_v10, %v3098_v37  ;;  %v7332_v63 = vsub.f32 %v3060_v5, %v3098_v37 }
 0x8c3   :  { %v3123_v4 = vmul.f32 %v7330_v2, %v7330_v2  ;;  %v3124_v36 = vmul.f32 %v7332_v63, %v7332_v63 }
 0x8c5   :  { %v3140_v39 = vadd.f32 %v3124_v36, %v3123_v4 }
 0x8c7   :  { %3141 = vadd.xlane.f32.xlu0 %v3140_v39 }
 0x8e6   :  { %v3151_v3 = vpop.xlane.xlu1 %3150 }
 0x8e7   :  { %v3165_v0 = vmul.f32 %v3151_v3, %v8321_v45 }
 0x8e9   :  { %v3173_v10 = vadd.f32 1e-05, %v3165_v0 }
 0x8eb   :  { %vm3223_vm9 = vweird.f32 %v3173_v10 }
 0x8fa   :  { %v3157_v27 = vpop.xlane.xlu2 %3156 }
 0x8fb   :  { %v3167_v40 = vmul.f32 %v3157_v27, %v8321_v45 }
 0x8fd   :  { %v3175_v61 = vadd.f32 1e-05, %v3167_v40 }
 0x8ff   :  { %3682 = vrsqrt.f32 %v3175_v61  ;;  %vm3243_vm6 = vweird.f32 %v3175_v61 }
 0x900   :  { %3684 = vrsqrt.f32 %v3173_v10 }
 0x902   :  { %v3154_v16 = vpop.xlane.xlu2 %3153 }
 0x903   :  { %v3166_v5 = vmul.f32 %v3154_v16, %v8321_v45 }
 0x905   :  { %v3174_v18 = vadd.f32 1e-05, %v3166_v5  ;;  %v3683_v9 = vpop.eup %3682 }
 0x906   :  { %v3685_v12 = vpop.eup %3684  ;;  %v3238_v46 = vmul.f32 %v3683_v9, %v3175_v61  ;;  %vm3244_vm5 = vweird.f32 %v3683_v9 }
 0x907   :  { %3686 = vrsqrt.f32 %v3174_v18  ;;  %v3218_v55 = vmul.f32 %v3685_v12, %v3173_v10  ;;  %vm3224_vm4 = vweird.f32 %v3685_v12  ;;  %vm3245_vm12 = vmor %vm3243_vm6, %vm3244_vm5  ;;  %vm3233_vm14 = vweird.f32 %v3174_v18 }
 0x908   :  { %v3239_v13 = vmul.f32 %v3683_v9, %v3238_v46  ;;  %vm3225_vm13 = vmor %vm3223_vm9, %vm3224_vm4 }
 0x909   :  { %v3219_v48 = vmul.f32 %v3685_v12, %v3218_v55 }
 0x90a   :  { %v3240_v26 = vmul.f32 0.5, %v3239_v13 }
 0x90b   :  { %v3220_v24 = vmul.f32 0.5, %v3219_v48 }
 0x90c   :  { %v3241_v21 = vsub.f32 1.5, %v3240_v26 }
 0x90d   :  { %v3687_v25 = vpop.eup %3686  ;;  %v3221_v14 = vsub.f32 1.5, %v3220_v24 }
 0x90e   :  { %v3228_v33 = vmul.f32 %v3687_v25, %v3174_v18  ;;  %v3242_v57 = vmul.f32 %v3683_v9, %v3241_v21  ;;  %vm3234_vm1 = vweird.f32 %v3687_v25 }
 0x90f   :  { %v3222_v15 = vmul.f32 %v3685_v12, %v3221_v14  ;;  %vm3235_vm15 = vmor %vm3233_vm14, %vm3234_vm1 }
 0x910   :  { %v3229_v8 = vmul.f32 %v3687_v25, %v3228_v33  ;;  %v3246_v17 = vsel %vm3245_vm12, %v3683_v9, %v3242_v57 }
 0x911   :  { %v3226_v23 = vsel %vm3225_vm13, %v3685_v12, %v3222_v15  ;;  %v3269_v35 = vmul.f32 %v3246_v17, %v7265_v7  ;;  %v3270_v7 = vmul.f32 %v3246_v17, %v7268_v20 }
 0x912   :  { %v3230_v43 = vmul.f32 0.5, %v3229_v8  ;;  %v7352_v4 = vmul.f32 %v3226_v23, %v7254_v47  ;;  %v7358_v3 = vmul.f32 %v3226_v23, %v7257_v22 }
 0x913   :  { %v3301_v16 = vmul.f32 0.2, %v3269_v35  ;;  %vm3285_vm7 = vcmp.ge.f32.partialorder %v3269_v35, 0.0  ;;  %vm3286_vm10 = vcmp.ge.f32.partialorder %v3270_v7, 0.0 }
 0x914   :  { %v3231_v32 = vsub.f32 1.5, %v3230_v43  ;;  %v3297_v5 = vmul.f32 0.2, %v7352_v4  ;;  %v3298_v18 = vmul.f32 0.2, %v7358_v3  ;;  %vm3281_vm8 = vcmp.ge.f32.partialorder %v7352_v4, 0.0 }
 0x915   :  { %vm3282_vm0 = vcmp.ge.f32.partialorder %v7358_v3, 0.0  ;;  %v3317_v55 = vsel %vm3285_vm7, %v3269_v35, %v3301_v16 }
 0x916   :  { %v3232_v42 = vmul.f32 %v3687_v25, %v3231_v32 }
 0x918   :  { %v3236_v27 = vsel %vm3235_vm15, %v3687_v25, %v3232_v42 }
 0x919   :  { %v3267_v47 = vmul.f32 %v3236_v27, %v7276_v11  ;;  %v3268_v20 = vmul.f32 %v3236_v27, %v7279_v53  ;;  %v3302_v11 = vmul.f32 0.2, %v3270_v7 }
 0x91b   :  { %vm3283_vm4 = vcmp.ge.f32.partialorder %v3267_v47, 0.0  ;;  %v3299_v24 = vmul.f32 0.2, %v3267_v47  ;;  %vm3284_vm13 = vcmp.ge.f32.partialorder %v3268_v20, 0.0 }
 0x91d   :  { %v3315_v15 = vsel %vm3283_vm4, %v3267_v47, %v3299_v24 }
 0x928   :  { %v3160_v6 = vpop.xlane.xlu0 %3159 }
 0x929   :  { %v3168_v30 = vmul.f32 %v3160_v6, %v8321_v45  ;;  %v3148_v29 = vpop.xlane.xlu1 %3147  ;;  %v3300_v6 = vmul.f32 0.2, %v3268_v20 }
 0x92a   :  { %v3164_v51 = vmul.f32 %v3148_v29, %v8321_v45 }
 0x92b   :  { %v3176_v56 = vadd.f32 1e-05, %v3168_v30  ;;  %v3316_v42 = vsel %vm3284_vm13, %v3268_v20, %v3300_v6 }
 0x92c   :  { %v7343_v38 = vadd.f32 1e-05, %v3164_v51  ;;  %v3318_v51 = vsel %vm3286_vm10, %v3270_v7, %v3302_v11 }
 0x92d   :  { %3688 = vrsqrt.f32 %v3176_v56  ;;  %vm3253_vm3 = vweird.f32 %v3176_v56 }
 0x92e   :  { %3690 = vrsqrt.f32 %v7343_v38  ;;  %vm3213_vm9 = vweird.f32 %v7343_v38 }
 0x931   :  { %v3139_v28 = vpop.xlane.xlu2 %3138 }
 0x932   :  { %v3145_v60 = vpop.xlane.xlu0 %3144  ;;  %v3161_v19 = vmul.f32 %v3139_v28, %v8321_v45 }
 0x933   :  { %v3689_v54 = vpop.eup %3688  ;;  %v3163_v44 = vmul.f32 %v3145_v60, %v8321_v45 }
 0x934   :  { %v3691_v62 = vpop.eup %3690  ;;  %v3248_v34 = vmul.f32 %v3689_v54, %v3176_v56  ;;  %v7349_v37 = vadd.f32 1e-05, %v3161_v19  ;;  %vm3254_vm2 = vweird.f32 %v3689_v54 }
 0x935   :  { %v3208_v36 = vmul.f32 %v3691_v62, %v7343_v38  ;;  %v7355_v39 = vadd.f32 1e-05, %v3163_v44  ;;  %vm3214_vm5 = vweird.f32 %v3691_v62  ;;  %vm3255_vm6 = vmor %vm3253_vm3, %vm3254_vm2 }
 0x936   :  { %v3249_v40 = vmul.f32 %v3689_v54, %v3248_v34  ;;  %3692 = vrsqrt.f32 %v7349_v37  ;;  %vm3215_vm12 = vmor %vm3213_vm9, %vm3214_vm5  ;;  %v3314_v34 = vsel %vm3282_vm0, %v7358_v3, %v3298_v18  ;;  %vm3183_vm3 = vweird.f32 %v7349_v37 }
 0x937   :  { %v3209_v0 = vmul.f32 %v3691_v62, %v3208_v36  ;;  %3694 = vrsqrt.f32 %v7355_v39  ;;  %vm3203_vm7 = vweird.f32 %v7355_v39 }
 0x938   :  { %v3250_v61 = vmul.f32 0.5, %v3249_v40 }
 0x939   :  { %v3210_v10 = vmul.f32 0.5, %v3209_v0 }
 0x93a   :  { %v3251_v22 = vsub.f32 1.5, %v3250_v61  ;;  %v3142_v9 = vpop.xlane.xlu0 %3141 }
 0x93b   :  { %v3211_v12 = vsub.f32 1.5, %v3210_v10  ;;  %v3162_v46 = vmul.f32 %v3142_v9, %v8321_v45 }
 0x93c   :  { %v7370_v25 = vpop.eup %3692  ;;  %v3252_v13 = vmul.f32 %v3689_v54, %v3251_v22 }
 0x93d   :  { %v3695_v48 = vpop.eup %3694  ;;  %v3212_v33 = vmul.f32 %v3691_v62, %v3211_v12  ;;  %v3178_v53 = vmul.f32 %v7370_v25, %v7349_v37  ;;  %v7375_v26 = vadd.f32 1e-05, %v3162_v46  ;;  %vm3184_vm2 = vweird.f32 %v7370_v25 }
 0x93e   :  { %v3198_v8 = vmul.f32 %v3695_v48, %v7355_v39  ;;  %v3256_v21 = vsel %vm3255_vm6, %v3689_v54, %v3252_v13  ;;  %vm3204_vm15 = vweird.f32 %v3695_v48  ;;  %v3326_v39 = vpack.c.bf16 %v3316_v42, %v3314_v34 }
 0x93f   :  { %v3179_v14 = vmul.f32 %v7370_v25, %v3178_v53  ;;  %3696 = vrsqrt.f32 %v7375_v26  ;;  %v3271_v43 = vmul.f32 %v3256_v21, %v7288_v50  ;;  %v3272_v29 = vmul.f32 %v3256_v21, %v7291_v41  ;;  %vm3205_vm10 = vmor %vm3203_vm7, %vm3204_vm15 }
 0x940   :  { %v3199_v30 = vmul.f32 %v3695_v48, %v3198_v8  ;;  %v3216_v56 = vsel %vm3215_vm12, %v3691_v62, %v3212_v33  ;;  %v3313_v62 = vsel %vm3281_vm8, %v7352_v4, %v3297_v5  ;;  %vm3185_vm8 = vmor %vm3183_vm3, %vm3184_vm2  ;;  %vm3193_vm12 = vweird.f32 %v7375_v26 }
 0x941   :  { %v3180_v57 = vmul.f32 0.5, %v3179_v14  ;;  %vm3287_vm1 = vcmp.ge.f32.partialorder %v3271_v43, 0.0  ;;  %v3303_v38 = vmul.f32 0.2, %v3271_v43  ;;  %vm3288_vm14 = vcmp.ge.f32.partialorder %v3272_v29, 0.0 }
 0x942   :  { %v3200_v32 = vmul.f32 0.5, %v3199_v30  ;;  %v3304_v17 = vmul.f32 0.2, %v3272_v29  ;;  %v3263_v50 = vmul.f32 %v3216_v56, %v7294_v52  ;;  %v3264_v54 = vmul.f32 %v3216_v56, %v7297_v58 }
 0x943   :  { %v3181_v28 = vsub.f32 1.5, %v3180_v57  ;;  %v3319_v23 = vsel %vm3287_vm1, %v3271_v43, %v3303_v38  ;;  %v3325_v58 = vpack.c.bf16 %v3315_v15, %v3313_v62 }
 0x944   :  { %v3201_v60 = vsub.f32 1.5, %v3200_v32  ;;  %v3327_v19 = vpack.c.bf16 %v3319_v23, %v3317_v55  ;;  %v3320_v41 = vsel %vm3288_vm14, %v3272_v29, %v3304_v17  ;;  %v3295_v7 = vmul.f32 0.2, %v3263_v50 }
 0x945   :  { %v3697_v44 = vpop.eup %3696  ;;  %v3328_v35 = vpack.c.bf16 %v3320_v41, %v3318_v51  ;;  %v3182_v52 = vmul.f32 %v7370_v25, %v3181_v28  ;;  %v3296_v0 = vmul.f32 0.2, %v3264_v54  ;;  %vm3279_vm0 = vcmp.ge.f32.partialorder %v3263_v50, 0.0 }
 0x946   :  { %v3202_v36 = vmul.f32 %v3695_v48, %v3201_v60  ;;  %v3188_v27 = vmul.f32 %v3697_v44, %v7375_v26  ;;  %3333 = vmatpush.bf16.msrb.mxu0 %v3327_v19  ;;  %vm3280_vm5 = vcmp.ge.f32.partialorder %v3264_v54, 0.0  ;;  %vm3194_vm9 = vweird.f32 %v3697_v44 }
 0x947   :  { %3352 = vmatpush.bf16.msrb.mxu1 %v3328_v35  ;;  %v3186_v47 = vsel %vm3185_vm8, %v7370_v25, %v3182_v52  ;;  %v3311_v18 = vsel %vm3279_vm0, %v3263_v50, %v3295_v7  ;;  %v3312_v22 = vsel %vm3280_vm5, %v3264_v54, %v3296_v0  ;;  %vm3195_vm13 = vmor %vm3193_vm12, %vm3194_vm9 }
 0x948   :  { %v3189_v4 = vmul.f32 %v3697_v44, %v3188_v27  ;;  %v3206_v40 = vsel %vm3205_vm10, %v3695_v48, %v3202_v36 }
 0x949   :  { %v3261_v3 = vmul.f32 %v3206_v40, %v7316_v59  ;;  %v3262_v16 = vmul.f32 %v3206_v40, %v7319_v49  ;;  %v3257_v59 = vmul.f32 %v3186_v47, %v7310_v1  ;;  %v3258_v49 = vmul.f32 %v3186_v47, %v7313_v31 }
 0x94a   :  { %v3190_v61 = vmul.f32 0.5, %v3189_v4  ;;  %3334 = vmatpush.bf16.msrb.mxu0 %v3325_v58 }
 0x94b   :  { %3353 = vmatpush.bf16.msrb.mxu1 %v3326_v39  ;;  %vm3277_vm4 = vcmp.ge.f32.partialorder %v3261_v3, 0.0  ;;  %v3293_v37 = vmul.f32 0.2, %v3261_v3  ;;  %vm3278_vm6 = vcmp.ge.f32.partialorder %v3262_v16, 0.0  ;;  %v3294_v10 = vmul.f32 0.2, %v3262_v16 }
 0x94c   :  { %v3191_v5 = vsub.f32 1.5, %v3190_v61  ;;  %v3289_v13 = vmul.f32 0.2, %v3257_v59  ;;  %v3290_v33 = vmul.f32 0.2, %v3258_v49  ;;  %vm3273_vm1 = vcmp.ge.f32.partialorder %v3257_v59, 0.0 }
 0x94d   :  { %v3309_v9 = vsel %vm3277_vm4, %v3261_v3, %v3293_v37  ;;  %v3310_v20 = vsel %vm3278_vm6, %v3262_v16, %v3294_v10  ;;  %vm3274_vm14 = vcmp.ge.f32.partialorder %v3258_v49, 0.0 }
 0x94e   :  { %v3192_v12 = vmul.f32 %v3697_v44, %v3191_v5  ;;  %v3323_v46 = vpack.c.bf16 %v3311_v18, %v3309_v9  ;;  %v3324_v55 = vpack.c.bf16 %v3312_v22, %v3310_v20  ;;  %v3305_v53 = vsel %vm3273_vm1, %v3257_v59, %v3289_v13 }
 0x94f   :  { %v3306_v24 = vsel %vm3274_vm14, %v3258_v49, %v3290_v33 }
 0x950   :  { %3335 = vmatpush.bf16.msrb.mxu0 %v3323_v46  ;;  %3354 = vmatpush.bf16.msrb.mxu1 %v3324_v55  ;;  %v3196_v11 = vsel %vm3195_vm13, %v3697_v44, %v3192_v12 }
 0x951   :  { %v3259_v25 = vmul.f32 %v3196_v11, %v7330_v2  ;;  %v3260_v48 = vmul.f32 %v3196_v11, %v7332_v63  ;;  %v3726_v2 = vld [vmem:[%s7506_s3] sm:$0xff]  ;;  %v3727_v63 = vld [vmem:[%s7506_s3 + $0x8] sm:$0xff] }
 0x953   :  { %vm3275_vm15 = vcmp.ge.f32.partialorder %v3259_v25, 0.0  ;;  %v3291_v1 = vmul.f32 0.2, %v3259_v25  ;;  %vm3276_vm7 = vcmp.ge.f32.partialorder %v3260_v48, 0.0  ;;  %v3292_v31 = vmul.f32 0.2, %v3260_v48 }
 0x955   :  { %v3307_v26 = vsel %vm3275_vm15, %v3259_v25, %v3291_v1  ;;  %v3308_v8 = vsel %vm3276_vm7, %v3260_v48, %v3292_v31 }
 0x956   :  { %v3321_v21 = vpack.c.bf16 %v3307_v26, %v3305_v53  ;;  %v3322_v6 = vpack.c.bf16 %v3308_v8, %v3306_v24 }
 0x958   :  { %3336 = vmatpush.bf16.msrb.mxu0 %v3321_v21  ;;  %3355 = vmatpush.bf16.msrb.mxu1 %v3322_v6 }
 0x95b   :  { %3546 = vmatmul.msk.bf16.vlgmr.msrb.gmra.mxu0 %vm1809_vm11, %v3726_v2  ;;  %3548 = vmatmul.msk.bf16.vlgmr.msrb.gmra.mxu1 %vm1809_vm11, %v3726_v2 }
 0x96b   :  { %3547 = vmatmul.msk.bf16.gmra.mxu0 %vm1809_vm11, %v3727_v63  ;;  %3549 = vmatmul.msk.bf16.gmra.mxu1 %vm1809_vm11, %v3727_v63 }
 0x9d8   :  { %v3338_v14 = vpop.f32.mrf.mxu0  ;;  %v3357_v43 = vpop.f32.mrf.mxu1 }
 0x9d9   :  { %v3367_v30 = vadd.f32 %v3357_v43, %v3338_v14 }
 0x9db   :  { %3368 = vadd.xlane.f32.xlu1 %v3367_v30  ;;  %v3729_v30 = vld [vmem:[%s7504_s0 + $0x48] sm:$0xff] }
 0x9e0   :  { %v3340_v29 = vpop.f32.mrf.mxu0  ;;  %v3359_v51 = vpop.f32.mrf.mxu1 }
 0x9e1   :  { %v3370_v56 = vadd.f32 %v3359_v51, %v3340_v29 }
 0x9e3   :  { %3371 = vadd.xlane.f32.xlu2 %v3370_v56 }
 0x9e8   :  { %v3343_v57 = vpop.f32.mrf.mxu0  ;;  %v3362_v38 = vpop.f32.mrf.mxu1 }
 0x9e9   :  { %v3373_v15 = vadd.f32 %v3362_v38, %v3343_v57 }
 0x9eb   :  { %3374 = vadd.xlane.f32.xlu0 %v3373_v15 }
 0x9f0   :  { %v3345_v32 = vpop.f32.mrf.mxu0  ;;  %v3364_v17 = vpop.f32.mrf.mxu1 }
 0x9f1   :  { %v3376_v42 = vadd.f32 %v3364_v17, %v3345_v32 }
 0x9f3   :  { %3377 = vadd.xlane.f32.xlu1 %v3376_v42 }
 0xa4e   :  { %v3369_v28 = vpop.xlane.xlu1 %3368 }
 0xa4f   :  { %v3379_v23 = vmul.f32 %v3369_v28, %v8321_v45 }
 0xa51   :  { %v3383_v50 = vsub.f32 %v3338_v14, %v3379_v23  ;;  %v3384_v60 = vsub.f32 %v3357_v43, %v3379_v23  ;;  %v3728_v14 = vld [vmem:[%s7504_s0 + $0x40] sm:$0xff] }
 0xa53   :  { %v3391_v19 = vmul.f32 %v3383_v50, %v3383_v50  ;;  %v3392_v41 = vmul.f32 %v3384_v60, %v3384_v60 }
 0xa55   :  { %v3399_v54 = vadd.f32 %v3392_v41, %v3391_v19  ;;  %v3731_v19 = vld [vmem:[%s7504_s0 + $0x58] sm:$0xff] }
 0xa56   :  { %v3372_v44 = vpop.xlane.xlu2 %3371 }
 0xa57   :  { %v3380_v35 = vmul.f32 %v3372_v44, %v8321_v45  ;;  %3400 = vadd.xlane.f32.xlu2 %v3399_v54 }
 0xa59   :  { %v7419_v62 = vsub.f32 %v3340_v29, %v3380_v35  ;;  %v7421_v34 = vsub.f32 %v3359_v51, %v3380_v35 }
 0xa5b   :  { %v3393_v36 = vmul.f32 %v7419_v62, %v7419_v62  ;;  %v3394_v52 = vmul.f32 %v7421_v34, %v7421_v34 }
 0xa5d   :  { %v3402_v27 = vadd.f32 %v3394_v52, %v3393_v36 }
 0xa5e   :  { %v3375_v58 = vpop.xlane.xlu0 %3374 }
 0xa5f   :  { %v3381_v39 = vmul.f32 %v3375_v58, %v8321_v45  ;;  %3403 = vadd.xlane.f32.xlu0 %v3402_v27 }
 0xa61   :  { %v7428_v4 = vsub.f32 %v3343_v57, %v3381_v39  ;;  %v7430_v40 = vsub.f32 %v3362_v38, %v3381_v39  ;;  %v3732_v39 = vld [vmem:[%s7504_s0 + $0x60] sm:$0xff] }
 0xa63   :  { %v3395_v7 = vmul.f32 %v7428_v4, %v7428_v4  ;;  %v3396_v0 = vmul.f32 %v7430_v40, %v7430_v40 }
 0xa65   :  { %v3405_v3 = vadd.f32 %v3396_v0, %v3395_v7  ;;  %v3733_v0 = vld [vmem:[%s7504_s0 + $0x68] sm:$0xff] }
 0xa66   :  { %v3378_v16 = vpop.xlane.xlu1 %3377 }
 0xa67   :  { %v3382_v61 = vmul.f32 %v3378_v16, %v8321_v45  ;;  %3406 = vadd.xlane.f32.xlu1 %v3405_v3 }
 0xa69   :  { %v7437_v47 = vsub.f32 %v3345_v32, %v3382_v61  ;;  %v7439_v37 = vsub.f32 %v3364_v17, %v3382_v61 }
 0xa6b   :  { %v3397_v10 = vmul.f32 %v7437_v47, %v7437_v47  ;;  %v3398_v5 = vmul.f32 %v7439_v37, %v7439_v37 }
 0xa6d   :  { %v3408_v18 = vadd.f32 %v3398_v5, %v3397_v10  ;;  %v3734_v5 = vld [vmem:[%s7504_s0 + $0x70] sm:$0xff] }
 0xa6f   :  { %3409 = vadd.xlane.f32.xlu2 %v3408_v18 }
 0xaca   :  { %v3401_v22 = vpop.xlane.xlu2 %3400 }
 0xacb   :  { %v3411_v9 = vmul.f32 %v3401_v22, %v8321_v45  ;;  %v3735_v22 = vld [vmem:[%s7504_s0 + $0x78] sm:$0xff] }
 0xacd   :  { %v3415_v20 = vadd.f32 1e-05, %v3411_v9 }
 0xacf   :  { %3698 = vrsqrt.f32 %v3415_v20  ;;  %vm3425_vm2 = vweird.f32 %v3415_v20 }
 0xad2   :  { %v3404_v59 = vpop.xlane.xlu0 %3403 }
 0xad3   :  { %v3412_v49 = vmul.f32 %v3404_v59, %v8321_v45 }
 0xad5   :  { %v3699_v12 = vpop.eup %3698  ;;  %v3416_v46 = vadd.f32 1e-05, %v3412_v49 }
 0xad6   :  { %v3420_v55 = vmul.f32 %v3699_v12, %v3415_v20  ;;  %vm3426_vm11 = vweird.f32 %v3699_v12 }
 0xad7   :  { %3700 = vrsqrt.f32 %v3416_v46  ;;  %vm3427_vm10 = vmor %vm3425_vm2, %vm3426_vm11  ;;  %vm3435_vm8 = vweird.f32 %v3416_v46 }
 0xad8   :  { %v3421_v11 = vmul.f32 %v3699_v12, %v3420_v55 }
 0xada   :  { %v3422_v25 = vmul.f32 0.5, %v3421_v11  ;;  %v3407_v13 = vpop.xlane.xlu1 %3406 }
 0xadb   :  { %v3413_v48 = vmul.f32 %v3407_v13, %v8321_v45 }
 0xadc   :  { %v3423_v33 = vsub.f32 1.5, %v3422_v25 }
 0xadd   :  { %v3701_v1 = vpop.eup %3700  ;;  %v3417_v31 = vadd.f32 1e-05, %v3413_v48 }
 0xade   :  { %v3424_v53 = vmul.f32 %v3699_v12, %v3423_v33  ;;  %v3430_v26 = vmul.f32 %v3701_v1, %v3416_v46  ;;  %vm3436_vm3 = vweird.f32 %v3701_v1 }
 0xadf   :  { %3702 = vrsqrt.f32 %v3417_v31  ;;  %vm3437_vm0 = vmor %vm3435_vm8, %vm3436_vm3  ;;  %vm3445_vm4 = vweird.f32 %v3417_v31 }
 0xae0   :  { %v3428_v24 = vsel %vm3427_vm10, %v3699_v12, %v3424_v53  ;;  %v3431_v8 = vmul.f32 %v3701_v1, %v3430_v26 }
 0xae1   :  { %v3459_v21 = vmul.f32 %v3428_v24, %v3383_v50  ;;  %v3460_v6 = vmul.f32 %v3428_v24, %v3384_v60  ;;  %v3730_v50 = vld [vmem:[%s7504_s0 + $0x50] sm:$0xff] }
 0xae2   :  { %v3432_v2 = vmul.f32 0.5, %v3431_v8  ;;  %v3410_v63 = vpop.xlane.xlu2 %3409 }
 0xae3   :  { %v3467_v43 = vadd.f32 %v3728_v14, %v3459_v21  ;;  %v3468_v29 = vadd.f32 %v3729_v30, %v3460_v6  ;;  %v3414_v51 = vmul.f32 %v3410_v63, %v8321_v45 }
 0xae4   :  { %v3433_v56 = vsub.f32 1.5, %v3432_v2 }
 0xae5   :  { %v3703_v57 = vpop.eup %3702  ;;  %3550 = vst [vmem:[%s7507_s4 + $0x40] sm:$0xff] %v3467_v43  ;;  %v3418_v38 = vadd.f32 1e-05, %v3414_v51 }
 0xae6   :  { %3551 = vst [vmem:[%s7507_s4 + $0x48] sm:$0xff] %v3468_v29  ;;  %v3434_v15 = vmul.f32 %v3701_v1, %v3433_v56  ;;  %v3440_v32 = vmul.f32 %v3703_v57, %v3417_v31  ;;  %vm3446_vm5 = vweird.f32 %v3703_v57 }
 0xae7   :  { %3704 = vrsqrt.f32 %v3418_v38  ;;  %vm3447_vm6 = vmor %vm3445_vm4, %vm3446_vm5  ;;  %vm3455_vm12 = vweird.f32 %v3418_v38 }
 0xae8   :  { %v3438_v17 = vsel %vm3437_vm0, %v3701_v1, %v3434_v15  ;;  %v3441_v42 = vmul.f32 %v3703_v57, %v3440_v32 }
 0xae9   :  { %v3461_v45 = vmul.f32 %v3438_v17, %v7419_v62  ;;  %v3462_v28 = vmul.f32 %v3438_v17, %v7421_v34 }
 0xaea   :  { %v3442_v23 = vmul.f32 0.5, %v3441_v42 }
 0xaeb   :  { %v3469_v60 = vadd.f32 %v3730_v50, %v3461_v45  ;;  %v3470_v41 = vadd.f32 %v3731_v19, %v3462_v28 }
 0xaec   :  { %v3443_v54 = vsub.f32 1.5, %v3442_v23 }
 0xaed   :  { %v3705_v44 = vpop.eup %3704  ;;  %3552 = vst [vmem:[%s7507_s4 + $0x50] sm:$0xff] %v3469_v60 }
 0xaee   :  { %3553 = vst [vmem:[%s7507_s4 + $0x58] sm:$0xff] %v3470_v41  ;;  %v3444_v35 = vmul.f32 %v3703_v57, %v3443_v54  ;;  %v3450_v62 = vmul.f32 %v3705_v44, %v3418_v38  ;;  %vm3456_vm9 = vweird.f32 %v3705_v44 }
 0xaef   :  { %vm3457_vm13 = vmor %vm3455_vm12, %vm3456_vm9 }
 0xaf0   :  { %v3448_v34 = vsel %vm3447_vm6, %v3703_v57, %v3444_v35  ;;  %v3451_v36 = vmul.f32 %v3705_v44, %v3450_v62 }
 0xaf1   :  { %v3463_v52 = vmul.f32 %v3448_v34, %v7428_v4  ;;  %v3464_v27 = vmul.f32 %v3448_v34, %v7430_v40 }
 0xaf2   :  { %v3452_v58 = vmul.f32 0.5, %v3451_v36 }
 0xaf3   :  { %v3471_v7 = vadd.f32 %v3732_v39, %v3463_v52  ;;  %v3472_v3 = vadd.f32 %v3733_v0, %v3464_v27 }
 0xaf4   :  { %v3453_v16 = vsub.f32 1.5, %v3452_v58 }
 0xaf5   :  { %3554 = vst [vmem:[%s7507_s4 + $0x60] sm:$0xff] %v3471_v7 }
 0xaf6   :  { %3555 = vst [vmem:[%s7507_s4 + $0x68] sm:$0xff] %v3472_v3  ;;  %v3454_v4 = vmul.f32 %v3705_v44, %v3453_v16 }
 0xaf8   :  { %v3458_v40 = vsel %vm3457_vm13, %v3705_v44, %v3454_v4 }
 0xaf9   :  { %v3465_v61 = vmul.f32 %v3458_v40, %v7437_v47  ;;  %v3466_v10 = vmul.f32 %v3458_v40, %v7439_v37 }
 0xafb   :  { %v3473_v18 = vadd.f32 %v3734_v5, %v3465_v61  ;;  %v3474_v9 = vadd.f32 %v3735_v22, %v3466_v10 }
 0xafd   :  { %3556 = vst [vmem:[%s7507_s4 + $0x70] sm:$0xff] %v3473_v18 }
 0xafe   :  { %3557 = vst [vmem:[%s7507_s4 + $0x78] sm:$0xff] %v3474_v9 }

</bundles_post_ra>
